<compile_context>
chip_gen: v7x
topology: tpu7x:2x2x1
jax: 0.10.0
libtpu: 0.0.40
codegen_flags: <defaults>
</compile_context>

<pallas_src>
import functools

import jax
import jax.numpy as jnp
from jax.experimental import pallas as pl
from jax.experimental.pallas import tpu as pltpu


_PAD = 128   # left halo columns in the VMEM scratch (must be >= W + 1)
_SUB = 16    # per-dy-block channel stride (bf16 sublane tile)


def _round_up(v, m):
    return -(-v // m) * m


# ----------------------------------------------------------------------------
# Fused whole-network kernel (one grid step == one image)
# ----------------------------------------------------------------------------

def _unet_kernel(*refs, features, width):
    L = 4 * len(features) + 2          # number of conv3x3 + BN + ReLU layers
    U = len(features)                  # number of decoder (up) stages

    x_ref, hmask_ref = refs[0], refs[1]
    w3 = refs[2:2 + L]
    b3 = refs[2 + L:2 + 2 * L]
    wu = refs[2 + 2 * L:2 + 2 * L + U]
    bu = refs[2 + 2 * L + U:2 + 2 * L + 2 * U]
    wf_ref = refs[2 + 2 * L + 2 * U]
    bf_ref = refs[3 + 2 * L + 2 * U]
    o_ref = refs[4 + 2 * L + 2 * U]
    xpad_ref = refs[5 + 2 * L + 2 * U]

    hw = x_ref.shape[2]
    out_ch = o_ref.shape[1]
    P = _PAD
    lo, hi = P - 1, P + hw + 1          # union of the three dx read windows
    adt = xpad_ref.dtype                # bf16 MXU operand dtype

    # Post-matmul horizontal-wrap masks (flattened row-major spatial axis).
    mask_l = hmask_ref[0:1, :]          # 0 where w == 0     (dx = -1 reads)
    mask_r = hmask_ref[1:2, :]          # 0 where w == W - 1 (dx = +1 reads)

    def conv3x3_bn_relu(x_val, w_ref, b_ref):
        # x_val: (cin, hw) f32.  w_ref: (3, cout, 3*cin_r) bf16, BN scale
        # folded; K layout = dy-major, channel-minor per dy block.
        cin_r = w_ref.shape[2] // 3
        if x_val.shape[0] < cin_r:      # channel pad to the block stride
            x_val = jnp.concatenate(
                [x_val, jnp.zeros((cin_r - x_val.shape[0], hw), x_val.dtype)],
                axis=0)
        xb = x_val.astype(adt)          # single f32 -> bf16 cast per layer

        # Stage three dy-shifted copies; zero only the few read-window columns
        # each copy's interior write does not cover (no full-scratch zeroing).
        for j in range(3):              # j == dy tap
            r0 = j * cin_r
            base = P - (j - 1) * width
            if base > lo:
                xpad_ref[r0:r0 + cin_r, lo:base] = jnp.zeros(
                    (cin_r, base - lo), adt)
            if base + hw < hi:
                xpad_ref[r0:r0 + cin_r, base + hw:hi] = jnp.zeros(
                    (cin_r, hi - base - hw), adt)
            xpad_ref[r0:r0 + cin_r, base:base + hw] = xb

        # One K = 3*cin_r matmul per dx column; wrap masks on the partials.
        k = 3 * cin_r
        acc = jnp.dot(w_ref[1], xpad_ref[0:k, P:P + hw],
                      preferred_element_type=jnp.float32)
        acc = acc + mask_l * jnp.dot(w_ref[0], xpad_ref[0:k, P - 1:P - 1 + hw],
                                     preferred_element_type=jnp.float32)
        acc = acc + mask_r * jnp.dot(w_ref[2], xpad_ref[0:k, P + 1:P + 1 + hw],
                                     preferred_element_type=jnp.float32)
        return jnp.maximum(acc + b_ref[...], 0.0)     # bias + ReLU in f32

    x = x_ref[0]                        # (in_ch_r, hw) f32
    li = 0
    skips = []

    # ---- encoder ----
    for _ in features:
        x = conv3x3_bn_relu(x, w3[li], b3[li]); li += 1
        x = conv3x3_bn_relu(x, w3[li], b3[li]); li += 1
        skips.append(x)
        # reference module: `self.pool(x)` result is discarded -> no-op

    # ---- bottleneck ----
    x = conv3x3_bn_relu(x, w3[li], b3[li]); li += 1
    x = conv3x3_bn_relu(x, w3[li], b3[li]); li += 1

    # ---- decoder ----
    for ui in range(U):
        # ConvTranspose2d(k=2,s=2) + TF.resize back to the skip size
        # == 1x1 conv with the 4 transpose taps averaged (exact for 2x
        # bilinear, antialias=False).
        w_up = wu[ui][...]
        x = (jnp.dot(w_up, x.astype(w_up.dtype),
                     preferred_element_type=jnp.float32) + bu[ui][...])
        skip = skips[U - 1 - ui]
        # torch.cat((skip, x), dim=1): in-register channel concat.
        x = conv3x3_bn_relu(jnp.concatenate([skip, x], axis=0),
                            w3[li], b3[li]); li += 1
        x = conv3x3_bn_relu(x, w3[li], b3[li]); li += 1

    # ---- final 1x1 conv, fused epilogue (weight rows padded to 8) ----
    w_f = wf_ref[...]
    y = (jnp.dot(w_f, x.astype(w_f.dtype),
                 preferred_element_type=jnp.float32) + bf_ref[...])
    o_ref[0] = y[0:out_ch, :].astype(o_ref.dtype)


# ----------------------------------------------------------------------------
# Wrapper: per-layer parameter packing + one pallas_call
# ----------------------------------------------------------------------------

def _pack_conv(c):
    # Fold BN (eval) scale into the conv weight, pack as (dx, cout, dy*cin_r)
    # with the per-dy channel block padded to a multiple of _SUB, cast bf16.
    w = c["w"] * c["scale"].reshape(1, 1, 1, -1)       # (dy, dx, cin, cout)
    cin = w.shape[2]
    cin_r = _round_up(cin, _SUB)
    wt = jnp.transpose(w, (1, 3, 0, 2))                # (dx, cout, dy, cin)
    wt = jnp.pad(wt, ((0, 0), (0, 0), (0, 0), (0, cin_r - cin)))
    return (wt.reshape(3, wt.shape[1], 3 * cin_r).astype(jnp.bfloat16),
            c["bias"].reshape(-1, 1))


def _const_index(ndim):
    return lambda i: (0,) * ndim


def _const_spec(a):
    return pl.BlockSpec(a.shape, _const_index(a.ndim))


@jax.jit
def unet_forward(x_nchw, params):
    n, in_ch, h, width = x_nchw.shape
    hw = h * width
    features = tuple(p[0]["w"].shape[-1] for p in params["downs"])
    out_ch = params["final_w"].shape[-1]
    # TODO(synk): W >= 128 needs the (C, H, W_pad) lane layout + H tiling.
    assert width + 1 <= _PAD

    # ---- per-layer packed weights (no global cmax padding) ----
    convs = []
    for p in params["downs"]:
        convs += list(p)
    convs += list(params["bottleneck"])
    for up in params["ups"]:
        convs += list(up["dc"])
    w3, b3 = zip(*[_pack_conv(c) for c in convs])
    wu = tuple(jnp.mean(u["wt"], axis=0).T.astype(jnp.bfloat16)
               for u in params["ups"])                 # averaged transpose taps
    bu = tuple(u["bt"].reshape(-1, 1) for u in params["ups"])
    ofr = _round_up(out_ch, 8)
    wf = jnp.pad(params["final_w"].T,
                 ((0, ofr - out_ch), (0, 0))).astype(jnp.bfloat16)
    bf = jnp.pad(params["final_b"].reshape(-1, 1), ((0, ofr - out_ch), (0, 0)))

    # Horizontal-wrap masks for the flattened (row-major) spatial axis.
    wpos = jnp.arange(hw, dtype=jnp.int32) % width
    hmask = jnp.stack([wpos != 0, wpos != width - 1]).astype(jnp.float32)

    # Input: NCHW with spatial flattened; channels padded to the block stride.
    in_ch_r = _round_up(in_ch, _SUB)
    x_flat = x_nchw.reshape(n, in_ch, hw)
    if in_ch_r != in_ch:
        x_flat = jnp.pad(x_flat, ((0, 0), (0, in_ch_r - in_ch), (0, 0)))

    scratch_rows = 3 * max(w.shape[2] // 3 for w in w3)
    inputs = (x_flat, hmask) + tuple(w3) + tuple(b3) + wu + bu + (wf, bf)
    in_specs = [pl.BlockSpec((1, in_ch_r, hw), lambda i: (i, 0, 0))]
    in_specs += [_const_spec(a) for a in inputs[1:]]
    # TODO(synk): mark the grid-invariant weight specs pipeline_mode=
    # pl.Buffered(1) and stream them from HBM at realistic channel counts.

    kernel = functools.partial(_unet_kernel, features=features, width=width)
    out = pl.pallas_call(
        kernel,
        out_shape=jax.ShapeDtypeStruct((n, out_ch, hw), jnp.float32),
        grid=(n,),
        in_specs=in_specs,
        out_specs=pl.BlockSpec((1, out_ch, hw), lambda i: (i, 0, 0)),
        scratch_shapes=[pltpu.VMEM((scratch_rows, 2 * _PAD + hw),
                                   jnp.bfloat16)],
        compiler_params=pltpu.CompilerParams(
            dimension_semantics=("parallel",)),   # batch across megacore TCs
    )(*inputs)
    return out.reshape(n, out_ch, h, width)


# ----------------------------------------------------------------------------
# Pure-JAX reference of the same forward semantics (for validation).
# The kernel feeds bf16 operands to the MXU (f32 accumulation); the reference
# applies the identical quantization so it validates the kernel structure.
# ----------------------------------------------------------------------------

def _q(a):
    return a.astype(jnp.bfloat16).astype(jnp.float32)


def _ref_forward(x, params):
    hp = jax.lax.Precision.HIGHEST

    def conv3(x, c):
        w = _q(c["w"] * c["scale"].reshape(1, 1, 1, -1))
        y = jax.lax.conv_general_dilated(
            _q(x), w, window_strides=(1, 1), padding="SAME",
            dimension_numbers=("NCHW", "HWIO", "NCHW"), precision=hp)
        return jnp.maximum(y + c["bias"].reshape(1, -1, 1, 1), 0.0)

    def dconv(x, p):
        return conv3(conv3(x, p[0]), p[1])

    skips = []
    for p in params["downs"]:
        x = dconv(x, p)
        skips.append(x)
    x = dconv(x, params["bottleneck"])
    skips = skips[::-1]
    for i, up in enumerate(params["ups"]):
        wavg = _q(jnp.mean(up["wt"], axis=0))          # (cin, cout)
        x = (jnp.einsum("nchw,cd->ndhw", _q(x), wavg, precision=hp)
             + up["bt"].reshape(1, -1, 1, 1))
        x = jnp.concatenate([skips[i], x], axis=1)
        x = dconv(x, up["dc"])
    return (jnp.einsum("nchw,cd->ndhw", _q(x), _q(params["final_w"]),
                       precision=hp)
            + params["final_b"].reshape(1, -1, 1, 1))


# ----------------------------------------------------------------------------
# Deterministic parameter construction (synthetic; no checkpoint)
# ----------------------------------------------------------------------------

def _init_conv_bn(key, cin, cout):
    k1, k2, k3, k4, k5 = jax.random.split(key, 5)
    w = jax.random.normal(k1, (3, 3, cin, cout), jnp.float32) / jnp.sqrt(9.0 * cin)
    gamma = 1.0 + 0.1 * jax.random.normal(k2, (cout,), jnp.float32)
    beta = 0.1 * jax.random.normal(k3, (cout,), jnp.float32)
    rmean = 0.1 * jax.random.normal(k4, (cout,), jnp.float32)
    rvar = 1.0 + 0.1 * jax.random.uniform(k5, (cout,), jnp.float32)
    scale = gamma / jnp.sqrt(rvar + 1e-5)   # BatchNorm2d eval mode, folded
    bias = beta - rmean * scale
    return {"w": w, "scale": scale, "bias": bias}


def _init_double_conv(key, cin, cout):
    k1, k2 = jax.random.split(key)
    return [_init_conv_bn(k1, cin, cout), _init_conv_bn(k2, cout, cout)]


def init_params(key, in_channels=3, out_channels=1, features=(8, 16)):
    params = {"downs": [], "ups": []}
    cin = in_channels
    for f in features:
        key, sub = jax.random.split(key)
        params["downs"].append(_init_double_conv(sub, cin, f))
        cin = f
    key, sub = jax.random.split(key)
    params["bottleneck"] = _init_double_conv(sub, features[-1], features[-1] * 2)
    for f in reversed(features):
        key, k1, k2, k3 = jax.random.split(key, 4)
        # ConvTranspose2d(2f, f, k=2, s=2); taps stored tap-major (t = 2a + b)
        wt = jax.random.normal(k1, (4, 2 * f, f), jnp.float32) / jnp.sqrt(8.0 * f)
        bt = 0.1 * jax.random.normal(k2, (f,), jnp.float32)
        params["ups"].append({"wt": wt, "bt": bt,
                              "dc": _init_double_conv(k3, 2 * f, f)})
    key, k1, k2 = jax.random.split(key, 3)
    params["final_w"] = (jax.random.normal(k1, (features[0], out_channels),
                                           jnp.float32)
                         / jnp.sqrt(float(features[0])))
    params["final_b"] = 0.1 * jax.random.normal(k2, (out_channels,), jnp.float32)
    return params


if __name__ == "__main__":
    key = jax.random.PRNGKey(0)
    pkey, xkey = jax.random.split(key)
    # Small UNET: in_channels=3, out_channels=1, features=(8, 16)
    params = init_params(pkey, in_channels=3, out_channels=1, features=(8, 16))
    x = jax.random.normal(xkey, (2, 3, 16, 16), jnp.float32)  # NCHW like PyTorch
    out = jax.block_until_ready(unet_forward(x, params))
    assert out.shape == (2, 1, 16, 16), out.shape
    assert bool(jnp.all(jnp.isfinite(out)))
    ref = jax.block_until_ready(_ref_forward(x, params))
    err = float(jnp.max(jnp.abs(out - ref)))
    assert err < 2e-3, f"max abs error vs reference: {err}"
    print("KERNEL_OK")
</pallas_src>

<mosaic_0001>
module attributes {stable_mosaic.version = 11 : i64} {
  func.func @_unet_kernel(%arg0: i32, %arg1: memref<1x16x256xf32, #tpu.memory_space<vmem>>, %arg2: memref<2x256xf32, #tpu.memory_space<vmem>>, %arg3: memref<3x8x48xbf16, #tpu.memory_space<vmem>>, %arg4: memref<3x8x48xbf16, #tpu.memory_space<vmem>>, %arg5: memref<3x16x48xbf16, #tpu.memory_space<vmem>>, %arg6: memref<3x16x48xbf16, #tpu.memory_space<vmem>>, %arg7: memref<3x32x48xbf16, #tpu.memory_space<vmem>>, %arg8: memref<3x32x96xbf16, #tpu.memory_space<vmem>>, %arg9: memref<3x16x96xbf16, #tpu.memory_space<vmem>>, %arg10: memref<3x16x48xbf16, #tpu.memory_space<vmem>>, %arg11: memref<3x8x48xbf16, #tpu.memory_space<vmem>>, %arg12: memref<3x8x48xbf16, #tpu.memory_space<vmem>>, %arg13: memref<8x1xf32, #tpu.memory_space<vmem>>, %arg14: memref<8x1xf32, #tpu.memory_space<vmem>>, %arg15: memref<16x1xf32, #tpu.memory_space<vmem>>, %arg16: memref<16x1xf32, #tpu.memory_space<vmem>>, %arg17: memref<32x1xf32, #tpu.memory_space<vmem>>, %arg18: memref<32x1xf32, #tpu.memory_space<vmem>>, %arg19: memref<16x1xf32, #tpu.memory_space<vmem>>, %arg20: memref<16x1xf32, #tpu.memory_space<vmem>>, %arg21: memref<8x1xf32, #tpu.memory_space<vmem>>, %arg22: memref<8x1xf32, #tpu.memory_space<vmem>>, %arg23: memref<16x32xbf16, #tpu.memory_space<vmem>>, %arg24: memref<8x16xbf16, #tpu.memory_space<vmem>>, %arg25: memref<16x1xf32, #tpu.memory_space<vmem>>, %arg26: memref<8x1xf32, #tpu.memory_space<vmem>>, %arg27: memref<8x8xbf16, #tpu.memory_space<vmem>>, %arg28: memref<8x1xf32, #tpu.memory_space<vmem>>, %arg29: memref<1x1x256xf32, #tpu.memory_space<vmem>>, %arg30: memref<96x512xbf16, #tpu.memory_space<vmem>>) attributes {dimension_semantics = [#tpu.dimension_semantics<parallel>], iteration_bounds = array<i64: 2>, scalar_prefetch = 0 : i64, scratch_operands = 1 : i64, tpu.core_type = #tpu.core_type<tc>, window_params = [{transform_indices = @transform_0, window_bounds = array<i64: 1, 16, 256>}, {pipeline_mode = #tpu.pipeline_mode<synchronous>, transform_indices = @transform_1, window_bounds = array<i64: 2, 256>}, {pipeline_mode = #tpu.pipeline_mode<synchronous>, transform_indices = @transform_2, window_bounds = array<i64: 3, 8, 48>}, {pipeline_mode = #tpu.pipeline_mode<synchronous>, transform_indices = @transform_3, window_bounds = array<i64: 3, 8, 48>}, {pipeline_mode = #tpu.pipeline_mode<synchronous>, transform_indices = @transform_4, window_bounds = array<i64: 3, 16, 48>}, {pipeline_mode = #tpu.pipeline_mode<synchronous>, transform_indices = @transform_5, window_bounds = array<i64: 3, 16, 48>}, {pipeline_mode = #tpu.pipeline_mode<synchronous>, transform_indices = @transform_6, window_bounds = array<i64: 3, 32, 48>}, {pipeline_mode = #tpu.pipeline_mode<synchronous>, transform_indices = @transform_7, window_bounds = array<i64: 3, 32, 96>}, {pipeline_mode = #tpu.pipeline_mode<synchronous>, transform_indices = @transform_8, window_bounds = array<i64: 3, 16, 96>}, {pipeline_mode = #tpu.pipeline_mode<synchronous>, transform_indices = @transform_9, window_bounds = array<i64: 3, 16, 48>}, {pipeline_mode = #tpu.pipeline_mode<synchronous>, transform_indices = @transform_10, window_bounds = array<i64: 3, 8, 48>}, {pipeline_mode = #tpu.pipeline_mode<synchronous>, transform_indices = @transform_11, window_bounds = array<i64: 3, 8, 48>}, {pipeline_mode = #tpu.pipeline_mode<synchronous>, transform_indices = @transform_12, window_bounds = array<i64: 8, 1>}, {pipeline_mode = #tpu.pipeline_mode<synchronous>, transform_indices = @transform_13, window_bounds = array<i64: 8, 1>}, {pipeline_mode = #tpu.pipeline_mode<synchronous>, transform_indices = @transform_14, window_bounds = array<i64: 16, 1>}, {pipeline_mode = #tpu.pipeline_mode<synchronous>, transform_indices = @transform_15, window_bounds = array<i64: 16, 1>}, {pipeline_mode = #tpu.pipeline_mode<synchronous>, transform_indices = @transform_16, window_bounds = array<i64: 32, 1>}, {pipeline_mode = #tpu.pipeline_mode<synchronous>, transform_indices = @transform_17, window_bounds = array<i64: 32, 1>}, {pipeline_mode = #tpu.pipeline_mode<synchronous>, transform_indices = @transform_18, window_bounds = array<i64: 16, 1>}, {pipeline_mode = #tpu.pipeline_mode<synchronous>, transform_indices = @transform_19, window_bounds = array<i64: 16, 1>}, {pipeline_mode = #tpu.pipeline_mode<synchronous>, transform_indices = @transform_20, window_bounds = array<i64: 8, 1>}, {pipeline_mode = #tpu.pipeline_mode<synchronous>, transform_indices = @transform_21, window_bounds = array<i64: 8, 1>}, {pipeline_mode = #tpu.pipeline_mode<synchronous>, transform_indices = @transform_22, window_bounds = array<i64: 16, 32>}, {pipeline_mode = #tpu.pipeline_mode<synchronous>, transform_indices = @transform_23, window_bounds = array<i64: 8, 16>}, {pipeline_mode = #tpu.pipeline_mode<synchronous>, transform_indices = @transform_24, window_bounds = array<i64: 16, 1>}, {pipeline_mode = #tpu.pipeline_mode<synchronous>, transform_indices = @transform_25, window_bounds = array<i64: 8, 1>}, {pipeline_mode = #tpu.pipeline_mode<synchronous>, transform_indices = @transform_26, window_bounds = array<i64: 8, 8>}, {pipeline_mode = #tpu.pipeline_mode<synchronous>, transform_indices = @transform_27, window_bounds = array<i64: 8, 1>}, {transform_indices = @transform_28, window_bounds = array<i64: 1, 1, 256>}]} {
    %c0 = arith.constant 0 : index
    %c0_0 = arith.constant 0 : index
    %0 = vector.load %arg2[%c0, %c0_0] : memref<2x256xf32, #tpu.memory_space<vmem>>, vector<1x256xf32>
    %c1 = arith.constant 1 : index
    %c0_1 = arith.constant 0 : index
    %1 = vector.load %arg2[%c1, %c0_1] : memref<2x256xf32, #tpu.memory_space<vmem>>, vector<1x256xf32>
    %c0_2 = arith.constant 0 : index
    %c0_3 = arith.constant 0 : index
    %c0_4 = arith.constant 0 : index
    %2 = vector.load %arg1[%c0_2, %c0_3, %c0_4] : memref<1x16x256xf32, #tpu.memory_space<vmem>>, vector<1x16x256xf32>
    %3 = vector.shape_cast %2 : vector<1x16x256xf32> to vector<16x256xf32>
    %4 = arith.truncf %3 : vector<16x256xf32> to vector<16x256xbf16>
    %cst = arith.constant 0.000000e+00 : bf16
    %5 = vector.broadcast %cst : bf16 to vector<16x17xbf16>
    %c0_5 = arith.constant 0 : index
    %c127 = arith.constant 127 : index
    %6 = vector.load %arg30[%c0_5, %c127] : memref<96x512xbf16, #tpu.memory_space<vmem>>, vector<16x17xbf16>
    tpu.vector_store %arg30[%c0_5, %c127], %5 {strides = array<i32>} : memref<96x512xbf16, #tpu.memory_space<vmem>>, vector<16x17xbf16>,
    %c0_6 = arith.constant 0 : index
    %c144 = arith.constant 144 : index
    %7 = vector.load %arg30[%c0_6, %c144] : memref<96x512xbf16, #tpu.memory_space<vmem>>, vector<16x256xbf16>
    tpu.vector_store %arg30[%c0_6, %c144], %4 {strides = array<i32>} : memref<96x512xbf16, #tpu.memory_space<vmem>>, vector<16x256xbf16>,
    %cst_7 = arith.constant 0.000000e+00 : bf16
    %8 = vector.broadcast %cst_7 : bf16 to vector<16x1xbf16>
    %c16 = arith.constant 16 : index
    %c127_8 = arith.constant 127 : index
    %9 = vector.load %arg30[%c16, %c127_8] : memref<96x512xbf16, #tpu.memory_space<vmem>>, vector<16x1xbf16>
    tpu.vector_store %arg30[%c16, %c127_8], %8 {strides = array<i32>} : memref<96x512xbf16, #tpu.memory_space<vmem>>, vector<16x1xbf16>,
    %cst_9 = arith.constant 0.000000e+00 : bf16
    %10 = vector.broadcast %cst_9 : bf16 to vector<16x1xbf16>
    %c16_10 = arith.constant 16 : index
    %c384 = arith.constant 384 : index
    %11 = vector.load %arg30[%c16_10, %c384] : memref<96x512xbf16, #tpu.memory_space<vmem>>, vector<16x1xbf16>
    tpu.vector_store %arg30[%c16_10, %c384], %10 {strides = array<i32>} : memref<96x512xbf16, #tpu.memory_space<vmem>>, vector<16x1xbf16>,
    %c16_11 = arith.constant 16 : index
    %c128 = arith.constant 128 : index
    %12 = vector.load %arg30[%c16_11, %c128] : memref<96x512xbf16, #tpu.memory_space<vmem>>, vector<16x256xbf16>
    tpu.vector_store %arg30[%c16_11, %c128], %4 {strides = array<i32>} : memref<96x512xbf16, #tpu.memory_space<vmem>>, vector<16x256xbf16>,
    %cst_12 = arith.constant 0.000000e+00 : bf16
    %13 = vector.broadcast %cst_12 : bf16 to vector<16x17xbf16>
    %c32 = arith.constant 32 : index
    %c368 = arith.constant 368 : index
    %14 = vector.load %arg30[%c32, %c368] : memref<96x512xbf16, #tpu.memory_space<vmem>>, vector<16x17xbf16>
    tpu.vector_store %arg30[%c32, %c368], %13 {strides = array<i32>} : memref<96x512xbf16, #tpu.memory_space<vmem>>, vector<16x17xbf16>,
    %c32_13 = arith.constant 32 : index
    %c112 = arith.constant 112 : index
    %15 = vector.load %arg30[%c32_13, %c112] : memref<96x512xbf16, #tpu.memory_space<vmem>>, vector<16x256xbf16>
    tpu.vector_store %arg30[%c32_13, %c112], %4 {strides = array<i32>} : memref<96x512xbf16, #tpu.memory_space<vmem>>, vector<16x256xbf16>,
    %c1_14 = arith.constant 1 : index
    %c0_15 = arith.constant 0 : index
    %c0_16 = arith.constant 0 : index
    %16 = vector.load %arg3[%c1_14, %c0_15, %c0_16] : memref<3x8x48xbf16, #tpu.memory_space<vmem>>, vector<1x8x48xbf16>
    %17 = vector.shape_cast %16 : vector<1x8x48xbf16> to vector<8x48xbf16>
    %c0_17 = arith.constant 0 : index
    %c128_18 = arith.constant 128 : index
    %18 = vector.load %arg30[%c0_17, %c128_18] : memref<96x512xbf16, #tpu.memory_space<vmem>>, vector<48x256xbf16>
    %cst_19 = arith.constant dense<0.000000e+00> : vector<8x256xf32>
    %19 = tpu.matmul %17, %18, %cst_19 {dimension_numbers = #tpu.dot_dimension_numbers<[1], [0], [0], [1], [0, 0, 1, 1], [], []>} : vector<8x48xbf16>, vector<48x256xbf16>, vector<8x256xf32> -> vector<8x256xf32>
    %c0_20 = arith.constant 0 : index
    %c0_21 = arith.constant 0 : index
    %c0_22 = arith.constant 0 : index
    %20 = vector.load %arg3[%c0_20, %c0_21, %c0_22] : memref<3x8x48xbf16, #tpu.memory_space<vmem>>, vector<1x8x48xbf16>
    %21 = vector.shape_cast %20 : vector<1x8x48xbf16> to vector<8x48xbf16>
    %c0_23 = arith.constant 0 : index
    %c127_24 = arith.constant 127 : index
    %22 = vector.load %arg30[%c0_23, %c127_24] : memref<96x512xbf16, #tpu.memory_space<vmem>>, vector<48x256xbf16>
    %cst_25 = arith.constant dense<0.000000e+00> : vector<8x256xf32>
    %23 = tpu.matmul %21, %22, %cst_25 {dimension_numbers = #tpu.dot_dimension_numbers<[1], [0], [0], [1], [0, 0, 1, 1], [], []>} : vector<8x48xbf16>, vector<48x256xbf16>, vector<8x256xf32> -> vector<8x256xf32>
    %24 = vector.broadcast %0 : vector<1x256xf32> to vector<8x256xf32>
    %25 = arith.mulf %24, %23 : vector<8x256xf32>
    %26 = arith.addf %19, %25 : vector<8x256xf32>
    %c2 = arith.constant 2 : index
    %c0_26 = arith.constant 0 : index
    %c0_27 = arith.constant 0 : index
    %27 = vector.load %arg3[%c2, %c0_26, %c0_27] : memref<3x8x48xbf16, #tpu.memory_space<vmem>>, vector<1x8x48xbf16>
    %28 = vector.shape_cast %27 : vector<1x8x48xbf16> to vector<8x48xbf16>
    %c0_28 = arith.constant 0 : index
    %c129 = arith.constant 129 : index
    %29 = vector.load %arg30[%c0_28, %c129] : memref<96x512xbf16, #tpu.memory_space<vmem>>, vector<48x256xbf16>
    %cst_29 = arith.constant dense<0.000000e+00> : vector<8x256xf32>
    %30 = tpu.matmul %28, %29, %cst_29 {dimension_numbers = #tpu.dot_dimension_numbers<[1], [0], [0], [1], [0, 0, 1, 1], [], []>} : vector<8x48xbf16>, vector<48x256xbf16>, vector<8x256xf32> -> vector<8x256xf32>
    %31 = vector.broadcast %1 : vector<1x256xf32> to vector<8x256xf32>
    %32 = arith.mulf %31, %30 : vector<8x256xf32>
    %33 = arith.addf %26, %32 : vector<8x256xf32>
    %c0_30 = arith.constant 0 : index
    %c0_31 = arith.constant 0 : index
    %34 = vector.load %arg13[%c0_30, %c0_31] : memref<8x1xf32, #tpu.memory_space<vmem>>, vector<8x1xf32>
    %35 = vector.broadcast %34 : vector<8x1xf32> to vector<8x256xf32>
    %36 = arith.addf %33, %35 : vector<8x256xf32>
    %cst_32 = arith.constant 0.000000e+00 : f32
    %37 = vector.broadcast %cst_32 : f32 to vector<8x256xf32>
    %38 = arith.maximumf %36, %37 : vector<8x256xf32>
    %cst_33 = arith.constant 0.000000e+00 : f32
    %39 = vector.broadcast %cst_33 : f32 to vector<8x256xf32>
    %40 = tpu.concatenate %38, %39 in 0 : vector<8x256xf32>, vector<8x256xf32> -> vector<16x256xf32>
    %41 = arith.truncf %40 : vector<16x256xf32> to vector<16x256xbf16>
    %cst_34 = arith.constant 0.000000e+00 : bf16
    %42 = vector.broadcast %cst_34 : bf16 to vector<16x17xbf16>
    %c0_35 = arith.constant 0 : index
    %c127_36 = arith.constant 127 : index
    %43 = vector.load %arg30[%c0_35, %c127_36] : memref<96x512xbf16, #tpu.memory_space<vmem>>, vector<16x17xbf16>
    tpu.vector_store %arg30[%c0_35, %c127_36], %42 {strides = array<i32>} : memref<96x512xbf16, #tpu.memory_space<vmem>>, vector<16x17xbf16>,
    %c0_37 = arith.constant 0 : index
    %c144_38 = arith.constant 144 : index
    %44 = vector.load %arg30[%c0_37, %c144_38] : memref<96x512xbf16, #tpu.memory_space<vmem>>, vector<16x256xbf16>
    tpu.vector_store %arg30[%c0_37, %c144_38], %41 {strides = array<i32>} : memref<96x512xbf16, #tpu.memory_space<vmem>>, vector<16x256xbf16>,
    %cst_39 = arith.constant 0.000000e+00 : bf16
    %45 = vector.broadcast %cst_39 : bf16 to vector<16x1xbf16>
    %c16_40 = arith.constant 16 : index
    %c127_41 = arith.constant 127 : index
    %46 = vector.load %arg30[%c16_40, %c127_41] : memref<96x512xbf16, #tpu.memory_space<vmem>>, vector<16x1xbf16>
    tpu.vector_store %arg30[%c16_40, %c127_41], %45 {strides = array<i32>} : memref<96x512xbf16, #tpu.memory_space<vmem>>, vector<16x1xbf16>,
    %cst_42 = arith.constant 0.000000e+00 : bf16
    %47 = vector.broadcast %cst_42 : bf16 to vector<16x1xbf16>
    %c16_43 = arith.constant 16 : index
    %c384_44 = arith.constant 384 : index
    %48 = vector.load %arg30[%c16_43, %c384_44] : memref<96x512xbf16, #tpu.memory_space<vmem>>, vector<16x1xbf16>
    tpu.vector_store %arg30[%c16_43, %c384_44], %47 {strides = array<i32>} : memref<96x512xbf16, #tpu.memory_space<vmem>>, vector<16x1xbf16>,
    %c16_45 = arith.constant 16 : index
    %c128_46 = arith.constant 128 : index
    %49 = vector.load %arg30[%c16_45, %c128_46] : memref<96x512xbf16, #tpu.memory_space<vmem>>, vector<16x256xbf16>
    tpu.vector_store %arg30[%c16_45, %c128_46], %41 {strides = array<i32>} : memref<96x512xbf16, #tpu.memory_space<vmem>>, vector<16x256xbf16>,
    %cst_47 = arith.constant 0.000000e+00 : bf16
    %50 = vector.broadcast %cst_47 : bf16 to vector<16x17xbf16>
    %c32_48 = arith.constant 32 : index
    %c368_49 = arith.constant 368 : index
    %51 = vector.load %arg30[%c32_48, %c368_49] : memref<96x512xbf16, #tpu.memory_space<vmem>>, vector<16x17xbf16>
    tpu.vector_store %arg30[%c32_48, %c368_49], %50 {strides = array<i32>} : memref<96x512xbf16, #tpu.memory_space<vmem>>, vector<16x17xbf16>,
    %c32_50 = arith.constant 32 : index
    %c112_51 = arith.constant 112 : index
    %52 = vector.load %arg30[%c32_50, %c112_51] : memref<96x512xbf16, #tpu.memory_space<vmem>>, vector<16x256xbf16>
    tpu.vector_store %arg30[%c32_50, %c112_51], %41 {strides = array<i32>} : memref<96x512xbf16, #tpu.memory_space<vmem>>, vector<16x256xbf16>,
    %c1_52 = arith.constant 1 : index
    %c0_53 = arith.constant 0 : index
    %c0_54 = arith.constant 0 : index
    %53 = vector.load %arg4[%c1_52, %c0_53, %c0_54] : memref<3x8x48xbf16, #tpu.memory_space<vmem>>, vector<1x8x48xbf16>
    %54 = vector.shape_cast %53 : vector<1x8x48xbf16> to vector<8x48xbf16>
    %c0_55 = arith.constant 0 : index
    %c128_56 = arith.constant 128 : index
    %55 = vector.load %arg30[%c0_55, %c128_56] : memref<96x512xbf16, #tpu.memory_space<vmem>>, vector<48x256xbf16>
    %cst_57 = arith.constant dense<0.000000e+00> : vector<8x256xf32>
    %56 = tpu.matmul %54, %55, %cst_57 {dimension_numbers = #tpu.dot_dimension_numbers<[1], [0], [0], [1], [0, 0, 1, 1], [], []>} : vector<8x48xbf16>, vector<48x256xbf16>, vector<8x256xf32> -> vector<8x256xf32>
    %c0_58 = arith.constant 0 : index
    %c0_59 = arith.constant 0 : index
    %c0_60 = arith.constant 0 : index
    %57 = vector.load %arg4[%c0_58, %c0_59, %c0_60] : memref<3x8x48xbf16, #tpu.memory_space<vmem>>, vector<1x8x48xbf16>
    %58 = vector.shape_cast %57 : vector<1x8x48xbf16> to vector<8x48xbf16>
    %c0_61 = arith.constant 0 : index
    %c127_62 = arith.constant 127 : index
    %59 = vector.load %arg30[%c0_61, %c127_62] : memref<96x512xbf16, #tpu.memory_space<vmem>>, vector<48x256xbf16>
    %cst_63 = arith.constant dense<0.000000e+00> : vector<8x256xf32>
    %60 = tpu.matmul %58, %59, %cst_63 {dimension_numbers = #tpu.dot_dimension_numbers<[1], [0], [0], [1], [0, 0, 1, 1], [], []>} : vector<8x48xbf16>, vector<48x256xbf16>, vector<8x256xf32> -> vector<8x256xf32>
    %61 = vector.broadcast %0 : vector<1x256xf32> to vector<8x256xf32>
    %62 = arith.mulf %61, %60 : vector<8x256xf32>
    %63 = arith.addf %56, %62 : vector<8x256xf32>
    %c2_64 = arith.constant 2 : index
    %c0_65 = arith.constant 0 : index
    %c0_66 = arith.constant 0 : index
    %64 = vector.load %arg4[%c2_64, %c0_65, %c0_66] : memref<3x8x48xbf16, #tpu.memory_space<vmem>>, vector<1x8x48xbf16>
    %65 = vector.shape_cast %64 : vector<1x8x48xbf16> to vector<8x48xbf16>
    %c0_67 = arith.constant 0 : index
    %c129_68 = arith.constant 129 : index
    %66 = vector.load %arg30[%c0_67, %c129_68] : memref<96x512xbf16, #tpu.memory_space<vmem>>, vector<48x256xbf16>
    %cst_69 = arith.constant dense<0.000000e+00> : vector<8x256xf32>
    %67 = tpu.matmul %65, %66, %cst_69 {dimension_numbers = #tpu.dot_dimension_numbers<[1], [0], [0], [1], [0, 0, 1, 1], [], []>} : vector<8x48xbf16>, vector<48x256xbf16>, vector<8x256xf32> -> vector<8x256xf32>
    %68 = vector.broadcast %1 : vector<1x256xf32> to vector<8x256xf32>
    %69 = arith.mulf %68, %67 : vector<8x256xf32>
    %70 = arith.addf %63, %69 : vector<8x256xf32>
    %c0_70 = arith.constant 0 : index
    %c0_71 = arith.constant 0 : index
    %71 = vector.load %arg14[%c0_70, %c0_71] : memref<8x1xf32, #tpu.memory_space<vmem>>, vector<8x1xf32>
    %72 = vector.broadcast %71 : vector<8x1xf32> to vector<8x256xf32>
    %73 = arith.addf %70, %72 : vector<8x256xf32>
    %cst_72 = arith.constant 0.000000e+00 : f32
    %74 = vector.broadcast %cst_72 : f32 to vector<8x256xf32>
    %75 = arith.maximumf %73, %74 : vector<8x256xf32>
    %cst_73 = arith.constant 0.000000e+00 : f32
    %76 = vector.broadcast %cst_73 : f32 to vector<8x256xf32>
    %77 = tpu.concatenate %75, %76 in 0 : vector<8x256xf32>, vector<8x256xf32> -> vector<16x256xf32>
    %78 = arith.truncf %77 : vector<16x256xf32> to vector<16x256xbf16>
    %cst_74 = arith.constant 0.000000e+00 : bf16
    %79 = vector.broadcast %cst_74 : bf16 to vector<16x17xbf16>
    %c0_75 = arith.constant 0 : index
    %c127_76 = arith.constant 127 : index
    %80 = vector.load %arg30[%c0_75, %c127_76] : memref<96x512xbf16, #tpu.memory_space<vmem>>, vector<16x17xbf16>
    tpu.vector_store %arg30[%c0_75, %c127_76], %79 {strides = array<i32>} : memref<96x512xbf16, #tpu.memory_space<vmem>>, vector<16x17xbf16>,
    %c0_77 = arith.constant 0 : index
    %c144_78 = arith.constant 144 : index
    %81 = vector.load %arg30[%c0_77, %c144_78] : memref<96x512xbf16, #tpu.memory_space<vmem>>, vector<16x256xbf16>
    tpu.vector_store %arg30[%c0_77, %c144_78], %78 {strides = array<i32>} : memref<96x512xbf16, #tpu.memory_space<vmem>>, vector<16x256xbf16>,
    %cst_79 = arith.constant 0.000000e+00 : bf16
    %82 = vector.broadcast %cst_79 : bf16 to vector<16x1xbf16>
    %c16_80 = arith.constant 16 : index
    %c127_81 = arith.constant 127 : index
    %83 = vector.load %arg30[%c16_80, %c127_81] : memref<96x512xbf16, #tpu.memory_space<vmem>>, vector<16x1xbf16>
    tpu.vector_store %arg30[%c16_80, %c127_81], %82 {strides = array<i32>} : memref<96x512xbf16, #tpu.memory_space<vmem>>, vector<16x1xbf16>,
    %cst_82 = arith.constant 0.000000e+00 : bf16
    %84 = vector.broadcast %cst_82 : bf16 to vector<16x1xbf16>
    %c16_83 = arith.constant 16 : index
    %c384_84 = arith.constant 384 : index
    %85 = vector.load %arg30[%c16_83, %c384_84] : memref<96x512xbf16, #tpu.memory_space<vmem>>, vector<16x1xbf16>
    tpu.vector_store %arg30[%c16_83, %c384_84], %84 {strides = array<i32>} : memref<96x512xbf16, #tpu.memory_space<vmem>>, vector<16x1xbf16>,
    %c16_85 = arith.constant 16 : index
    %c128_86 = arith.constant 128 : index
    %86 = vector.load %arg30[%c16_85, %c128_86] : memref<96x512xbf16, #tpu.memory_space<vmem>>, vector<16x256xbf16>
    tpu.vector_store %arg30[%c16_85, %c128_86], %78 {strides = array<i32>} : memref<96x512xbf16, #tpu.memory_space<vmem>>, vector<16x256xbf16>,
    %cst_87 = arith.constant 0.000000e+00 : bf16
    %87 = vector.broadcast %cst_87 : bf16 to vector<16x17xbf16>
    %c32_88 = arith.constant 32 : index
    %c368_89 = arith.constant 368 : index
    %88 = vector.load %arg30[%c32_88, %c368_89] : memref<96x512xbf16, #tpu.memory_space<vmem>>, vector<16x17xbf16>
    tpu.vector_store %arg30[%c32_88, %c368_89], %87 {strides = array<i32>} : memref<96x512xbf16, #tpu.memory_space<vmem>>, vector<16x17xbf16>,
    %c32_90 = arith.constant 32 : index
    %c112_91 = arith.constant 112 : index
    %89 = vector.load %arg30[%c32_90, %c112_91] : memref<96x512xbf16, #tpu.memory_space<vmem>>, vector<16x256xbf16>
    tpu.vector_store %arg30[%c32_90, %c112_91], %78 {strides = array<i32>} : memref<96x512xbf16, #tpu.memory_space<vmem>>, vector<16x256xbf16>,
    %c1_92 = arith.constant 1 : index
    %c0_93 = arith.constant 0 : index
    %c0_94 = arith.constant 0 : index
    %90 = vector.load %arg5[%c1_92, %c0_93, %c0_94] : memref<3x16x48xbf16, #tpu.memory_space<vmem>>, vector<1x16x48xbf16>
    %91 = vector.shape_cast %90 : vector<1x16x48xbf16> to vector<16x48xbf16>
    %c0_95 = arith.constant 0 : index
    %c128_96 = arith.constant 128 : index
    %92 = vector.load %arg30[%c0_95, %c128_96] : memref<96x512xbf16, #tpu.memory_space<vmem>>, vector<48x256xbf16>
    %cst_97 = arith.constant dense<0.000000e+00> : vector<16x256xf32>
    %93 = tpu.matmul %91, %92, %cst_97 {dimension_numbers = #tpu.dot_dimension_numbers<[1], [0], [0], [1], [0, 0, 1, 1], [], []>} : vector<16x48xbf16>, vector<48x256xbf16>, vector<16x256xf32> -> vector<16x256xf32>
    %c0_98 = arith.constant 0 : index
    %c0_99 = arith.constant 0 : index
    %c0_100 = arith.constant 0 : index
    %94 = vector.load %arg5[%c0_98, %c0_99, %c0_100] : memref<3x16x48xbf16, #tpu.memory_space<vmem>>, vector<1x16x48xbf16>
    %95 = vector.shape_cast %94 : vector<1x16x48xbf16> to vector<16x48xbf16>
    %c0_101 = arith.constant 0 : index
    %c127_102 = arith.constant 127 : index
    %96 = vector.load %arg30[%c0_101, %c127_102] : memref<96x512xbf16, #tpu.memory_space<vmem>>, vector<48x256xbf16>
    %cst_103 = arith.constant dense<0.000000e+00> : vector<16x256xf32>
    %97 = tpu.matmul %95, %96, %cst_103 {dimension_numbers = #tpu.dot_dimension_numbers<[1], [0], [0], [1], [0, 0, 1, 1], [], []>} : vector<16x48xbf16>, vector<48x256xbf16>, vector<16x256xf32> -> vector<16x256xf32>
    %98 = vector.broadcast %0 : vector<1x256xf32> to vector<16x256xf32>
    %99 = arith.mulf %98, %97 : vector<16x256xf32>
    %100 = arith.addf %93, %99 : vector<16x256xf32>
    %c2_104 = arith.constant 2 : index
    %c0_105 = arith.constant 0 : index
    %c0_106 = arith.constant 0 : index
    %101 = vector.load %arg5[%c2_104, %c0_105, %c0_106] : memref<3x16x48xbf16, #tpu.memory_space<vmem>>, vector<1x16x48xbf16>
    %102 = vector.shape_cast %101 : vector<1x16x48xbf16> to vector<16x48xbf16>
    %c0_107 = arith.constant 0 : index
    %c129_108 = arith.constant 129 : index
    %103 = vector.load %arg30[%c0_107, %c129_108] : memref<96x512xbf16, #tpu.memory_space<vmem>>, vector<48x256xbf16>
    %cst_109 = arith.constant dense<0.000000e+00> : vector<16x256xf32>
    %104 = tpu.matmul %102, %103, %cst_109 {dimension_numbers = #tpu.dot_dimension_numbers<[1], [0], [0], [1], [0, 0, 1, 1], [], []>} : vector<16x48xbf16>, vector<48x256xbf16>, vector<16x256xf32> -> vector<16x256xf32>
    %105 = vector.broadcast %1 : vector<1x256xf32> to vector<16x256xf32>
    %106 = arith.mulf %105, %104 : vector<16x256xf32>
    %107 = arith.addf %100, %106 : vector<16x256xf32>
    %c0_110 = arith.constant 0 : index
    %c0_111 = arith.constant 0 : index
    %108 = vector.load %arg15[%c0_110, %c0_111] : memref<16x1xf32, #tpu.memory_space<vmem>>, vector<16x1xf32>
    %109 = vector.broadcast %108 : vector<16x1xf32> to vector<16x256xf32>
    %110 = arith.addf %107, %109 : vector<16x256xf32>
    %cst_112 = arith.constant 0.000000e+00 : f32
    %111 = vector.broadcast %cst_112 : f32 to vector<16x256xf32>
    %112 = arith.maximumf %110, %111 : vector<16x256xf32>
    %113 = arith.truncf %112 : vector<16x256xf32> to vector<16x256xbf16>
    %cst_113 = arith.constant 0.000000e+00 : bf16
    %114 = vector.broadcast %cst_113 : bf16 to vector<16x17xbf16>
    %c0_114 = arith.constant 0 : index
    %c127_115 = arith.constant 127 : index
    %115 = vector.load %arg30[%c0_114, %c127_115] : memref<96x512xbf16, #tpu.memory_space<vmem>>, vector<16x17xbf16>
    tpu.vector_store %arg30[%c0_114, %c127_115], %114 {strides = array<i32>} : memref<96x512xbf16, #tpu.memory_space<vmem>>, vector<16x17xbf16>,
    %c0_116 = arith.constant 0 : index
    %c144_117 = arith.constant 144 : index
    %116 = vector.load %arg30[%c0_116, %c144_117] : memref<96x512xbf16, #tpu.memory_space<vmem>>, vector<16x256xbf16>
    tpu.vector_store %arg30[%c0_116, %c144_117], %113 {strides = array<i32>} : memref<96x512xbf16, #tpu.memory_space<vmem>>, vector<16x256xbf16>,
    %cst_118 = arith.constant 0.000000e+00 : bf16
    %117 = vector.broadcast %cst_118 : bf16 to vector<16x1xbf16>
    %c16_119 = arith.constant 16 : index
    %c127_120 = arith.constant 127 : index
    %118 = vector.load %arg30[%c16_119, %c127_120] : memref<96x512xbf16, #tpu.memory_space<vmem>>, vector<16x1xbf16>
    tpu.vector_store %arg30[%c16_119, %c127_120], %117 {strides = array<i32>} : memref<96x512xbf16, #tpu.memory_space<vmem>>, vector<16x1xbf16>,
    %cst_121 = arith.constant 0.000000e+00 : bf16
    %119 = vector.broadcast %cst_121 : bf16 to vector<16x1xbf16>
    %c16_122 = arith.constant 16 : index
    %c384_123 = arith.constant 384 : index
    %120 = vector.load %arg30[%c16_122, %c384_123] : memref<96x512xbf16, #tpu.memory_space<vmem>>, vector<16x1xbf16>
    tpu.vector_store %arg30[%c16_122, %c384_123], %119 {strides = array<i32>} : memref<96x512xbf16, #tpu.memory_space<vmem>>, vector<16x1xbf16>,
    %c16_124 = arith.constant 16 : index
    %c128_125 = arith.constant 128 : index
    %121 = vector.load %arg30[%c16_124, %c128_125] : memref<96x512xbf16, #tpu.memory_space<vmem>>, vector<16x256xbf16>
    tpu.vector_store %arg30[%c16_124, %c128_125], %113 {strides = array<i32>} : memref<96x512xbf16, #tpu.memory_space<vmem>>, vector<16x256xbf16>,
    %cst_126 = arith.constant 0.000000e+00 : bf16
    %122 = vector.broadcast %cst_126 : bf16 to vector<16x17xbf16>
    %c32_127 = arith.constant 32 : index
    %c368_128 = arith.constant 368 : index
    %123 = vector.load %arg30[%c32_127, %c368_128] : memref<96x512xbf16, #tpu.memory_space<vmem>>, vector<16x17xbf16>
    tpu.vector_store %arg30[%c32_127, %c368_128], %122 {strides = array<i32>} : memref<96x512xbf16, #tpu.memory_space<vmem>>, vector<16x17xbf16>,
    %c32_129 = arith.constant 32 : index
    %c112_130 = arith.constant 112 : index
    %124 = vector.load %arg30[%c32_129, %c112_130] : memref<96x512xbf16, #tpu.memory_space<vmem>>, vector<16x256xbf16>
    tpu.vector_store %arg30[%c32_129, %c112_130], %113 {strides = array<i32>} : memref<96x512xbf16, #tpu.memory_space<vmem>>, vector<16x256xbf16>,
    %c1_131 = arith.constant 1 : index
    %c0_132 = arith.constant 0 : index
    %c0_133 = arith.constant 0 : index
    %125 = vector.load %arg6[%c1_131, %c0_132, %c0_133] : memref<3x16x48xbf16, #tpu.memory_space<vmem>>, vector<1x16x48xbf16>
    %126 = vector.shape_cast %125 : vector<1x16x48xbf16> to vector<16x48xbf16>
    %c0_134 = arith.constant 0 : index
    %c128_135 = arith.constant 128 : index
    %127 = vector.load %arg30[%c0_134, %c128_135] : memref<96x512xbf16, #tpu.memory_space<vmem>>, vector<48x256xbf16>
    %cst_136 = arith.constant dense<0.000000e+00> : vector<16x256xf32>
    %128 = tpu.matmul %126, %127, %cst_136 {dimension_numbers = #tpu.dot_dimension_numbers<[1], [0], [0], [1], [0, 0, 1, 1], [], []>} : vector<16x48xbf16>, vector<48x256xbf16>, vector<16x256xf32> -> vector<16x256xf32>
    %c0_137 = arith.constant 0 : index
    %c0_138 = arith.constant 0 : index
    %c0_139 = arith.constant 0 : index
    %129 = vector.load %arg6[%c0_137, %c0_138, %c0_139] : memref<3x16x48xbf16, #tpu.memory_space<vmem>>, vector<1x16x48xbf16>
    %130 = vector.shape_cast %129 : vector<1x16x48xbf16> to vector<16x48xbf16>
    %c0_140 = arith.constant 0 : index
    %c127_141 = arith.constant 127 : index
    %131 = vector.load %arg30[%c0_140, %c127_141] : memref<96x512xbf16, #tpu.memory_space<vmem>>, vector<48x256xbf16>
    %cst_142 = arith.constant dense<0.000000e+00> : vector<16x256xf32>
    %132 = tpu.matmul %130, %131, %cst_142 {dimension_numbers = #tpu.dot_dimension_numbers<[1], [0], [0], [1], [0, 0, 1, 1], [], []>} : vector<16x48xbf16>, vector<48x256xbf16>, vector<16x256xf32> -> vector<16x256xf32>
    %133 = vector.broadcast %0 : vector<1x256xf32> to vector<16x256xf32>
    %134 = arith.mulf %133, %132 : vector<16x256xf32>
    %135 = arith.addf %128, %134 : vector<16x256xf32>
    %c2_143 = arith.constant 2 : index
    %c0_144 = arith.constant 0 : index
    %c0_145 = arith.constant 0 : index
    %136 = vector.load %arg6[%c2_143, %c0_144, %c0_145] : memref<3x16x48xbf16, #tpu.memory_space<vmem>>, vector<1x16x48xbf16>
    %137 = vector.shape_cast %136 : vector<1x16x48xbf16> to vector<16x48xbf16>
    %c0_146 = arith.constant 0 : index
    %c129_147 = arith.constant 129 : index
    %138 = vector.load %arg30[%c0_146, %c129_147] : memref<96x512xbf16, #tpu.memory_space<vmem>>, vector<48x256xbf16>
    %cst_148 = arith.constant dense<0.000000e+00> : vector<16x256xf32>
    %139 = tpu.matmul %137, %138, %cst_148 {dimension_numbers = #tpu.dot_dimension_numbers<[1], [0], [0], [1], [0, 0, 1, 1], [], []>} : vector<16x48xbf16>, vector<48x256xbf16>, vector<16x256xf32> -> vector<16x256xf32>
    %140 = vector.broadcast %1 : vector<1x256xf32> to vector<16x256xf32>
    %141 = arith.mulf %140, %139 : vector<16x256xf32>
    %142 = arith.addf %135, %141 : vector<16x256xf32>
    %c0_149 = arith.constant 0 : index
    %c0_150 = arith.constant 0 : index
    %143 = vector.load %arg16[%c0_149, %c0_150] : memref<16x1xf32, #tpu.memory_space<vmem>>, vector<16x1xf32>
    %144 = vector.broadcast %143 : vector<16x1xf32> to vector<16x256xf32>
    %145 = arith.addf %142, %144 : vector<16x256xf32>
    %cst_151 = arith.constant 0.000000e+00 : f32
    %146 = vector.broadcast %cst_151 : f32 to vector<16x256xf32>
    %147 = arith.maximumf %145, %146 : vector<16x256xf32>
    %148 = arith.truncf %147 : vector<16x256xf32> to vector<16x256xbf16>
    %cst_152 = arith.constant 0.000000e+00 : bf16
    %149 = vector.broadcast %cst_152 : bf16 to vector<16x17xbf16>
    %c0_153 = arith.constant 0 : index
    %c127_154 = arith.constant 127 : index
    %150 = vector.load %arg30[%c0_153, %c127_154] : memref<96x512xbf16, #tpu.memory_space<vmem>>, vector<16x17xbf16>
    tpu.vector_store %arg30[%c0_153, %c127_154], %149 {strides = array<i32>} : memref<96x512xbf16, #tpu.memory_space<vmem>>, vector<16x17xbf16>,
    %c0_155 = arith.constant 0 : index
    %c144_156 = arith.constant 144 : index
    %151 = vector.load %arg30[%c0_155, %c144_156] : memref<96x512xbf16, #tpu.memory_space<vmem>>, vector<16x256xbf16>
    tpu.vector_store %arg30[%c0_155, %c144_156], %148 {strides = array<i32>} : memref<96x512xbf16, #tpu.memory_space<vmem>>, vector<16x256xbf16>,
    %cst_157 = arith.constant 0.000000e+00 : bf16
    %152 = vector.broadcast %cst_157 : bf16 to vector<16x1xbf16>
    %c16_158 = arith.constant 16 : index
    %c127_159 = arith.constant 127 : index
    %153 = vector.load %arg30[%c16_158, %c127_159] : memref<96x512xbf16, #tpu.memory_space<vmem>>, vector<16x1xbf16>
    tpu.vector_store %arg30[%c16_158, %c127_159], %152 {strides = array<i32>} : memref<96x512xbf16, #tpu.memory_space<vmem>>, vector<16x1xbf16>,
    %cst_160 = arith.constant 0.000000e+00 : bf16
    %154 = vector.broadcast %cst_160 : bf16 to vector<16x1xbf16>
    %c16_161 = arith.constant 16 : index
    %c384_162 = arith.constant 384 : index
    %155 = vector.load %arg30[%c16_161, %c384_162] : memref<96x512xbf16, #tpu.memory_space<vmem>>, vector<16x1xbf16>
    tpu.vector_store %arg30[%c16_161, %c384_162], %154 {strides = array<i32>} : memref<96x512xbf16, #tpu.memory_space<vmem>>, vector<16x1xbf16>,
    %c16_163 = arith.constant 16 : index
    %c128_164 = arith.constant 128 : index
    %156 = vector.load %arg30[%c16_163, %c128_164] : memref<96x512xbf16, #tpu.memory_space<vmem>>, vector<16x256xbf16>
    tpu.vector_store %arg30[%c16_163, %c128_164], %148 {strides = array<i32>} : memref<96x512xbf16, #tpu.memory_space<vmem>>, vector<16x256xbf16>,
    %cst_165 = arith.constant 0.000000e+00 : bf16
    %157 = vector.broadcast %cst_165 : bf16 to vector<16x17xbf16>
    %c32_166 = arith.constant 32 : index
    %c368_167 = arith.constant 368 : index
    %158 = vector.load %arg30[%c32_166, %c368_167] : memref<96x512xbf16, #tpu.memory_space<vmem>>, vector<16x17xbf16>
    tpu.vector_store %arg30[%c32_166, %c368_167], %157 {strides = array<i32>} : memref<96x512xbf16, #tpu.memory_space<vmem>>, vector<16x17xbf16>,
    %c32_168 = arith.constant 32 : index
    %c112_169 = arith.constant 112 : index
    %159 = vector.load %arg30[%c32_168, %c112_169] : memref<96x512xbf16, #tpu.memory_space<vmem>>, vector<16x256xbf16>
    tpu.vector_store %arg30[%c32_168, %c112_169], %148 {strides = array<i32>} : memref<96x512xbf16, #tpu.memory_space<vmem>>, vector<16x256xbf16>,
    %c1_170 = arith.constant 1 : index
    %c0_171 = arith.constant 0 : index
    %c0_172 = arith.constant 0 : index
    %160 = vector.load %arg7[%c1_170, %c0_171, %c0_172] : memref<3x32x48xbf16, #tpu.memory_space<vmem>>, vector<1x32x48xbf16>
    %161 = vector.shape_cast %160 : vector<1x32x48xbf16> to vector<32x48xbf16>
    %c0_173 = arith.constant 0 : index
    %c128_174 = arith.constant 128 : index
    %162 = vector.load %arg30[%c0_173, %c128_174] : memref<96x512xbf16, #tpu.memory_space<vmem>>, vector<48x256xbf16>
    %cst_175 = arith.constant dense<0.000000e+00> : vector<32x256xf32>
    %163 = tpu.matmul %161, %162, %cst_175 {dimension_numbers = #tpu.dot_dimension_numbers<[1], [0], [0], [1], [0, 0, 1, 1], [], []>} : vector<32x48xbf16>, vector<48x256xbf16>, vector<32x256xf32> -> vector<32x256xf32>
    %c0_176 = arith.constant 0 : index
    %c0_177 = arith.constant 0 : index
    %c0_178 = arith.constant 0 : index
    %164 = vector.load %arg7[%c0_176, %c0_177, %c0_178] : memref<3x32x48xbf16, #tpu.memory_space<vmem>>, vector<1x32x48xbf16>
    %165 = vector.shape_cast %164 : vector<1x32x48xbf16> to vector<32x48xbf16>
    %c0_179 = arith.constant 0 : index
    %c127_180 = arith.constant 127 : index
    %166 = vector.load %arg30[%c0_179, %c127_180] : memref<96x512xbf16, #tpu.memory_space<vmem>>, vector<48x256xbf16>
    %cst_181 = arith.constant dense<0.000000e+00> : vector<32x256xf32>
    %167 = tpu.matmul %165, %166, %cst_181 {dimension_numbers = #tpu.dot_dimension_numbers<[1], [0], [0], [1], [0, 0, 1, 1], [], []>} : vector<32x48xbf16>, vector<48x256xbf16>, vector<32x256xf32> -> vector<32x256xf32>
    %168 = vector.broadcast %0 : vector<1x256xf32> to vector<32x256xf32>
    %169 = arith.mulf %168, %167 : vector<32x256xf32>
    %170 = arith.addf %163, %169 : vector<32x256xf32>
    %c2_182 = arith.constant 2 : index
    %c0_183 = arith.constant 0 : index
    %c0_184 = arith.constant 0 : index
    %171 = vector.load %arg7[%c2_182, %c0_183, %c0_184] : memref<3x32x48xbf16, #tpu.memory_space<vmem>>, vector<1x32x48xbf16>
    %172 = vector.shape_cast %171 : vector<1x32x48xbf16> to vector<32x48xbf16>
    %c0_185 = arith.constant 0 : index
    %c129_186 = arith.constant 129 : index
    %173 = vector.load %arg30[%c0_185, %c129_186] : memref<96x512xbf16, #tpu.memory_space<vmem>>, vector<48x256xbf16>
    %cst_187 = arith.constant dense<0.000000e+00> : vector<32x256xf32>
    %174 = tpu.matmul %172, %173, %cst_187 {dimension_numbers = #tpu.dot_dimension_numbers<[1], [0], [0], [1], [0, 0, 1, 1], [], []>} : vector<32x48xbf16>, vector<48x256xbf16>, vector<32x256xf32> -> vector<32x256xf32>
    %175 = vector.broadcast %1 : vector<1x256xf32> to vector<32x256xf32>
    %176 = arith.mulf %175, %174 : vector<32x256xf32>
    %177 = arith.addf %170, %176 : vector<32x256xf32>
    %c0_188 = arith.constant 0 : index
    %c0_189 = arith.constant 0 : index
    %178 = vector.load %arg17[%c0_188, %c0_189] : memref<32x1xf32, #tpu.memory_space<vmem>>, vector<32x1xf32>
    %179 = vector.broadcast %178 : vector<32x1xf32> to vector<32x256xf32>
    %180 = arith.addf %177, %179 : vector<32x256xf32>
    %cst_190 = arith.constant 0.000000e+00 : f32
    %181 = vector.broadcast %cst_190 : f32 to vector<32x256xf32>
    %182 = arith.maximumf %180, %181 : vector<32x256xf32>
    %183 = arith.truncf %182 : vector<32x256xf32> to vector<32x256xbf16>
    %cst_191 = arith.constant 0.000000e+00 : bf16
    %184 = vector.broadcast %cst_191 : bf16 to vector<32x17xbf16>
    %c0_192 = arith.constant 0 : index
    %c127_193 = arith.constant 127 : index
    %185 = vector.load %arg30[%c0_192, %c127_193] : memref<96x512xbf16, #tpu.memory_space<vmem>>, vector<32x17xbf16>
    tpu.vector_store %arg30[%c0_192, %c127_193], %184 {strides = array<i32>} : memref<96x512xbf16, #tpu.memory_space<vmem>>, vector<32x17xbf16>,
    %c0_194 = arith.constant 0 : index
    %c144_195 = arith.constant 144 : index
    %186 = vector.load %arg30[%c0_194, %c144_195] : memref<96x512xbf16, #tpu.memory_space<vmem>>, vector<32x256xbf16>
    tpu.vector_store %arg30[%c0_194, %c144_195], %183 {strides = array<i32>} : memref<96x512xbf16, #tpu.memory_space<vmem>>, vector<32x256xbf16>,
    %cst_196 = arith.constant 0.000000e+00 : bf16
    %187 = vector.broadcast %cst_196 : bf16 to vector<32x1xbf16>
    %c32_197 = arith.constant 32 : index
    %c127_198 = arith.constant 127 : index
    %188 = vector.load %arg30[%c32_197, %c127_198] : memref<96x512xbf16, #tpu.memory_space<vmem>>, vector<32x1xbf16>
    tpu.vector_store %arg30[%c32_197, %c127_198], %187 {strides = array<i32>} : memref<96x512xbf16, #tpu.memory_space<vmem>>, vector<32x1xbf16>,
    %cst_199 = arith.constant 0.000000e+00 : bf16
    %189 = vector.broadcast %cst_199 : bf16 to vector<32x1xbf16>
    %c32_200 = arith.constant 32 : index
    %c384_201 = arith.constant 384 : index
    %190 = vector.load %arg30[%c32_200, %c384_201] : memref<96x512xbf16, #tpu.memory_space<vmem>>, vector<32x1xbf16>
    tpu.vector_store %arg30[%c32_200, %c384_201], %189 {strides = array<i32>} : memref<96x512xbf16, #tpu.memory_space<vmem>>, vector<32x1xbf16>,
    %c32_202 = arith.constant 32 : index
    %c128_203 = arith.constant 128 : index
    %191 = vector.load %arg30[%c32_202, %c128_203] : memref<96x512xbf16, #tpu.memory_space<vmem>>, vector<32x256xbf16>
    tpu.vector_store %arg30[%c32_202, %c128_203], %183 {strides = array<i32>} : memref<96x512xbf16, #tpu.memory_space<vmem>>, vector<32x256xbf16>,
    %cst_204 = arith.constant 0.000000e+00 : bf16
    %192 = vector.broadcast %cst_204 : bf16 to vector<32x17xbf16>
    %c64 = arith.constant 64 : index
    %c368_205 = arith.constant 368 : index
    %193 = vector.load %arg30[%c64, %c368_205] : memref<96x512xbf16, #tpu.memory_space<vmem>>, vector<32x17xbf16>
    tpu.vector_store %arg30[%c64, %c368_205], %192 {strides = array<i32>} : memref<96x512xbf16, #tpu.memory_space<vmem>>, vector<32x17xbf16>,
    %c64_206 = arith.constant 64 : index
    %c112_207 = arith.constant 112 : index
    %194 = vector.load %arg30[%c64_206, %c112_207] : memref<96x512xbf16, #tpu.memory_space<vmem>>, vector<32x256xbf16>
    tpu.vector_store %arg30[%c64_206, %c112_207], %183 {strides = array<i32>} : memref<96x512xbf16, #tpu.memory_space<vmem>>, vector<32x256xbf16>,
    %c1_208 = arith.constant 1 : index
    %c0_209 = arith.constant 0 : index
    %c0_210 = arith.constant 0 : index
    %195 = vector.load %arg8[%c1_208, %c0_209, %c0_210] : memref<3x32x96xbf16, #tpu.memory_space<vmem>>, vector<1x32x96xbf16>
    %196 = vector.shape_cast %195 : vector<1x32x96xbf16> to vector<32x96xbf16>
    %c0_211 = arith.constant 0 : index
    %c128_212 = arith.constant 128 : index
    %197 = vector.load %arg30[%c0_211, %c128_212] : memref<96x512xbf16, #tpu.memory_space<vmem>>, vector<96x256xbf16>
    %cst_213 = arith.constant dense<0.000000e+00> : vector<32x256xf32>
    %198 = tpu.matmul %196, %197, %cst_213 {dimension_numbers = #tpu.dot_dimension_numbers<[1], [0], [0], [1], [0, 0, 1, 1], [], []>} : vector<32x96xbf16>, vector<96x256xbf16>, vector<32x256xf32> -> vector<32x256xf32>
    %c0_214 = arith.constant 0 : index
    %c0_215 = arith.constant 0 : index
    %c0_216 = arith.constant 0 : index
    %199 = vector.load %arg8[%c0_214, %c0_215, %c0_216] : memref<3x32x96xbf16, #tpu.memory_space<vmem>>, vector<1x32x96xbf16>
    %200 = vector.shape_cast %199 : vector<1x32x96xbf16> to vector<32x96xbf16>
    %c0_217 = arith.constant 0 : index
    %c127_218 = arith.constant 127 : index
    %201 = vector.load %arg30[%c0_217, %c127_218] : memref<96x512xbf16, #tpu.memory_space<vmem>>, vector<96x256xbf16>
    %cst_219 = arith.constant dense<0.000000e+00> : vector<32x256xf32>
    %202 = tpu.matmul %200, %201, %cst_219 {dimension_numbers = #tpu.dot_dimension_numbers<[1], [0], [0], [1], [0, 0, 1, 1], [], []>} : vector<32x96xbf16>, vector<96x256xbf16>, vector<32x256xf32> -> vector<32x256xf32>
    %203 = vector.broadcast %0 : vector<1x256xf32> to vector<32x256xf32>
    %204 = arith.mulf %203, %202 : vector<32x256xf32>
    %205 = arith.addf %198, %204 : vector<32x256xf32>
    %c2_220 = arith.constant 2 : index
    %c0_221 = arith.constant 0 : index
    %c0_222 = arith.constant 0 : index
    %206 = vector.load %arg8[%c2_220, %c0_221, %c0_222] : memref<3x32x96xbf16, #tpu.memory_space<vmem>>, vector<1x32x96xbf16>
    %207 = vector.shape_cast %206 : vector<1x32x96xbf16> to vector<32x96xbf16>
    %c0_223 = arith.constant 0 : index
    %c129_224 = arith.constant 129 : index
    %208 = vector.load %arg30[%c0_223, %c129_224] : memref<96x512xbf16, #tpu.memory_space<vmem>>, vector<96x256xbf16>
    %cst_225 = arith.constant dense<0.000000e+00> : vector<32x256xf32>
    %209 = tpu.matmul %207, %208, %cst_225 {dimension_numbers = #tpu.dot_dimension_numbers<[1], [0], [0], [1], [0, 0, 1, 1], [], []>} : vector<32x96xbf16>, vector<96x256xbf16>, vector<32x256xf32> -> vector<32x256xf32>
    %210 = vector.broadcast %1 : vector<1x256xf32> to vector<32x256xf32>
    %211 = arith.mulf %210, %209 : vector<32x256xf32>
    %212 = arith.addf %205, %211 : vector<32x256xf32>
    %c0_226 = arith.constant 0 : index
    %c0_227 = arith.constant 0 : index
    %213 = vector.load %arg18[%c0_226, %c0_227] : memref<32x1xf32, #tpu.memory_space<vmem>>, vector<32x1xf32>
    %214 = vector.broadcast %213 : vector<32x1xf32> to vector<32x256xf32>
    %215 = arith.addf %212, %214 : vector<32x256xf32>
    %cst_228 = arith.constant 0.000000e+00 : f32
    %216 = vector.broadcast %cst_228 : f32 to vector<32x256xf32>
    %217 = arith.maximumf %215, %216 : vector<32x256xf32>
    %c0_229 = arith.constant 0 : index
    %c0_230 = arith.constant 0 : index
    %218 = vector.load %arg23[%c0_229, %c0_230] : memref<16x32xbf16, #tpu.memory_space<vmem>>, vector<16x32xbf16>
    %219 = arith.truncf %217 : vector<32x256xf32> to vector<32x256xbf16>
    %cst_231 = arith.constant dense<0.000000e+00> : vector<16x256xf32>
    %220 = tpu.matmul %218, %219, %cst_231 {dimension_numbers = #tpu.dot_dimension_numbers<[1], [0], [0], [1], [0, 0, 1, 1], [], []>} : vector<16x32xbf16>, vector<32x256xbf16>, vector<16x256xf32> -> vector<16x256xf32>
    %c0_232 = arith.constant 0 : index
    %c0_233 = arith.constant 0 : index
    %221 = vector.load %arg25[%c0_232, %c0_233] : memref<16x1xf32, #tpu.memory_space<vmem>>, vector<16x1xf32>
    %222 = vector.broadcast %221 : vector<16x1xf32> to vector<16x256xf32>
    %223 = arith.addf %220, %222 : vector<16x256xf32>
    %224 = tpu.concatenate %147, %223 in 0 : vector<16x256xf32>, vector<16x256xf32> -> vector<32x256xf32>
    %225 = arith.truncf %224 : vector<32x256xf32> to vector<32x256xbf16>
    %cst_234 = arith.constant 0.000000e+00 : bf16
    %226 = vector.broadcast %cst_234 : bf16 to vector<32x17xbf16>
    %c0_235 = arith.constant 0 : index
    %c127_236 = arith.constant 127 : index
    %227 = vector.load %arg30[%c0_235, %c127_236] : memref<96x512xbf16, #tpu.memory_space<vmem>>, vector<32x17xbf16>
    tpu.vector_store %arg30[%c0_235, %c127_236], %226 {strides = array<i32>} : memref<96x512xbf16, #tpu.memory_space<vmem>>, vector<32x17xbf16>,
    %c0_237 = arith.constant 0 : index
    %c144_238 = arith.constant 144 : index
    %228 = vector.load %arg30[%c0_237, %c144_238] : memref<96x512xbf16, #tpu.memory_space<vmem>>, vector<32x256xbf16>
    tpu.vector_store %arg30[%c0_237, %c144_238], %225 {strides = array<i32>} : memref<96x512xbf16, #tpu.memory_space<vmem>>, vector<32x256xbf16>,
    %cst_239 = arith.constant 0.000000e+00 : bf16
    %229 = vector.broadcast %cst_239 : bf16 to vector<32x1xbf16>
    %c32_240 = arith.constant 32 : index
    %c127_241 = arith.constant 127 : index
    %230 = vector.load %arg30[%c32_240, %c127_241] : memref<96x512xbf16, #tpu.memory_space<vmem>>, vector<32x1xbf16>
    tpu.vector_store %arg30[%c32_240, %c127_241], %229 {strides = array<i32>} : memref<96x512xbf16, #tpu.memory_space<vmem>>, vector<32x1xbf16>,
    %cst_242 = arith.constant 0.000000e+00 : bf16
    %231 = vector.broadcast %cst_242 : bf16 to vector<32x1xbf16>
    %c32_243 = arith.constant 32 : index
    %c384_244 = arith.constant 384 : index
    %232 = vector.load %arg30[%c32_243, %c384_244] : memref<96x512xbf16, #tpu.memory_space<vmem>>, vector<32x1xbf16>
    tpu.vector_store %arg30[%c32_243, %c384_244], %231 {strides = array<i32>} : memref<96x512xbf16, #tpu.memory_space<vmem>>, vector<32x1xbf16>,
    %c32_245 = arith.constant 32 : index
    %c128_246 = arith.constant 128 : index
    %233 = vector.load %arg30[%c32_245, %c128_246] : memref<96x512xbf16, #tpu.memory_space<vmem>>, vector<32x256xbf16>
    tpu.vector_store %arg30[%c32_245, %c128_246], %225 {strides = array<i32>} : memref<96x512xbf16, #tpu.memory_space<vmem>>, vector<32x256xbf16>,
    %cst_247 = arith.constant 0.000000e+00 : bf16
    %234 = vector.broadcast %cst_247 : bf16 to vector<32x17xbf16>
    %c64_248 = arith.constant 64 : index
    %c368_249 = arith.constant 368 : index
    %235 = vector.load %arg30[%c64_248, %c368_249] : memref<96x512xbf16, #tpu.memory_space<vmem>>, vector<32x17xbf16>
    tpu.vector_store %arg30[%c64_248, %c368_249], %234 {strides = array<i32>} : memref<96x512xbf16, #tpu.memory_space<vmem>>, vector<32x17xbf16>,
    %c64_250 = arith.constant 64 : index
    %c112_251 = arith.constant 112 : index
    %236 = vector.load %arg30[%c64_250, %c112_251] : memref<96x512xbf16, #tpu.memory_space<vmem>>, vector<32x256xbf16>
    tpu.vector_store %arg30[%c64_250, %c112_251], %225 {strides = array<i32>} : memref<96x512xbf16, #tpu.memory_space<vmem>>, vector<32x256xbf16>,
    %c1_252 = arith.constant 1 : index
    %c0_253 = arith.constant 0 : index
    %c0_254 = arith.constant 0 : index
    %237 = vector.load %arg9[%c1_252, %c0_253, %c0_254] : memref<3x16x96xbf16, #tpu.memory_space<vmem>>, vector<1x16x96xbf16>
    %238 = vector.shape_cast %237 : vector<1x16x96xbf16> to vector<16x96xbf16>
    %c0_255 = arith.constant 0 : index
    %c128_256 = arith.constant 128 : index
    %239 = vector.load %arg30[%c0_255, %c128_256] : memref<96x512xbf16, #tpu.memory_space<vmem>>, vector<96x256xbf16>
    %cst_257 = arith.constant dense<0.000000e+00> : vector<16x256xf32>
    %240 = tpu.matmul %238, %239, %cst_257 {dimension_numbers = #tpu.dot_dimension_numbers<[1], [0], [0], [1], [0, 0, 1, 1], [], []>} : vector<16x96xbf16>, vector<96x256xbf16>, vector<16x256xf32> -> vector<16x256xf32>
    %c0_258 = arith.constant 0 : index
    %c0_259 = arith.constant 0 : index
    %c0_260 = arith.constant 0 : index
    %241 = vector.load %arg9[%c0_258, %c0_259, %c0_260] : memref<3x16x96xbf16, #tpu.memory_space<vmem>>, vector<1x16x96xbf16>
    %242 = vector.shape_cast %241 : vector<1x16x96xbf16> to vector<16x96xbf16>
    %c0_261 = arith.constant 0 : index
    %c127_262 = arith.constant 127 : index
    %243 = vector.load %arg30[%c0_261, %c127_262] : memref<96x512xbf16, #tpu.memory_space<vmem>>, vector<96x256xbf16>
    %cst_263 = arith.constant dense<0.000000e+00> : vector<16x256xf32>
    %244 = tpu.matmul %242, %243, %cst_263 {dimension_numbers = #tpu.dot_dimension_numbers<[1], [0], [0], [1], [0, 0, 1, 1], [], []>} : vector<16x96xbf16>, vector<96x256xbf16>, vector<16x256xf32> -> vector<16x256xf32>
    %245 = vector.broadcast %0 : vector<1x256xf32> to vector<16x256xf32>
    %246 = arith.mulf %245, %244 : vector<16x256xf32>
    %247 = arith.addf %240, %246 : vector<16x256xf32>
    %c2_264 = arith.constant 2 : index
    %c0_265 = arith.constant 0 : index
    %c0_266 = arith.constant 0 : index
    %248 = vector.load %arg9[%c2_264, %c0_265, %c0_266] : memref<3x16x96xbf16, #tpu.memory_space<vmem>>, vector<1x16x96xbf16>
    %249 = vector.shape_cast %248 : vector<1x16x96xbf16> to vector<16x96xbf16>
    %c0_267 = arith.constant 0 : index
    %c129_268 = arith.constant 129 : index
    %250 = vector.load %arg30[%c0_267, %c129_268] : memref<96x512xbf16, #tpu.memory_space<vmem>>, vector<96x256xbf16>
    %cst_269 = arith.constant dense<0.000000e+00> : vector<16x256xf32>
    %251 = tpu.matmul %249, %250, %cst_269 {dimension_numbers = #tpu.dot_dimension_numbers<[1], [0], [0], [1], [0, 0, 1, 1], [], []>} : vector<16x96xbf16>, vector<96x256xbf16>, vector<16x256xf32> -> vector<16x256xf32>
    %252 = vector.broadcast %1 : vector<1x256xf32> to vector<16x256xf32>
    %253 = arith.mulf %252, %251 : vector<16x256xf32>
    %254 = arith.addf %247, %253 : vector<16x256xf32>
    %c0_270 = arith.constant 0 : index
    %c0_271 = arith.constant 0 : index
    %255 = vector.load %arg19[%c0_270, %c0_271] : memref<16x1xf32, #tpu.memory_space<vmem>>, vector<16x1xf32>
    %256 = vector.broadcast %255 : vector<16x1xf32> to vector<16x256xf32>
    %257 = arith.addf %254, %256 : vector<16x256xf32>
    %cst_272 = arith.constant 0.000000e+00 : f32
    %258 = vector.broadcast %cst_272 : f32 to vector<16x256xf32>
    %259 = arith.maximumf %257, %258 : vector<16x256xf32>
    %260 = arith.truncf %259 : vector<16x256xf32> to vector<16x256xbf16>
    %cst_273 = arith.constant 0.000000e+00 : bf16
    %261 = vector.broadcast %cst_273 : bf16 to vector<16x17xbf16>
    %c0_274 = arith.constant 0 : index
    %c127_275 = arith.constant 127 : index
    %262 = vector.load %arg30[%c0_274, %c127_275] : memref<96x512xbf16, #tpu.memory_space<vmem>>, vector<16x17xbf16>
    tpu.vector_store %arg30[%c0_274, %c127_275], %261 {strides = array<i32>} : memref<96x512xbf16, #tpu.memory_space<vmem>>, vector<16x17xbf16>,
    %c0_276 = arith.constant 0 : index
    %c144_277 = arith.constant 144 : index
    %263 = vector.load %arg30[%c0_276, %c144_277] : memref<96x512xbf16, #tpu.memory_space<vmem>>, vector<16x256xbf16>
    tpu.vector_store %arg30[%c0_276, %c144_277], %260 {strides = array<i32>} : memref<96x512xbf16, #tpu.memory_space<vmem>>, vector<16x256xbf16>,
    %cst_278 = arith.constant 0.000000e+00 : bf16
    %264 = vector.broadcast %cst_278 : bf16 to vector<16x1xbf16>
    %c16_279 = arith.constant 16 : index
    %c127_280 = arith.constant 127 : index
    %265 = vector.load %arg30[%c16_279, %c127_280] : memref<96x512xbf16, #tpu.memory_space<vmem>>, vector<16x1xbf16>
    tpu.vector_store %arg30[%c16_279, %c127_280], %264 {strides = array<i32>} : memref<96x512xbf16, #tpu.memory_space<vmem>>, vector<16x1xbf16>,
    %cst_281 = arith.constant 0.000000e+00 : bf16
    %266 = vector.broadcast %cst_281 : bf16 to vector<16x1xbf16>
    %c16_282 = arith.constant 16 : index
    %c384_283 = arith.constant 384 : index
    %267 = vector.load %arg30[%c16_282, %c384_283] : memref<96x512xbf16, #tpu.memory_space<vmem>>, vector<16x1xbf16>
    tpu.vector_store %arg30[%c16_282, %c384_283], %266 {strides = array<i32>} : memref<96x512xbf16, #tpu.memory_space<vmem>>, vector<16x1xbf16>,
    %c16_284 = arith.constant 16 : index
    %c128_285 = arith.constant 128 : index
    %268 = vector.load %arg30[%c16_284, %c128_285] : memref<96x512xbf16, #tpu.memory_space<vmem>>, vector<16x256xbf16>
    tpu.vector_store %arg30[%c16_284, %c128_285], %260 {strides = array<i32>} : memref<96x512xbf16, #tpu.memory_space<vmem>>, vector<16x256xbf16>,
    %cst_286 = arith.constant 0.000000e+00 : bf16
    %269 = vector.broadcast %cst_286 : bf16 to vector<16x17xbf16>
    %c32_287 = arith.constant 32 : index
    %c368_288 = arith.constant 368 : index
    %270 = vector.load %arg30[%c32_287, %c368_288] : memref<96x512xbf16, #tpu.memory_space<vmem>>, vector<16x17xbf16>
    tpu.vector_store %arg30[%c32_287, %c368_288], %269 {strides = array<i32>} : memref<96x512xbf16, #tpu.memory_space<vmem>>, vector<16x17xbf16>,
    %c32_289 = arith.constant 32 : index
    %c112_290 = arith.constant 112 : index
    %271 = vector.load %arg30[%c32_289, %c112_290] : memref<96x512xbf16, #tpu.memory_space<vmem>>, vector<16x256xbf16>
    tpu.vector_store %arg30[%c32_289, %c112_290], %260 {strides = array<i32>} : memref<96x512xbf16, #tpu.memory_space<vmem>>, vector<16x256xbf16>,
    %c1_291 = arith.constant 1 : index
    %c0_292 = arith.constant 0 : index
    %c0_293 = arith.constant 0 : index
    %272 = vector.load %arg10[%c1_291, %c0_292, %c0_293] : memref<3x16x48xbf16, #tpu.memory_space<vmem>>, vector<1x16x48xbf16>
    %273 = vector.shape_cast %272 : vector<1x16x48xbf16> to vector<16x48xbf16>
    %c0_294 = arith.constant 0 : index
    %c128_295 = arith.constant 128 : index
    %274 = vector.load %arg30[%c0_294, %c128_295] : memref<96x512xbf16, #tpu.memory_space<vmem>>, vector<48x256xbf16>
    %cst_296 = arith.constant dense<0.000000e+00> : vector<16x256xf32>
    %275 = tpu.matmul %273, %274, %cst_296 {dimension_numbers = #tpu.dot_dimension_numbers<[1], [0], [0], [1], [0, 0, 1, 1], [], []>} : vector<16x48xbf16>, vector<48x256xbf16>, vector<16x256xf32> -> vector<16x256xf32>
    %c0_297 = arith.constant 0 : index
    %c0_298 = arith.constant 0 : index
    %c0_299 = arith.constant 0 : index
    %276 = vector.load %arg10[%c0_297, %c0_298, %c0_299] : memref<3x16x48xbf16, #tpu.memory_space<vmem>>, vector<1x16x48xbf16>
    %277 = vector.shape_cast %276 : vector<1x16x48xbf16> to vector<16x48xbf16>
    %c0_300 = arith.constant 0 : index
    %c127_301 = arith.constant 127 : index
    %278 = vector.load %arg30[%c0_300, %c127_301] : memref<96x512xbf16, #tpu.memory_space<vmem>>, vector<48x256xbf16>
    %cst_302 = arith.constant dense<0.000000e+00> : vector<16x256xf32>
    %279 = tpu.matmul %277, %278, %cst_302 {dimension_numbers = #tpu.dot_dimension_numbers<[1], [0], [0], [1], [0, 0, 1, 1], [], []>} : vector<16x48xbf16>, vector<48x256xbf16>, vector<16x256xf32> -> vector<16x256xf32>
    %280 = vector.broadcast %0 : vector<1x256xf32> to vector<16x256xf32>
    %281 = arith.mulf %280, %279 : vector<16x256xf32>
    %282 = arith.addf %275, %281 : vector<16x256xf32>
    %c2_303 = arith.constant 2 : index
    %c0_304 = arith.constant 0 : index
    %c0_305 = arith.constant 0 : index
    %283 = vector.load %arg10[%c2_303, %c0_304, %c0_305] : memref<3x16x48xbf16, #tpu.memory_space<vmem>>, vector<1x16x48xbf16>
    %284 = vector.shape_cast %283 : vector<1x16x48xbf16> to vector<16x48xbf16>
    %c0_306 = arith.constant 0 : index
    %c129_307 = arith.constant 129 : index
    %285 = vector.load %arg30[%c0_306, %c129_307] : memref<96x512xbf16, #tpu.memory_space<vmem>>, vector<48x256xbf16>
    %cst_308 = arith.constant dense<0.000000e+00> : vector<16x256xf32>
    %286 = tpu.matmul %284, %285, %cst_308 {dimension_numbers = #tpu.dot_dimension_numbers<[1], [0], [0], [1], [0, 0, 1, 1], [], []>} : vector<16x48xbf16>, vector<48x256xbf16>, vector<16x256xf32> -> vector<16x256xf32>
    %287 = vector.broadcast %1 : vector<1x256xf32> to vector<16x256xf32>
    %288 = arith.mulf %287, %286 : vector<16x256xf32>
    %289 = arith.addf %282, %288 : vector<16x256xf32>
    %c0_309 = arith.constant 0 : index
    %c0_310 = arith.constant 0 : index
    %290 = vector.load %arg20[%c0_309, %c0_310] : memref<16x1xf32, #tpu.memory_space<vmem>>, vector<16x1xf32>
    %291 = vector.broadcast %290 : vector<16x1xf32> to vector<16x256xf32>
    %292 = arith.addf %289, %291 : vector<16x256xf32>
    %cst_311 = arith.constant 0.000000e+00 : f32
    %293 = vector.broadcast %cst_311 : f32 to vector<16x256xf32>
    %294 = arith.maximumf %292, %293 : vector<16x256xf32>
    %c0_312 = arith.constant 0 : index
    %c0_313 = arith.constant 0 : index
    %295 = vector.load %arg24[%c0_312, %c0_313] : memref<8x16xbf16, #tpu.memory_space<vmem>>, vector<8x16xbf16>
    %296 = arith.truncf %294 : vector<16x256xf32> to vector<16x256xbf16>
    %cst_314 = arith.constant dense<0.000000e+00> : vector<8x256xf32>
    %297 = tpu.matmul %295, %296, %cst_314 {dimension_numbers = #tpu.dot_dimension_numbers<[1], [0], [0], [1], [0, 0, 1, 1], [], []>} : vector<8x16xbf16>, vector<16x256xbf16>, vector<8x256xf32> -> vector<8x256xf32>
    %c0_315 = arith.constant 0 : index
    %c0_316 = arith.constant 0 : index
    %298 = vector.load %arg26[%c0_315, %c0_316] : memref<8x1xf32, #tpu.memory_space<vmem>>, vector<8x1xf32>
    %299 = vector.broadcast %298 : vector<8x1xf32> to vector<8x256xf32>
    %300 = arith.addf %297, %299 : vector<8x256xf32>
    %301 = tpu.concatenate %75, %300 in 0 : vector<8x256xf32>, vector<8x256xf32> -> vector<16x256xf32>
    %302 = arith.truncf %301 : vector<16x256xf32> to vector<16x256xbf16>
    %cst_317 = arith.constant 0.000000e+00 : bf16
    %303 = vector.broadcast %cst_317 : bf16 to vector<16x17xbf16>
    %c0_318 = arith.constant 0 : index
    %c127_319 = arith.constant 127 : index
    %304 = vector.load %arg30[%c0_318, %c127_319] : memref<96x512xbf16, #tpu.memory_space<vmem>>, vector<16x17xbf16>
    tpu.vector_store %arg30[%c0_318, %c127_319], %303 {strides = array<i32>} : memref<96x512xbf16, #tpu.memory_space<vmem>>, vector<16x17xbf16>,
    %c0_320 = arith.constant 0 : index
    %c144_321 = arith.constant 144 : index
    %305 = vector.load %arg30[%c0_320, %c144_321] : memref<96x512xbf16, #tpu.memory_space<vmem>>, vector<16x256xbf16>
    tpu.vector_store %arg30[%c0_320, %c144_321], %302 {strides = array<i32>} : memref<96x512xbf16, #tpu.memory_space<vmem>>, vector<16x256xbf16>,
    %cst_322 = arith.constant 0.000000e+00 : bf16
    %306 = vector.broadcast %cst_322 : bf16 to vector<16x1xbf16>
    %c16_323 = arith.constant 16 : index
    %c127_324 = arith.constant 127 : index
    %307 = vector.load %arg30[%c16_323, %c127_324] : memref<96x512xbf16, #tpu.memory_space<vmem>>, vector<16x1xbf16>
    tpu.vector_store %arg30[%c16_323, %c127_324], %306 {strides = array<i32>} : memref<96x512xbf16, #tpu.memory_space<vmem>>, vector<16x1xbf16>,
    %cst_325 = arith.constant 0.000000e+00 : bf16
    %308 = vector.broadcast %cst_325 : bf16 to vector<16x1xbf16>
    %c16_326 = arith.constant 16 : index
    %c384_327 = arith.constant 384 : index
    %309 = vector.load %arg30[%c16_326, %c384_327] : memref<96x512xbf16, #tpu.memory_space<vmem>>, vector<16x1xbf16>
    tpu.vector_store %arg30[%c16_326, %c384_327], %308 {strides = array<i32>} : memref<96x512xbf16, #tpu.memory_space<vmem>>, vector<16x1xbf16>,
    %c16_328 = arith.constant 16 : index
    %c128_329 = arith.constant 128 : index
    %310 = vector.load %arg30[%c16_328, %c128_329] : memref<96x512xbf16, #tpu.memory_space<vmem>>, vector<16x256xbf16>
    tpu.vector_store %arg30[%c16_328, %c128_329], %302 {strides = array<i32>} : memref<96x512xbf16, #tpu.memory_space<vmem>>, vector<16x256xbf16>,
    %cst_330 = arith.constant 0.000000e+00 : bf16
    %311 = vector.broadcast %cst_330 : bf16 to vector<16x17xbf16>
    %c32_331 = arith.constant 32 : index
    %c368_332 = arith.constant 368 : index
    %312 = vector.load %arg30[%c32_331, %c368_332] : memref<96x512xbf16, #tpu.memory_space<vmem>>, vector<16x17xbf16>
    tpu.vector_store %arg30[%c32_331, %c368_332], %311 {strides = array<i32>} : memref<96x512xbf16, #tpu.memory_space<vmem>>, vector<16x17xbf16>,
    %c32_333 = arith.constant 32 : index
    %c112_334 = arith.constant 112 : index
    %313 = vector.load %arg30[%c32_333, %c112_334] : memref<96x512xbf16, #tpu.memory_space<vmem>>, vector<16x256xbf16>
    tpu.vector_store %arg30[%c32_333, %c112_334], %302 {strides = array<i32>} : memref<96x512xbf16, #tpu.memory_space<vmem>>, vector<16x256xbf16>,
    %c1_335 = arith.constant 1 : index
    %c0_336 = arith.constant 0 : index
    %c0_337 = arith.constant 0 : index
    %314 = vector.load %arg11[%c1_335, %c0_336, %c0_337] : memref<3x8x48xbf16, #tpu.memory_space<vmem>>, vector<1x8x48xbf16>
    %315 = vector.shape_cast %314 : vector<1x8x48xbf16> to vector<8x48xbf16>
    %c0_338 = arith.constant 0 : index
    %c128_339 = arith.constant 128 : index
    %316 = vector.load %arg30[%c0_338, %c128_339] : memref<96x512xbf16, #tpu.memory_space<vmem>>, vector<48x256xbf16>
    %cst_340 = arith.constant dense<0.000000e+00> : vector<8x256xf32>
    %317 = tpu.matmul %315, %316, %cst_340 {dimension_numbers = #tpu.dot_dimension_numbers<[1], [0], [0], [1], [0, 0, 1, 1], [], []>} : vector<8x48xbf16>, vector<48x256xbf16>, vector<8x256xf32> -> vector<8x256xf32>
    %c0_341 = arith.constant 0 : index
    %c0_342 = arith.constant 0 : index
    %c0_343 = arith.constant 0 : index
    %318 = vector.load %arg11[%c0_341, %c0_342, %c0_343] : memref<3x8x48xbf16, #tpu.memory_space<vmem>>, vector<1x8x48xbf16>
    %319 = vector.shape_cast %318 : vector<1x8x48xbf16> to vector<8x48xbf16>
    %c0_344 = arith.constant 0 : index
    %c127_345 = arith.constant 127 : index
    %320 = vector.load %arg30[%c0_344, %c127_345] : memref<96x512xbf16, #tpu.memory_space<vmem>>, vector<48x256xbf16>
    %cst_346 = arith.constant dense<0.000000e+00> : vector<8x256xf32>
    %321 = tpu.matmul %319, %320, %cst_346 {dimension_numbers = #tpu.dot_dimension_numbers<[1], [0], [0], [1], [0, 0, 1, 1], [], []>} : vector<8x48xbf16>, vector<48x256xbf16>, vector<8x256xf32> -> vector<8x256xf32>
    %322 = vector.broadcast %0 : vector<1x256xf32> to vector<8x256xf32>
    %323 = arith.mulf %322, %321 : vector<8x256xf32>
    %324 = arith.addf %317, %323 : vector<8x256xf32>
    %c2_347 = arith.constant 2 : index
    %c0_348 = arith.constant 0 : index
    %c0_349 = arith.constant 0 : index
    %325 = vector.load %arg11[%c2_347, %c0_348, %c0_349] : memref<3x8x48xbf16, #tpu.memory_space<vmem>>, vector<1x8x48xbf16>
    %326 = vector.shape_cast %325 : vector<1x8x48xbf16> to vector<8x48xbf16>
    %c0_350 = arith.constant 0 : index
    %c129_351 = arith.constant 129 : index
    %327 = vector.load %arg30[%c0_350, %c129_351] : memref<96x512xbf16, #tpu.memory_space<vmem>>, vector<48x256xbf16>
    %cst_352 = arith.constant dense<0.000000e+00> : vector<8x256xf32>
    %328 = tpu.matmul %326, %327, %cst_352 {dimension_numbers = #tpu.dot_dimension_numbers<[1], [0], [0], [1], [0, 0, 1, 1], [], []>} : vector<8x48xbf16>, vector<48x256xbf16>, vector<8x256xf32> -> vector<8x256xf32>
    %329 = vector.broadcast %1 : vector<1x256xf32> to vector<8x256xf32>
    %330 = arith.mulf %329, %328 : vector<8x256xf32>
    %331 = arith.addf %324, %330 : vector<8x256xf32>
    %c0_353 = arith.constant 0 : index
    %c0_354 = arith.constant 0 : index
    %332 = vector.load %arg21[%c0_353, %c0_354] : memref<8x1xf32, #tpu.memory_space<vmem>>, vector<8x1xf32>
    %333 = vector.broadcast %332 : vector<8x1xf32> to vector<8x256xf32>
    %334 = arith.addf %331, %333 : vector<8x256xf32>
    %cst_355 = arith.constant 0.000000e+00 : f32
    %335 = vector.broadcast %cst_355 : f32 to vector<8x256xf32>
    %336 = arith.maximumf %334, %335 : vector<8x256xf32>
    %cst_356 = arith.constant 0.000000e+00 : f32
    %337 = vector.broadcast %cst_356 : f32 to vector<8x256xf32>
    %338 = tpu.concatenate %336, %337 in 0 : vector<8x256xf32>, vector<8x256xf32> -> vector<16x256xf32>
    %339 = arith.truncf %338 : vector<16x256xf32> to vector<16x256xbf16>
    %cst_357 = arith.constant 0.000000e+00 : bf16
    %340 = vector.broadcast %cst_357 : bf16 to vector<16x17xbf16>
    %c0_358 = arith.constant 0 : index
    %c127_359 = arith.constant 127 : index
    %341 = vector.load %arg30[%c0_358, %c127_359] : memref<96x512xbf16, #tpu.memory_space<vmem>>, vector<16x17xbf16>
    tpu.vector_store %arg30[%c0_358, %c127_359], %340 {strides = array<i32>} : memref<96x512xbf16, #tpu.memory_space<vmem>>, vector<16x17xbf16>,
    %c0_360 = arith.constant 0 : index
    %c144_361 = arith.constant 144 : index
    %342 = vector.load %arg30[%c0_360, %c144_361] : memref<96x512xbf16, #tpu.memory_space<vmem>>, vector<16x256xbf16>
    tpu.vector_store %arg30[%c0_360, %c144_361], %339 {strides = array<i32>} : memref<96x512xbf16, #tpu.memory_space<vmem>>, vector<16x256xbf16>,
    %cst_362 = arith.constant 0.000000e+00 : bf16
    %343 = vector.broadcast %cst_362 : bf16 to vector<16x1xbf16>
    %c16_363 = arith.constant 16 : index
    %c127_364 = arith.constant 127 : index
    %344 = vector.load %arg30[%c16_363, %c127_364] : memref<96x512xbf16, #tpu.memory_space<vmem>>, vector<16x1xbf16>
    tpu.vector_store %arg30[%c16_363, %c127_364], %343 {strides = array<i32>} : memref<96x512xbf16, #tpu.memory_space<vmem>>, vector<16x1xbf16>,
    %cst_365 = arith.constant 0.000000e+00 : bf16
    %345 = vector.broadcast %cst_365 : bf16 to vector<16x1xbf16>
    %c16_366 = arith.constant 16 : index
    %c384_367 = arith.constant 384 : index
    %346 = vector.load %arg30[%c16_366, %c384_367] : memref<96x512xbf16, #tpu.memory_space<vmem>>, vector<16x1xbf16>
    tpu.vector_store %arg30[%c16_366, %c384_367], %345 {strides = array<i32>} : memref<96x512xbf16, #tpu.memory_space<vmem>>, vector<16x1xbf16>,
    %c16_368 = arith.constant 16 : index
    %c128_369 = arith.constant 128 : index
    %347 = vector.load %arg30[%c16_368, %c128_369] : memref<96x512xbf16, #tpu.memory_space<vmem>>, vector<16x256xbf16>
    tpu.vector_store %arg30[%c16_368, %c128_369], %339 {strides = array<i32>} : memref<96x512xbf16, #tpu.memory_space<vmem>>, vector<16x256xbf16>,
    %cst_370 = arith.constant 0.000000e+00 : bf16
    %348 = vector.broadcast %cst_370 : bf16 to vector<16x17xbf16>
    %c32_371 = arith.constant 32 : index
    %c368_372 = arith.constant 368 : index
    %349 = vector.load %arg30[%c32_371, %c368_372] : memref<96x512xbf16, #tpu.memory_space<vmem>>, vector<16x17xbf16>
    tpu.vector_store %arg30[%c32_371, %c368_372], %348 {strides = array<i32>} : memref<96x512xbf16, #tpu.memory_space<vmem>>, vector<16x17xbf16>,
    %c32_373 = arith.constant 32 : index
    %c112_374 = arith.constant 112 : index
    %350 = vector.load %arg30[%c32_373, %c112_374] : memref<96x512xbf16, #tpu.memory_space<vmem>>, vector<16x256xbf16>
    tpu.vector_store %arg30[%c32_373, %c112_374], %339 {strides = array<i32>} : memref<96x512xbf16, #tpu.memory_space<vmem>>, vector<16x256xbf16>,
    %c1_375 = arith.constant 1 : index
    %c0_376 = arith.constant 0 : index
    %c0_377 = arith.constant 0 : index
    %351 = vector.load %arg12[%c1_375, %c0_376, %c0_377] : memref<3x8x48xbf16, #tpu.memory_space<vmem>>, vector<1x8x48xbf16>
    %352 = vector.shape_cast %351 : vector<1x8x48xbf16> to vector<8x48xbf16>
    %c0_378 = arith.constant 0 : index
    %c128_379 = arith.constant 128 : index
    %353 = vector.load %arg30[%c0_378, %c128_379] : memref<96x512xbf16, #tpu.memory_space<vmem>>, vector<48x256xbf16>
    %cst_380 = arith.constant dense<0.000000e+00> : vector<8x256xf32>
    %354 = tpu.matmul %352, %353, %cst_380 {dimension_numbers = #tpu.dot_dimension_numbers<[1], [0], [0], [1], [0, 0, 1, 1], [], []>} : vector<8x48xbf16>, vector<48x256xbf16>, vector<8x256xf32> -> vector<8x256xf32>
    %c0_381 = arith.constant 0 : index
    %c0_382 = arith.constant 0 : index
    %c0_383 = arith.constant 0 : index
    %355 = vector.load %arg12[%c0_381, %c0_382, %c0_383] : memref<3x8x48xbf16, #tpu.memory_space<vmem>>, vector<1x8x48xbf16>
    %356 = vector.shape_cast %355 : vector<1x8x48xbf16> to vector<8x48xbf16>
    %c0_384 = arith.constant 0 : index
    %c127_385 = arith.constant 127 : index
    %357 = vector.load %arg30[%c0_384, %c127_385] : memref<96x512xbf16, #tpu.memory_space<vmem>>, vector<48x256xbf16>
    %cst_386 = arith.constant dense<0.000000e+00> : vector<8x256xf32>
    %358 = tpu.matmul %356, %357, %cst_386 {dimension_numbers = #tpu.dot_dimension_numbers<[1], [0], [0], [1], [0, 0, 1, 1], [], []>} : vector<8x48xbf16>, vector<48x256xbf16>, vector<8x256xf32> -> vector<8x256xf32>
    %359 = vector.broadcast %0 : vector<1x256xf32> to vector<8x256xf32>
    %360 = arith.mulf %359, %358 : vector<8x256xf32>
    %361 = arith.addf %354, %360 : vector<8x256xf32>
    %c2_387 = arith.constant 2 : index
    %c0_388 = arith.constant 0 : index
    %c0_389 = arith.constant 0 : index
    %362 = vector.load %arg12[%c2_387, %c0_388, %c0_389] : memref<3x8x48xbf16, #tpu.memory_space<vmem>>, vector<1x8x48xbf16>
    %363 = vector.shape_cast %362 : vector<1x8x48xbf16> to vector<8x48xbf16>
    %c0_390 = arith.constant 0 : index
    %c129_391 = arith.constant 129 : index
    %364 = vector.load %arg30[%c0_390, %c129_391] : memref<96x512xbf16, #tpu.memory_space<vmem>>, vector<48x256xbf16>
    %cst_392 = arith.constant dense<0.000000e+00> : vector<8x256xf32>
    %365 = tpu.matmul %363, %364, %cst_392 {dimension_numbers = #tpu.dot_dimension_numbers<[1], [0], [0], [1], [0, 0, 1, 1], [], []>} : vector<8x48xbf16>, vector<48x256xbf16>, vector<8x256xf32> -> vector<8x256xf32>
    %366 = vector.broadcast %1 : vector<1x256xf32> to vector<8x256xf32>
    %367 = arith.mulf %366, %365 : vector<8x256xf32>
    %368 = arith.addf %361, %367 : vector<8x256xf32>
    %c0_393 = arith.constant 0 : index
    %c0_394 = arith.constant 0 : index
    %369 = vector.load %arg22[%c0_393, %c0_394] : memref<8x1xf32, #tpu.memory_space<vmem>>, vector<8x1xf32>
    %370 = vector.broadcast %369 : vector<8x1xf32> to vector<8x256xf32>
    %371 = arith.addf %368, %370 : vector<8x256xf32>
    %cst_395 = arith.constant 0.000000e+00 : f32
    %372 = vector.broadcast %cst_395 : f32 to vector<8x256xf32>
    %373 = arith.maximumf %371, %372 : vector<8x256xf32>
    %c0_396 = arith.constant 0 : index
    %c0_397 = arith.constant 0 : index
    %374 = vector.load %arg27[%c0_396, %c0_397] : memref<8x8xbf16, #tpu.memory_space<vmem>>, vector<8x8xbf16>
    %375 = arith.truncf %373 : vector<8x256xf32> to vector<8x256xbf16>
    %cst_398 = arith.constant dense<0.000000e+00> : vector<8x256xf32>
    %376 = tpu.matmul %374, %375, %cst_398 {dimension_numbers = #tpu.dot_dimension_numbers<[1], [0], [0], [1], [0, 0, 1, 1], [], []>} : vector<8x8xbf16>, vector<8x256xbf16>, vector<8x256xf32> -> vector<8x256xf32>
    %c0_399 = arith.constant 0 : index
    %c0_400 = arith.constant 0 : index
    %377 = vector.load %arg28[%c0_399, %c0_400] : memref<8x1xf32, #tpu.memory_space<vmem>>, vector<8x1xf32>
    %378 = vector.broadcast %377 : vector<8x1xf32> to vector<8x256xf32>
    %379 = arith.addf %376, %378 : vector<8x256xf32>
    %380 = vector.extract_strided_slice %379 {offsets = [0, 0], sizes = [1, 256], strides = [1, 1]} : vector<8x256xf32> to vector<1x256xf32>
    %c0_401 = arith.constant 0 : index
    %c0_402 = arith.constant 0 : index
    %c0_403 = arith.constant 0 : index
    %381 = vector.load %arg29[%c0_401, %c0_402, %c0_403] : memref<1x1x256xf32, #tpu.memory_space<vmem>>, vector<1x1x256xf32>
    %382 = vector.shape_cast %381 : vector<1x1x256xf32> to vector<1x256xf32>
    %383 = vector.shape_cast %380 : vector<1x256xf32> to vector<1x1x256xf32>
    tpu.vector_store %arg29[%c0_401, %c0_402, %c0_403], %383 {strides = array<i32>} : memref<1x1x256xf32, #tpu.memory_space<vmem>>, vector<1x1x256xf32>,
    return
  }
  func.func @transform_0(%arg0: i32) -> (i32, i32, i32) {
    %c0_i32 = arith.constant 0 : i32
    %c0_i32_0 = arith.constant 0 : i32
    %c0_i32_1 = arith.constant 0 : i32
    return %arg0, %c0_i32, %c0_i32_0 : i32, i32, i32
  }
  func.func @transform_1(%arg0: i32) -> (i32, i32) {
    %c0_i32 = arith.constant 0 : i32
    %c0_i32_0 = arith.constant 0 : i32
    %c0_i32_1 = arith.constant 0 : i32
    return %c0_i32, %c0_i32_0 : i32, i32
  }
  func.func @transform_2(%arg0: i32) -> (i32, i32, i32) {
    %c0_i32 = arith.constant 0 : i32
    %c0_i32_0 = arith.constant 0 : i32
    %c0_i32_1 = arith.constant 0 : i32
    %c0_i32_2 = arith.constant 0 : i32
    return %c0_i32, %c0_i32_0, %c0_i32_1 : i32, i32, i32
  }
  func.func @transform_3(%arg0: i32) -> (i32, i32, i32) {
    %c0_i32 = arith.constant 0 : i32
    %c0_i32_0 = arith.constant 0 : i32
    %c0_i32_1 = arith.constant 0 : i32
    %c0_i32_2 = arith.constant 0 : i32
    return %c0_i32, %c0_i32_0, %c0_i32_1 : i32, i32, i32
  }
  func.func @transform_4(%arg0: i32) -> (i32, i32, i32) {
    %c0_i32 = arith.constant 0 : i32
    %c0_i32_0 = arith.constant 0 : i32
    %c0_i32_1 = arith.constant 0 : i32
    %c0_i32_2 = arith.constant 0 : i32
    return %c0_i32, %c0_i32_0, %c0_i32_1 : i32, i32, i32
  }
  func.func @transform_5(%arg0: i32) -> (i32, i32, i32) {
    %c0_i32 = arith.constant 0 : i32
    %c0_i32_0 = arith.constant 0 : i32
    %c0_i32_1 = arith.constant 0 : i32
    %c0_i32_2 = arith.constant 0 : i32
    return %c0_i32, %c0_i32_0, %c0_i32_1 : i32, i32, i32
  }
  func.func @transform_6(%arg0: i32) -> (i32, i32, i32) {
    %c0_i32 = arith.constant 0 : i32
    %c0_i32_0 = arith.constant 0 : i32
    %c0_i32_1 = arith.constant 0 : i32
    %c0_i32_2 = arith.constant 0 : i32
    return %c0_i32, %c0_i32_0, %c0_i32_1 : i32, i32, i32
  }
  func.func @transform_7(%arg0: i32) -> (i32, i32, i32) {
    %c0_i32 = arith.constant 0 : i32
    %c0_i32_0 = arith.constant 0 : i32
    %c0_i32_1 = arith.constant 0 : i32
    %c0_i32_2 = arith.constant 0 : i32
    return %c0_i32, %c0_i32_0, %c0_i32_1 : i32, i32, i32
  }
  func.func @transform_8(%arg0: i32) -> (i32, i32, i32) {
    %c0_i32 = arith.constant 0 : i32
    %c0_i32_0 = arith.constant 0 : i32
    %c0_i32_1 = arith.constant 0 : i32
    %c0_i32_2 = arith.constant 0 : i32
    return %c0_i32, %c0_i32_0, %c0_i32_1 : i32, i32, i32
  }
  func.func @transform_9(%arg0: i32) -> (i32, i32, i32) {
    %c0_i32 = arith.constant 0 : i32
    %c0_i32_0 = arith.constant 0 : i32
    %c0_i32_1 = arith.constant 0 : i32
    %c0_i32_2 = arith.constant 0 : i32
    return %c0_i32, %c0_i32_0, %c0_i32_1 : i32, i32, i32
  }
  func.func @transform_10(%arg0: i32) -> (i32, i32, i32) {
    %c0_i32 = arith.constant 0 : i32
    %c0_i32_0 = arith.constant 0 : i32
    %c0_i32_1 = arith.constant 0 : i32
    %c0_i32_2 = arith.constant 0 : i32
    return %c0_i32, %c0_i32_0, %c0_i32_1 : i32, i32, i32
  }
  func.func @transform_11(%arg0: i32) -> (i32, i32, i32) {
    %c0_i32 = arith.constant 0 : i32
    %c0_i32_0 = arith.constant 0 : i32
    %c0_i32_1 = arith.constant 0 : i32
    %c0_i32_2 = arith.constant 0 : i32
    return %c0_i32, %c0_i32_0, %c0_i32_1 : i32, i32, i32
  }
  func.func @transform_12(%arg0: i32) -> (i32, i32) {
    %c0_i32 = arith.constant 0 : i32
    %c0_i32_0 = arith.constant 0 : i32
    %c0_i32_1 = arith.constant 0 : i32
    return %c0_i32, %c0_i32_0 : i32, i32
  }
  func.func @transform_13(%arg0: i32) -> (i32, i32) {
    %c0_i32 = arith.constant 0 : i32
    %c0_i32_0 = arith.constant 0 : i32
    %c0_i32_1 = arith.constant 0 : i32
    return %c0_i32, %c0_i32_0 : i32, i32
  }
  func.func @transform_14(%arg0: i32) -> (i32, i32) {
    %c0_i32 = arith.constant 0 : i32
    %c0_i32_0 = arith.constant 0 : i32
    %c0_i32_1 = arith.constant 0 : i32
    return %c0_i32, %c0_i32_0 : i32, i32
  }
  func.func @transform_15(%arg0: i32) -> (i32, i32) {
    %c0_i32 = arith.constant 0 : i32
    %c0_i32_0 = arith.constant 0 : i32
    %c0_i32_1 = arith.constant 0 : i32
    return %c0_i32, %c0_i32_0 : i32, i32
  }
  func.func @transform_16(%arg0: i32) -> (i32, i32) {
    %c0_i32 = arith.constant 0 : i32
    %c0_i32_0 = arith.constant 0 : i32
    %c0_i32_1 = arith.constant 0 : i32
    return %c0_i32, %c0_i32_0 : i32, i32
  }
  func.func @transform_17(%arg0: i32) -> (i32, i32) {
    %c0_i32 = arith.constant 0 : i32
    %c0_i32_0 = arith.constant 0 : i32
    %c0_i32_1 = arith.constant 0 : i32
    return %c0_i32, %c0_i32_0 : i32, i32
  }
  func.func @transform_18(%arg0: i32) -> (i32, i32) {
    %c0_i32 = arith.constant 0 : i32
    %c0_i32_0 = arith.constant 0 : i32
    %c0_i32_1 = arith.constant 0 : i32
    return %c0_i32, %c0_i32_0 : i32, i32
  }
  func.func @transform_19(%arg0: i32) -> (i32, i32) {
    %c0_i32 = arith.constant 0 : i32
    %c0_i32_0 = arith.constant 0 : i32
    %c0_i32_1 = arith.constant 0 : i32
    return %c0_i32, %c0_i32_0 : i32, i32
  }
  func.func @transform_20(%arg0: i32) -> (i32, i32) {
    %c0_i32 = arith.constant 0 : i32
    %c0_i32_0 = arith.constant 0 : i32
    %c0_i32_1 = arith.constant 0 : i32
    return %c0_i32, %c0_i32_0 : i32, i32
  }
  func.func @transform_21(%arg0: i32) -> (i32, i32) {
    %c0_i32 = arith.constant 0 : i32
    %c0_i32_0 = arith.constant 0 : i32
    %c0_i32_1 = arith.constant 0 : i32
    return %c0_i32, %c0_i32_0 : i32, i32
  }
  func.func @transform_22(%arg0: i32) -> (i32, i32) {
    %c0_i32 = arith.constant 0 : i32
    %c0_i32_0 = arith.constant 0 : i32
    %c0_i32_1 = arith.constant 0 : i32
    return %c0_i32, %c0_i32_0 : i32, i32
  }
  func.func @transform_23(%arg0: i32) -> (i32, i32) {
    %c0_i32 = arith.constant 0 : i32
    %c0_i32_0 = arith.constant 0 : i32
    %c0_i32_1 = arith.constant 0 : i32
    return %c0_i32, %c0_i32_0 : i32, i32
  }
  func.func @transform_24(%arg0: i32) -> (i32, i32) {
    %c0_i32 = arith.constant 0 : i32
    %c0_i32_0 = arith.constant 0 : i32
    %c0_i32_1 = arith.constant 0 : i32
    return %c0_i32, %c0_i32_0 : i32, i32
  }
  func.func @transform_25(%arg0: i32) -> (i32, i32) {
    %c0_i32 = arith.constant 0 : i32
    %c0_i32_0 = arith.constant 0 : i32
    %c0_i32_1 = arith.constant 0 : i32
    return %c0_i32, %c0_i32_0 : i32, i32
  }
  func.func @transform_26(%arg0: i32) -> (i32, i32) {
    %c0_i32 = arith.constant 0 : i32
    %c0_i32_0 = arith.constant 0 : i32
    %c0_i32_1 = arith.constant 0 : i32
    return %c0_i32, %c0_i32_0 : i32, i32
  }
  func.func @transform_27(%arg0: i32) -> (i32, i32) {
    %c0_i32 = arith.constant 0 : i32
    %c0_i32_0 = arith.constant 0 : i32
    %c0_i32_1 = arith.constant 0 : i32
    return %c0_i32, %c0_i32_0 : i32, i32
  }
  func.func @transform_28(%arg0: i32) -> (i32, i32, i32) {
    %c0_i32 = arith.constant 0 : i32
    %c0_i32_0 = arith.constant 0 : i32
    %c0_i32_1 = arith.constant 0 : i32
    return %arg0, %c0_i32, %c0_i32_0 : i32, i32, i32
  }
}

</mosaic_0001>

<bundles_post_ra>
// kernel: unet_forward.1
= control target key start
LH: loop header
LB: loop body
LE: loop exit
PB: predicated region body
PF: predicated region fallthrough
CT: control target
= control target key end

     0   :  { %s6144_s0 = inlined_call_operand.vmem [shape: f32[2,16,256], index: 0, kind: input, shape index: {}]   ;;  %s6145_s1 = inlined_call_operand.vmem [shape: f32[2,256], index: 1, kind: input, shape index: {}]   ;;  %s6146_s2 = inlined_call_operand.vmem [shape: bf16[3,8,48], index: 2, kind: input, shape index: {}]   ;;  %s6147_s3 = inlined_call_operand.vmem [shape: bf16[3,8,48], index: 3, kind: input, shape index: {}]   ;;  %s6148_s4 = inlined_call_operand.vmem [shape: bf16[3,16,48], index: 4, kind: input, shape index: {}]   ;;  %s6149_s5 = inlined_call_operand.vmem [shape: bf16[3,16,48], index: 5, kind: input, shape index: {}]   ;;  %s6150_s6 = inlined_call_operand.vmem [shape: bf16[3,32,48], index: 6, kind: input, shape index: {}]   ;;  %s6151_s7 = inlined_call_operand.vmem [shape: bf16[3,32,96], index: 7, kind: input, shape index: {}]   ;;  %s6152_s8 = inlined_call_operand.vmem [shape: bf16[3,16,96], index: 8, kind: input, shape index: {}]   ;;  %s6153_s9 = inlined_call_operand.vmem [shape: bf16[3,16,48], index: 9, kind: input, shape index: {}]   ;;  %s6154_s10 = inlined_call_operand.vmem [shape: bf16[3,8,48], index: 10, kind: input, shape index: {}]   ;;  %s6155_s11 = inlined_call_operand.vmem [shape: bf16[3,8,48], index: 11, kind: input, shape index: {}]   ;;  %s6156_s12 = inlined_call_operand.vmem [shape: f32[8,1], index: 12, kind: input, shape index: {}]   ;;  %s6157_s13 = inlined_call_operand.vmem [shape: f32[8,1], index: 13, kind: input, shape index: {}]   ;;  %s6158_s14 = inlined_call_operand.vmem [shape: f32[16,1], index: 14, kind: input, shape index: {}]   ;;  %s6159_s15 = inlined_call_operand.vmem [shape: f32[16,1], index: 15, kind: input, shape index: {}]   ;;  %s6160_s16 = inlined_call_operand.vmem [shape: f32[32,1], index: 16, kind: input, shape index: {}]   ;;  %s6161_s17 = inlined_call_operand.vmem [shape: f32[32,1], index: 17, kind: input, shape index: {}]   ;;  %s6162_s18 = inlined_call_operand.vmem [shape: f32[16,1], index: 18, kind: input, shape index: {}]   ;;  %s6163_s19 = inlined_call_operand.vmem [shape: f32[16,1], index: 19, kind: input, shape index: {}]   ;;  %s6164_s20 = inlined_call_operand.vmem [shape: f32[8,1], index: 20, kind: input, shape index: {}]   ;;  %s6165_s21 = inlined_call_operand.vmem [shape: f32[8,1], index: 21, kind: input, shape index: {}]   ;;  %s6166_s22 = inlined_call_operand.vmem [shape: bf16[16,32], index: 22, kind: input, shape index: {}]   ;;  %s6167_s23 = inlined_call_operand.vmem [shape: bf16[8,16], index: 23, kind: input, shape index: {}]   ;;  %s6168_s24 = inlined_call_operand.vmem [shape: f32[16,1], index: 24, kind: input, shape index: {}]   ;;  %s6169_s25 = inlined_call_operand.vmem [shape: f32[8,1], index: 25, kind: input, shape index: {}]   ;;  %s6170_s26 = inlined_call_operand.vmem [shape: bf16[8,8], index: 26, kind: input, shape index: {}]   ;;  %s6171_s27 = inlined_call_operand.vmem [shape: f32[8,1], index: 27, kind: input, shape index: {}]   ;;  %s6172_s28 = inlined_call_operand.vmem [shape: f32[2,1,256], index: 28, kind: output, shape index: {}]  }
   0x1   :  { %6197 = sst [smem:[#allocation3_spill]] %s6144_s0 }
   0x2   :  { %6198 = sst [smem:[#allocation4_spill]] %s6145_s1 }
   0x3   :  { %6199 = sst [smem:[#allocation5_spill]] %s6146_s2 }
   0x4   :  { %6200 = sst [smem:[#allocation6_spill]] %s6147_s3 }
   0x5   :  { %6201 = sst [smem:[#allocation7_spill]] %s6148_s4 }
   0x6   :  { %6202 = sst [smem:[#allocation8_spill]] %s6149_s5 }
   0x7   :  { %6203 = sst [smem:[#allocation9_spill]] %s6150_s6 }
   0x8   :  { %6204 = sst [smem:[#allocation10_spill]] %s6151_s7 }
   0x9   :  { %6205 = sst [smem:[#allocation11_spill]] %s6152_s8  ;;  %s4960_s8 = smov 0  }
   0xa   :  { %6206 = sst [smem:[#allocation12_spill]] %s6153_s9 }
   0xb   :  { %6207 = sst [smem:[#allocation13_spill]] %s6154_s10 }
   0xc   :  { %6208 = sst [smem:[#allocation14_spill]] %s6155_s11 }
   0xd   :  { %6209 = sst [smem:[#allocation15_spill]] %s6156_s12 }
   0xe   :  { %6210 = sst [smem:[#allocation16_spill]] %s6157_s13 }
   0xf   :  { %6211 = sst [smem:[#allocation17_spill]] %s6158_s14 }
  0x10 LB: > { %s4640_s5 = sadd.s32 4294967295, %s4806_s8   ;;  %p4644_p0 = scmp.ge.s32.totalorder %s4806_s8, 1  ;;  %s4806_s8 = sphi %s4960_s8, %s38_s8  }
  0x11   : > { %p762_p1 = scmp.lt.s32.totalorder %s4806_s8, 3 }
  0x13   : > { %p763_p2 = pnand %p4644_p0, %p762_p1 }
  0x14   : > { %p835_p3 = scmp.lt.s32.totalorder (!%p763_p2), %s4640_s5, 1  ;;  %vm856_vm0 = vcmask (!%p763_p2), 130048   ;;  %vm878_vm1 = vcmask (!%p763_p2), 1048448   ;;  %v4808_v0 = vmov (!%p763_p2), 0   ;;  %vm854_vm2 = vcmask (!%p763_p2), 1048568   ;;  %s6212_s6 = sld [smem:[#allocation3_spill]] (!%p763_p2) }
  0x15   : > { %766 = sbr.rel (%p763_p2) target bundleno = 5677 (0x162d), region = 132  ;;  %857 = vst.msk [vmem:[#allocation2 + $0x8] sm:$0xff] (!%p763_p2), %vm856_vm0, %v4808_v0  ;;  %982 = vmatprep.mubr.bf16.mxu0 (!%p763_p2), %v4808_v0  ;;  %1039 = vmatprep.mubr.bf16.mxu1 (!%p763_p2), %v4808_v0  ;;  %s6188_s0 = smov (!%p763_p2), 16   ;;  %vm874_vm3 = vcmask (!%p763_p2), 7168   ;;  %vm869_vm4 = vcmask (!%p763_p2), 1047680   ;;  %vm885_vm5 = vcmask (!%p763_p2), 916480   ;;  %v992_v61 = vlaneseq (!%p763_p2) }
  0x16   : > { %879 = vst.msk [vmem:[#allocation2 + $0x50] sm:$0xff] (!%p763_p2), %vm878_vm1, %v4808_v0  ;;  %2554 = vst.msk [vmem:[#allocation2 + $0x90] sm:$0xff] (!%p763_p2), %vm878_vm1, %v4808_v0  ;;  %4772 = vset.pattern.permute.xlu0 (!%p763_p2), %v4808_v0  ;;  %4773 = vset.pattern.permute.xlu1 (!%p763_p2), %v4808_v0  ;;  %s6184_s11 = smov (!%p763_p2), 112   ;;  %s6186_s29 = smov (!%p763_p2), 1   ;;  %vm946_vm6 = vcmask (!%p763_p2), 392192   ;;  %vm1086_vm7 = vcmask (!%p763_p2), 1039360  }
  0x17   : > { %2556 = vst.msk [vmem:[#allocation2 + $0xb0] sm:$0xff] (!%p763_p2), %vm878_vm1, %v4808_v0  ;;  %s6195_s2 = smov (!%p763_p2), 127   ;;  %s6213_s1 = sld [smem:[#allocation5_spill]] (!%p763_p2)  ;;  %v5084_v62 = vshrl.u32 (!%p763_p2), %v992_v61, 7  ;;  %vm2695_vm8 = vcmask (!%p763_p2), 785408   ;;  %vm3081_vm9 = vcmask (!%p763_p2), 261120  }
  0x18   : > { %855 = vst.msk [vmem:[#allocation2] sm:$0xff] (!%p763_p2), %vm854_vm2, %v4808_v0  ;;  %873 = vst.msk [vmem:[#allocation2 + $0x20] sm:$0xff] (!%p763_p2), %vm854_vm2, %v4808_v0  ;;  %s6214_s30 = sld [smem:[#allocation15_spill]] (!%p763_p2)  ;;  %s6216_s7 = sld [smem:[#allocation6_spill]] (!%p763_p2)  ;;  %vm4516_vm10 = vcmask (!%p763_p2), 1043456   ;;  %vm4512_vm11 = vcmask (!%p763_p2), 64512  }
  0x19   : > { %2547 = vst.msk [vmem:[#allocation2 + $0x60] sm:$0xff] (!%p763_p2), %vm854_vm2, %v4808_v0  ;;  %v994_v63 = vsub.s32 (!%p763_p2), 0, %v5084_v62  ;;  %s6217_s13 = sld [smem:[#allocation16_spill]] (!%p763_p2)  ;;  %s6219_s14 = sld [smem:[#allocation17_spill]] (!%p763_p2)  ;;  %vm4584_vm12 = vcmp.lt.s32.totalorder (!%p763_p2), %v992_v61, 256 }
  0x1a   : > { %875 = vst.msk [vmem:[#allocation2 + $0x38] sm:$0xff] (!%p763_p2), %vm874_vm3, %v4808_v0  ;;  %880 = vst.msk [vmem:[#allocation2 + $0x58] sm:$0xff] (!%p763_p2), %vm874_vm3, %v4808_v0  ;;  %s6220_s3 = sld [smem:[#allocation8_spill]] (!%p763_p2)  ;;  %s6221_s12 = sld [smem:[#allocation9_spill]] (!%p763_p2) }
  0x1b   : > { %2549 = vst.msk [vmem:[#allocation2 + $0x78] sm:$0xff] (!%p763_p2), %vm874_vm3, %v4808_v0  ;;  %2555 = vst.msk [vmem:[#allocation2 + $0x98] sm:$0xff] (!%p763_p2), %vm874_vm3, %v4808_v0  ;;  %s6230_s4 = sld [smem:[#allocation14_spill]] (!%p763_p2) }
  0x1c   : > { %s6232_s5 = smov (!%p835_p3, %s4640_s5), 1  ;;  %2557 = vst.msk [vmem:[#allocation2 + $0xb8] sm:$0xff] %vm874_vm3, %v4808_v0 }
  0x1d   : > { %s4756_s9 = sshll.u32 %s6232_s5, 5  ;;  %v4649_v21 = vld [vmem:[%s6213_s1 + $0x4] sm:$0xf]  ;;  %v902_v42 = vld [vmem:[%s6213_s1] sm:$0xf] }
  0x1e   : > { %s839_s10 = scalar_lea.vmem %s6212_s6, %s4756_s9  ;;  %v1158_v22 = vld [vmem:[%s6214_s30] sm:$0xff]  ;;  %v4652_v54 = vld [vmem:[%s6213_s1 + $0x8] sm:$0xf]  ;;  %s6215_s9 = sld [smem:[#allocation4_spill]] }
  0x1f   : > { %v848_v1 = vld [vmem:[%s839_s10] sm:$0xff]  ;;  %v850_v2 = vld [vmem:[%s839_s10 + $0x10] sm:$0xff]  ;;  %v849_v3 = vld [vmem:[%s839_s10 + $0x8] sm:$0xff]  ;;  %s6218_s30 = sld [smem:[#allocation7_spill]]  ;;  %s6224_s1 = smov 1  }
  0x20   : > { %v4992_v4 = vpack.c.bf16 %v850_v2, %v848_v1  ;;  %v851_v5 = vld [vmem:[%s839_s10 + $0x18] sm:$0xff]  ;;  %v903_v7 = vld [vmem:[#allocation2] sm:$0xff]  ;;  %v998_v2 = vsub.s32 1, %v5084_v62  ;;  %s6225_s10 = sld [smem:[#allocation10_spill]] }
  0x21   : > { %v853_v6 = vpack.c.bf16 %v851_v5, %v849_v3  ;;  %v904_v8 = vld [vmem:[#allocation2 + $0x20] sm:$0xff]  ;;  %1170 = vst.msk [vmem:[#allocation2] sm:$0xff] %vm854_vm2, %v4808_v0  ;;  %v1055_v9 = vld [vmem:[#allocation2 + $0x38] sm:$0xff] }
  0x22   : > { %860 = vrot.lane.b32.xlu0 %v4992_v4, %s6188_s0  ;;  %881 = vrot.lane.b32.xlu1 %v4992_v4, %s6184_s11  ;;  %1185 = vst.msk [vmem:[#allocation2 + $0x20] sm:$0xff] %vm854_vm2, %v4808_v0  ;;  %v1058_v10 = vld [vmem:[#allocation2 + $0x58] sm:$0xff] }
  0x23   : > { %1186 = vst.msk [vmem:[#allocation2 + $0x38] sm:$0xff] %vm874_vm3, %v4808_v0  ;;  %1190 = vst.msk [vmem:[#allocation2 + $0x58] sm:$0xff] %vm874_vm3, %v4808_v0 }
  0x24   : > { %v845_v1 = vld [vmem:[%s6215_s9] ss:$2 sm:$0x3] }
  0x25   : > { %v5091_v3 = vrot.slane %v845_v1, %v994_v63 }
  0x26   : > { %862 = vrot.lane.b32.xlu0 %v853_v6, %s6188_s0  ;;  %883 = vrot.lane.b32.xlu1 %v853_v6, %s6184_s11 }
  0x28   : > { %v1211_v59 = vld [vmem:[#allocation2] sm:$0xff] }
  0x29   : > { %1453 = vst.msk [vmem:[#allocation2] sm:$0xff] %vm854_vm2, %v4808_v0  ;;  %v1212_v60 = vld [vmem:[#allocation2 + $0x20] sm:$0xff] }
  0x2a   : > { %915 = vrot.lane.b32.xlu0 %v903_v7, %s6186_s29  ;;  %921 = vrot.lane.b32.xlu1 %v904_v8, %s6186_s29  ;;  %1468 = vst.msk [vmem:[#allocation2 + $0x20] sm:$0xff] %vm854_vm2, %v4808_v0 }
  0x2e   : > { %925 = vrot.lane.b32.xlu0 %v853_v6, %s6186_s29  ;;  %923 = vrot.lane.b32.xlu1 %v4992_v4, %s6186_s29 }
  0x94   : > { %v861_v11 = vpop.permute.xlu0 %860  ;;  %v882_v12 = vpop.permute.xlu1 %881 }
  0x95   : > { %870 = vst.msk [vmem:[#allocation2 + $0x8] sm:$0xff] %vm869_vm4, %v861_v11 }
  0x96   : > { %890 = vst.msk [vmem:[#allocation2 + $0x40] sm:$0xff] %vm878_vm1, %v882_v12 }
  0x98   : > { %v863_v13 = vpop.permute.xlu0 %862  ;;  %v884_v14 = vpop.permute.xlu1 %883 }
  0x99   : > { %v865_v15 = vsel %vm856_vm0, %v861_v11, %v863_v13  ;;  %872 = vst.msk [vmem:[#allocation2 + $0x18] sm:$0xff] %vm856_vm0, %v863_v13  ;;  %v886_v20 = vsel %vm885_vm5, %v882_v12, %v884_v14  ;;  %v4648_v13 = vld [vmem:[%s6215_s9 + $0x1] ss:$2 sm:$0x3]  ;;  %s6227_s9 = sld [smem:[#allocation11_spill]] }
  0x9a   : > { %893 = vst.msk [vmem:[#allocation2 + $0x50] sm:$0xff] %vm885_vm5, %v884_v14  ;;  %1007 = vmatprep.subr.bf16.mxu1 %v865_v15  ;;  %919 = vrot.lane.b32.xlu1 %v865_v15, %s6186_s29  ;;  %v5100_v14 = vrot.slane %v4648_v13, %v994_v63 }
  0x9c   : > { %v896_v16 = vld [vmem:[#allocation2 + $0x8] sm:$0xff]  ;;  %v916_v23 = vpop.permute.xlu0 %915  ;;  %v922_v24 = vpop.permute.xlu1 %921 }
  0x9d   : > { %917 = vrot.lane.b32.xlu0 %v896_v16, %s6186_s29  ;;  %1008 = vmatpush1.bf16.msra.mxu1 %v896_v16  ;;  %1171 = vst.msk [vmem:[#allocation2 + $0x8] sm:$0xff] %vm856_vm0, %v4808_v0  ;;  %v905_v17 = vld [vmem:[#allocation2 + $0x40] sm:$0xff] }
  0x9e   : > { %1009 = vmatprep.subr.bf16.mxu1 %v853_v6 }
  0xa0   : > { %v1052_v19 = vld [vmem:[#allocation2 + $0x18] sm:$0xff]  ;;  %v926_v25 = vpop.permute.xlu0 %925  ;;  %v924_v26 = vpop.permute.xlu1 %923 }
  0xa1   : > { %v901_v18 = vld [vmem:[#allocation2 + $0x50] sm:$0xff]  ;;  %927 = vrot.lane.b32.xlu0 %v905_v17, %s6186_s29  ;;  %1010 = vmatpush1.bf16.msra.mxu1 %v4992_v4  ;;  %v937_v31 = vsel %vm874_vm3, %v924_v26, %v926_v25  ;;  %v936_v34 = vsel %vm874_vm3, %v922_v24, %v924_v26 }
  0xa2   : > { %931 = vrot.lane.b32.xlu1 %v901_v18, %s6186_s29  ;;  %1189 = vst.msk [vmem:[#allocation2 + $0x50] sm:$0xff] %vm878_vm1, %v4808_v0  ;;  %1011 = vmatprep.subr.bf16.mxu1 %v901_v18 }
  0xa5   : > { %1072 = vrot.lane.b32.xlu0 %v1052_v19, %s6195_s2  ;;  %1012 = vmatpush1.bf16.msra.mxu1 %v886_v20 }
  0xa6   : > { %1068 = vrot.lane.b32.xlu1 %v896_v16, %s6195_s2 }
  0xa8   : > { %4651 = vmatmul.mubr.msk.bf16.vlgmr.msra.gmra.mrb[0].mxu1 %vm946_vm6, %v4649_v21 }
  0xa9   : > { %929 = vrot.lane.b32.xlu0 %v886_v20, %s6186_s29  ;;  %1288 = vmatprep.mubr.bf16.mxu1 %v4808_v0 }
  0xaa   : > { %1070 = vrot.lane.b32.xlu1 %v865_v15, %s6195_s2  ;;  %v5102_v15 = vrot.slane %v4648_v13, %v998_v2 }
  0xad   : > { %1076 = vrot.lane.b32.xlu0 %v853_v6, %s6195_s2 }
  0xae   : > { %1078 = vrot.lane.b32.xlu1 %v1055_v9, %s6195_s2 }
  0xb1   : > { %1074 = vrot.lane.b32.xlu0 %v4992_v4, %s6195_s2  ;;  %v5093_v4 = vrot.slane %v845_v1, %v998_v2  ;;  %v1210_v2 = vld [vmem:[%s6216_s7] sm:$0xf] }
  0xb2   : > { %1082 = vrot.lane.b32.xlu1 %v901_v18, %s6195_s2 }
  0xb5   : > { %1084 = vrot.lane.b32.xlu0 %v1058_v10, %s6195_s2 }
  0xb6   : > { %1080 = vrot.lane.b32.xlu1 %v886_v20, %s6195_s2 }
  0xb9   : > { %1161 = vperm.xlu0 %4772, %v1158_v22  }
 0x10c   : > { %v920_v28 = vpop.permute.xlu1 %919 }
 0x10f   : > { %v918_v27 = vpop.permute.xlu0 %917 }
 0x110   : > { %v935_v29 = vsel %vm874_vm3, %v918_v27, %v920_v28  ;;  %v934_v30 = vsel %vm874_vm3, %v916_v23, %v918_v27 }
 0x111   : > { %950 = vmatprep.subr.bf16.mxu0 %v935_v29  ;;  %v4813_v29 = vmov 0.0  }
 0x112   : > { %951 = vmatpush1.bf16.msra.mxu0 %v934_v30 }
 0x113   : > { %v928_v32 = vpop.permute.xlu0 %927  ;;  %952 = vmatprep.subr.bf16.mxu0 %v937_v31 }
 0x114   : > { %v932_v33 = vpop.permute.xlu1 %931 }
 0x116   : > { %953 = vmatpush1.bf16.msra.mxu0 %v936_v34 }
 0x117   : > { %v1073_v35 = vpop.permute.xlu0 %1072 }
 0x118   : > { %v1069_v36 = vpop.permute.xlu1 %1068 }
 0x11b   : > { %v930_v37 = vpop.permute.xlu0 %929 }
 0x11c   : > { %v1071_v38 = vpop.permute.xlu1 %1070  ;;  %v939_v39 = vsel %vm874_vm3, %v930_v37, %v932_v33  ;;  %v938_v40 = vsel %vm874_vm3, %v928_v32, %v930_v37  ;;  %v1350_v32 = vld [vmem:[#allocation2 + $0x38] sm:$0xff] }
 0x11d   : > { %954 = vmatprep.subr.bf16.mxu0 %v939_v39  ;;  %v1088_v41 = vsel %vm1086_vm7, %v1071_v38, %v1073_v35  ;;  %v1087_v45 = vsel %vm1086_vm7, %v1069_v36, %v1071_v38  ;;  %v1353_v33 = vld [vmem:[#allocation2 + $0x58] sm:$0xff]  ;;  %1469 = vst.msk [vmem:[#allocation2 + $0x38] sm:$0xff] %vm874_vm3, %v4808_v0 }
 0x11e   : > { %955 = vmatpush1.bf16.msra.mxu0 %v938_v40  ;;  %1473 = vst.msk [vmem:[#allocation2 + $0x58] sm:$0xff] %vm874_vm3, %v4808_v0 }
 0x11f   : > { %v1077_v43 = vpop.permute.xlu0 %1076  ;;  %1102 = vmatprep.subr.bf16.mxu0 %v1088_v41 }
 0x120   : > { %v1079_v44 = vpop.permute.xlu1 %1078 }
 0x121   : > { %4650 = vmatmul.mubr.msk.bf16.vlgmr.msra.gmra.mrb[0].mxu0 %vm946_vm6, %v902_v42  ;;  %v1090_v46 = vsel %vm1086_vm7, %v1077_v43, %v1079_v44  ;;  %v4654_v44 = vld [vmem:[%s6216_s7 + $0x4] sm:$0xf] }
 0x122   : > { %1103 = vmatpush1.bf16.msra.mxu0 %v1087_v45  ;;  %1134 = vmatprep.mubr.bf16.mxu0 %v4808_v0  ;;  %v1441_v45 = vld [vmem:[%s6217_s13] sm:$0xff]  ;;  %s6226_s13 = smov 127  }
 0x123   : > { %v1075_v47 = vpop.permute.xlu0 %1074  ;;  %1104 = vmatprep.subr.bf16.mxu0 %v1090_v46 }
 0x124   : > { %v1083_v48 = vpop.permute.xlu1 %1082  ;;  %v1089_v49 = vsel %vm1086_vm7, %v1075_v47, %v1077_v43 }
 0x126   : > { %1105 = vmatpush1.bf16.msra.mxu0 %v1089_v49 }
 0x127   : > { %v1085_v50 = vpop.permute.xlu0 %1084 }
 0x128   : > { %v1081_v51 = vpop.permute.xlu1 %1080  ;;  %v1092_v52 = vsel %vm1086_vm7, %v1083_v48, %v1085_v50 }
 0x129   : > { %v1091_v53 = vsel %vm1086_vm7, %v1081_v51, %v1083_v48  ;;  %1106 = vmatprep.subr.bf16.mxu0 %v1092_v52 }
 0x12a   : > { %1107 = vmatpush1.bf16.msra.mxu0 %v1091_v53 }
 0x12d   : > { %4653 = vmatmul.mubr.msk.bf16.vlgmr.msra.gmra.mrb[4].mxu0 %vm946_vm6, %v4652_v54 }
 0x12e   : > { %1334 = vmatprep.mubr.bf16.mxu0 %v4808_v0 }
 0x138   : > { %v1162_v21 = vpop.permute.xlu0 %1161 }
 0x17b   : > { %v1041_v55 = vpop.f32.mrb[0].mxu1 }
 0x17c   : > { %v1043_v56 = vpop.f32.mrb[1].mxu1 }
 0x17d   : > { %v1045_v57 = vpop.f32.mrb[2].mxu1 }
 0x17e   : > { %v1046_v58 = vpop.f32.mrb[3].mxu1 }
 0x1f4   : > { %v984_v5 = vpop.f32.mrb[0].mxu0 }
 0x1f5   : > { %v1002_v6 = vmul.f32 %v5091_v3, %v984_v5  ;;  %v986_v7 = vpop.f32.mrb[1].mxu0 }
 0x1f6   : > { %v1003_v8 = vmul.f32 %v5093_v4, %v986_v7  ;;  %v988_v9 = vpop.f32.mrb[2].mxu0 }
 0x1f7   : > { %v989_v10 = vpop.f32.mrb[3].mxu0  ;;  %v1042_v11 = vadd.f32 %v1041_v55, %v1002_v6 }
 0x1f8   : > { %v1044_v12 = vadd.f32 %v1043_v56, %v1003_v8 }
 0x200   : > { %v1136_v16 = vpop.f32.mrb[4].mxu0 }
 0x201   : > { %v1154_v17 = vmul.f32 %v5100_v14, %v1136_v16  ;;  %v1138_v18 = vpop.f32.mrb[5].mxu0 }
 0x202   : > { %v1155_v19 = vmul.f32 %v5102_v15, %v1138_v18  ;;  %v1140_v20 = vpop.f32.mrb[6].mxu0 }
 0x203   : > { %v1156_v22 = vadd.f32 %v1154_v17, %v1042_v11  ;;  %v1141_v23 = vpop.f32.mrb[7].mxu0  ;;  %v4657_v20 = vld [vmem:[%s6216_s7 + $0x8] sm:$0xf]  ;;  %s6228_s7 = sld [smem:[#allocation12_spill]] }
 0x204   : > { %v1157_v24 = vadd.f32 %v1155_v19, %v1044_v12 }
 0x205   : > { %v1164_v25 = vadd.f32 %v1162_v21, %v1156_v22 }
 0x206   : > { %v1165_v26 = vadd.f32 %v1162_v21, %v1157_v24 }
 0x207   : > { %v1166_v27 = vmax.f32 %v1164_v25, 0.0  ;;  %v1496_v25 = vld [vmem:[#allocation2] sm:$0xff] }
 0x208   : > { %v1167_v28 = vmax.f32 %v1165_v26, 0.0  ;;  %1776 = vst.msk [vmem:[#allocation2] sm:$0xff] %vm854_vm2, %v4808_v0  ;;  %v1497_v26 = vld [vmem:[#allocation2 + $0x20] sm:$0xff] }
 0x209   : > { %v1168_v30 = vpack.c.bf16 %v4813_v29, %v1166_v27  ;;  %1791 = vst.msk [vmem:[#allocation2 + $0x20] sm:$0xff] %vm854_vm2, %v4808_v0 }
 0x20a   : > { %v1169_v31 = vpack.c.bf16 %v4813_v29, %v1167_v28 }
 0x20b   : > { %1191 = vrot.lane.b32.xlu0 %v1168_v30, %s6184_s11  ;;  %1174 = vrot.lane.b32.xlu1 %v1168_v30, %s6188_s0 }
 0x20f   : > { %1176 = vrot.lane.b32.xlu1 %v1169_v31, %s6188_s0  ;;  %1223 = vrot.lane.b32.xlu0 %v1211_v59, %s6186_s29 }
 0x213   : > { %1193 = vrot.lane.b32.xlu1 %v1169_v31, %s6184_s11  ;;  %1233 = vrot.lane.b32.xlu0 %v1169_v31, %s6186_s29 }
 0x217   : > { %1229 = vrot.lane.b32.xlu1 %v1212_v60, %s6186_s29 }
 0x21b   : > { %1231 = vrot.lane.b32.xlu1 %v1168_v30, %s6186_s29 }
 0x27d   : > { %v1192_v34 = vpop.permute.xlu0 %1191  ;;  %v1175_v35 = vpop.permute.xlu1 %1174 }
 0x27e   : > { %1199 = vst.msk [vmem:[#allocation2 + $0x40] sm:$0xff] %vm878_vm1, %v1192_v34 }
 0x27f   : > { %1182 = vst.msk [vmem:[#allocation2 + $0x8] sm:$0xff] %vm869_vm4, %v1175_v35 }
 0x281   : > { %v1177_v36 = vpop.permute.xlu1 %1176  ;;  %v1224_v46 = vpop.permute.xlu0 %1223 }
 0x282   : > { %v1178_v37 = vsel %vm856_vm0, %v1175_v35, %v1177_v36  ;;  %1184 = vst.msk [vmem:[#allocation2 + $0x18] sm:$0xff] %vm856_vm0, %v1177_v36 }
 0x283   : > { %1302 = vmatprep.subr.bf16.mxu0 %v1178_v37  ;;  %1227 = vrot.lane.b32.xlu1 %v1178_v37, %s6186_s29 }
 0x285   : > { %v1194_v38 = vpop.permute.xlu1 %1193  ;;  %v1213_v40 = vld [vmem:[#allocation2 + $0x40] sm:$0xff]  ;;  %v1234_v48 = vpop.permute.xlu0 %1233 }
 0x286   : > { %v1204_v39 = vld [vmem:[#allocation2 + $0x8] sm:$0xff]  ;;  %1201 = vst.msk [vmem:[#allocation2 + $0x50] sm:$0xff] %vm885_vm5, %v1194_v38  ;;  %v1195_v43 = vsel %vm885_vm5, %v1192_v34, %v1194_v38 }
 0x287   : > { %1225 = vrot.lane.b32.xlu0 %v1204_v39, %s6186_s29  ;;  %1303 = vmatpush1.bf16.msra.mxu0 %v1204_v39  ;;  %1454 = vst.msk [vmem:[#allocation2 + $0x8] sm:$0xff] %vm856_vm0, %v4808_v0 }
 0x288   : > { %1304 = vmatprep.subr.bf16.mxu0 %v1169_v31 }
 0x289   : > { %v1347_v41 = vld [vmem:[#allocation2 + $0x18] sm:$0xff]  ;;  %v1230_v47 = vpop.permute.xlu1 %1229 }
 0x28b   : > { %1235 = vrot.lane.b32.xlu0 %v1213_v40, %s6186_s29  ;;  %1305 = vmatpush1.bf16.msra.mxu0 %v1168_v30 }
 0x28d   : > { %v1209_v42 = vld [vmem:[#allocation2 + $0x50] sm:$0xff]  ;;  %v1232_v49 = vpop.permute.xlu1 %1231 }
 0x28e   : > { %1239 = vrot.lane.b32.xlu1 %v1209_v42, %s6186_s29  ;;  %1472 = vst.msk [vmem:[#allocation2 + $0x50] sm:$0xff] %vm878_vm1, %v4808_v0  ;;  %1306 = vmatprep.subr.bf16.mxu0 %v1209_v42  ;;  %v1244_v54 = vsel %vm874_vm3, %v1232_v49, %v1234_v48  ;;  %v1243_v56 = vsel %vm874_vm3, %v1230_v47, %v1232_v49 }
 0x28f   : > { %1367 = vrot.lane.b32.xlu0 %v1347_v41, %s6195_s2  ;;  %1307 = vmatpush1.bf16.msra.mxu0 %v1195_v43 }
 0x292   : > { %1363 = vrot.lane.b32.xlu1 %v1204_v39, %s6195_s2  ;;  %4656 = vmatmul.mubr.msk.bf16.vlgmr.msra.gmra.mrb[8].mxu0 %vm946_vm6, %v4654_v44 }
 0x293   : > { %1237 = vrot.lane.b32.xlu0 %v1195_v43, %s6186_s29  ;;  %1578 = vmatprep.mubr.bf16.mxu0 %v4808_v0 }
 0x296   : > { %1365 = vrot.lane.b32.xlu1 %v1178_v37, %s6195_s2 }
 0x297   : > { %1371 = vrot.lane.b32.xlu0 %v1169_v31, %s6195_s2 }
 0x29a   : > { %1373 = vrot.lane.b32.xlu1 %v1350_v32, %s6195_s2 }
 0x29b   : > { %1369 = vrot.lane.b32.xlu0 %v1168_v30, %s6195_s2 }
 0x29e   : > { %1377 = vrot.lane.b32.xlu1 %v1209_v42, %s6195_s2 }
 0x29f   : > { %1379 = vrot.lane.b32.xlu0 %v1353_v33, %s6195_s2 }
 0x2a2   : > { %1375 = vrot.lane.b32.xlu1 %v1195_v43, %s6195_s2 }
 0x2a3   : > { %1444 = vperm.xlu0 %4772, %v1441_v45  }
 0x2f5   : > { %v1228_v51 = vpop.permute.xlu1 %1227 }
 0x2f9   : > { %v1226_v50 = vpop.permute.xlu0 %1225 }
 0x2fa   : > { %v1242_v52 = vsel %vm874_vm3, %v1226_v50, %v1228_v51  ;;  %v1241_v53 = vsel %vm874_vm3, %v1224_v46, %v1226_v50  ;;  %v1652_v51 = vld [vmem:[#allocation2 + $0x38] sm:$0xff] }
 0x2fb   : > { %1256 = vmatprep.subr.bf16.mxu1 %v1242_v52  ;;  %1792 = vst.msk [vmem:[#allocation2 + $0x38] sm:$0xff] %vm874_vm3, %v4808_v0  ;;  %v1655_v52 = vld [vmem:[#allocation2 + $0x58] sm:$0xff] }
 0x2fc   : > { %1257 = vmatpush1.bf16.msra.mxu1 %v1241_v53  ;;  %1796 = vst.msk [vmem:[#allocation2 + $0x58] sm:$0xff] %vm874_vm3, %v4808_v0 }
 0x2fd   : > { %v1236_v55 = vpop.permute.xlu0 %1235  ;;  %1258 = vmatprep.subr.bf16.mxu1 %v1244_v54 }
 0x300   : > { %1259 = vmatpush1.bf16.msra.mxu1 %v1243_v56  ;;  %v1240_v58 = vpop.permute.xlu1 %1239 }
 0x301   : > { %v1368_v57 = vpop.permute.xlu0 %1367 }
 0x304   : > { %v1364_v60 = vpop.permute.xlu1 %1363 }
 0x305   : > { %v1238_v59 = vpop.permute.xlu0 %1237 }
 0x306   : > { %v1246_v63 = vsel %vm874_vm3, %v1238_v59, %v1240_v58  ;;  %v1245_v1 = vsel %vm874_vm3, %v1236_v55, %v1238_v59 }
 0x307   : > { %1260 = vmatprep.subr.bf16.mxu1 %v1246_v63 }
 0x308   : > { %1261 = vmatpush1.bf16.msra.mxu1 %v1245_v1  ;;  %v1366_v6 = vpop.permute.xlu1 %1365 }
 0x309   : > { %v1372_v5 = vpop.permute.xlu0 %1371  ;;  %v1382_v7 = vsel %vm1086_vm7, %v1366_v6, %v1368_v57  ;;  %v1381_v8 = vsel %vm1086_vm7, %v1364_v60, %v1366_v6  ;;  %v1754_v6 = vld [vmem:[%s6219_s14] sm:$0xff] }
 0x30a   : > { %1396 = vmatprep.subr.bf16.mxu1 %v1382_v7 }
 0x30b   : > { %4655 = vmatmul.mubr.msk.bf16.vlgmr.msra.gmra.mrb[4].mxu1 %vm946_vm6, %v1210_v2  ;;  %v4775_v2 = vld [vmem:[%s6218_s30 + $0x8] sm:$0xff]  }
 0x30c   : > { %1397 = vmatpush1.bf16.msra.mxu1 %v1381_v8  ;;  %1428 = vmatprep.mubr.bf16.mxu1 %v4808_v0  ;;  %v1374_v10 = vpop.permute.xlu1 %1373 }
 0x30d   : > { %v1370_v9 = vpop.permute.xlu0 %1369  ;;  %v1384_v12 = vsel %vm1086_vm7, %v1372_v5, %v1374_v10 }
 0x30e   : > { %v1383_v11 = vsel %vm1086_vm7, %v1370_v9, %v1372_v5  ;;  %1398 = vmatprep.subr.bf16.mxu1 %v1384_v12  ;;  %v1755_v5 = vld [vmem:[%s6219_s14 + $0x8] sm:$0xff] }
 0x310   : > { %1399 = vmatpush1.bf16.msra.mxu1 %v1383_v11  ;;  %v1378_v16 = vpop.permute.xlu1 %1377 }
 0x311   : > { %v1380_v13 = vpop.permute.xlu0 %1379 }
 0x312   : > { %v1386_v17 = vsel %vm1086_vm7, %v1378_v16, %v1380_v13 }
 0x313   : > { %1400 = vmatprep.subr.bf16.mxu1 %v1386_v17 }
 0x314   : > { %v1376_v18 = vpop.permute.xlu1 %1375 }
 0x315   : > { %v1385_v19 = vsel %vm1086_vm7, %v1376_v18, %v1378_v16 }
 0x316   : > { %1401 = vmatpush1.bf16.msra.mxu1 %v1385_v19 }
 0x319   : > { %4658 = vmatmul.mubr.msk.bf16.vlgmr.msra.gmra.mrb[8].mxu1 %vm946_vm6, %v4657_v20 }
 0x31a   : > { %1633 = vmatprep.mubr.bf16.mxu1 %v4808_v0 }
 0x322   : > { %v1445_v43 = vpop.permute.xlu0 %1444 }
 0x365   : > { %v1336_v21 = vpop.f32.mrb[8].mxu0 }
 0x366   : > { %v1338_v22 = vpop.f32.mrb[9].mxu0 }
 0x367   : > { %v1340_v23 = vpop.f32.mrb[10].mxu0 }
 0x368   : > { %v1341_v24 = vpop.f32.mrb[11].mxu0 }
 0x3de   : > { %v1290_v27 = vpop.f32.mrb[4].mxu1 }
 0x3df   : > { %v1297_v28 = vmul.f32 %v1290_v27, %v5091_v3  ;;  %v1292_v30 = vpop.f32.mrb[5].mxu1 }
 0x3e0   : > { %v1298_v31 = vmul.f32 %v1292_v30, %v5093_v4  ;;  %v1294_v32 = vpop.f32.mrb[6].mxu1 }
 0x3e1   : > { %v1295_v33 = vpop.f32.mrb[7].mxu1  ;;  %v1337_v34 = vadd.f32 %v1336_v21, %v1297_v28  ;;  %v4774_v28 = vld [vmem:[%s6218_s30] sm:$0xff]  }
 0x3e2   : > { %v1339_v35 = vadd.f32 %v1338_v22, %v1298_v31 }
 0x3ec   : > { %v1430_v36 = vpop.f32.mrb[8].mxu1 }
 0x3ed   : > { %v1437_v37 = vmul.f32 %v1430_v36, %v5100_v14  ;;  %v1432_v38 = vpop.f32.mrb[9].mxu1 }
 0x3ee   : > { %v1438_v39 = vmul.f32 %v1432_v38, %v5102_v15  ;;  %v1434_v40 = vpop.f32.mrb[10].mxu1 }
 0x3ef   : > { %v1439_v41 = vadd.f32 %v1437_v37, %v1337_v34  ;;  %v1435_v42 = vpop.f32.mrb[11].mxu1 }
 0x3f0   : > { %v1440_v44 = vadd.f32 %v1438_v39, %v1339_v35 }
 0x3f1   : > { %v5182_v45 = vadd.f32 %v1445_v43, %v1439_v41  ;;  %v4776_v41 = vld [vmem:[%s6218_s30 + $0x10] sm:$0xff]  }
 0x3f2   : > { %v5184_v46 = vadd.f32 %v1445_v43, %v1440_v44 }
 0x3f3   : > { %v1449_v47 = vmax.f32 %v5182_v45, 0.0 }
 0x3f4   : > { %v1450_v48 = vmax.f32 %v5184_v46, 0.0 }
 0x3f5   : > { %v1451_v49 = vpack.c.bf16 %v4813_v29, %v1449_v47 }
 0x3f6   : > { %v1452_v50 = vpack.c.bf16 %v4813_v29, %v1450_v48 }
 0x3f7   : > { %1457 = vrot.lane.b32.xlu1 %v1451_v49, %s6188_s0 }
 0x3f8   : > { %1459 = vrot.lane.b32.xlu0 %v1452_v50, %s6188_s0 }
 0x3fb   : > { %1474 = vrot.lane.b32.xlu1 %v1451_v49, %s6184_s11 }
 0x3fc   : > { %1476 = vrot.lane.b32.xlu0 %v1452_v50, %s6184_s11 }
 0x3ff   : > { %1513 = vrot.lane.b32.xlu1 %v1496_v25, %s6186_s29 }
 0x400   : > { %1519 = vrot.lane.b32.xlu0 %v1497_v26, %s6186_s29 }
 0x403   : > { %1523 = vrot.lane.b32.xlu1 %v1452_v50, %s6186_s29 }
 0x404   : > { %1521 = vrot.lane.b32.xlu0 %v1451_v49, %s6186_s29 }
 0x469   : > { %v1458_v53 = vpop.permute.xlu1 %1457 }
 0x46a   : > { %1465 = vst.msk [vmem:[#allocation2 + $0x8] sm:$0xff] %vm869_vm4, %v1458_v53  ;;  %v1460_v54 = vpop.permute.xlu0 %1459 }
 0x46b   : > { %v1461_v55 = vsel %vm856_vm0, %v1458_v53, %v1460_v54  ;;  %1467 = vst.msk [vmem:[#allocation2 + $0x18] sm:$0xff] %vm856_vm0, %v1460_v54 }
 0x46c   : > { %1601 = vmatprep.subr.bf16.mxu1 %v1461_v55  ;;  %1517 = vrot.lane.b32.xlu0 %v1461_v55, %s6186_s29 }
 0x46d   : > { %v1475_v56 = vpop.permute.xlu1 %1474 }
 0x46e   : > { %1482 = vst.msk [vmem:[#allocation2 + $0x40] sm:$0xff] %vm878_vm1, %v1475_v56  ;;  %v1477_v57 = vpop.permute.xlu0 %1476 }
 0x46f   : > { %1484 = vst.msk [vmem:[#allocation2 + $0x50] sm:$0xff] %vm885_vm5, %v1477_v57  ;;  %v1478_v63 = vsel %vm885_vm5, %v1475_v56, %v1477_v57 }
 0x471   : > { %v1488_v58 = vld [vmem:[#allocation2 + $0x8] sm:$0xff]  ;;  %v1514_v7 = vpop.permute.xlu1 %1513 }
 0x472   : > { %1515 = vrot.lane.b32.xlu1 %v1488_v58, %s6186_s29  ;;  %1602 = vmatpush1.bf16.msra.mxu1 %v1488_v58  ;;  %1777 = vst.msk [vmem:[#allocation2 + $0x8] sm:$0xff] %vm856_vm0, %v4808_v0  ;;  %v1649_v1 = vld [vmem:[#allocation2 + $0x18] sm:$0xff]  ;;  %v1520_v8 = vpop.permute.xlu0 %1519 }
 0x473   : > { %1603 = vmatprep.subr.bf16.mxu1 %v1452_v50 }
 0x475   : > { %v1498_v59 = vld [vmem:[#allocation2 + $0x40] sm:$0xff]  ;;  %v1524_v9 = vpop.permute.xlu1 %1523 }
 0x476   : > { %1525 = vrot.lane.b32.xlu1 %v1498_v59, %s6186_s29  ;;  %v1493_v60 = vld [vmem:[#allocation2 + $0x50] sm:$0xff]  ;;  %1604 = vmatpush1.bf16.msra.mxu1 %v1451_v49  ;;  %v1522_v10 = vpop.permute.xlu0 %1521 }
 0x477   : > { %1529 = vrot.lane.b32.xlu0 %v1493_v60, %s6186_s29  ;;  %1605 = vmatprep.subr.bf16.mxu1 %v1493_v60  ;;  %1795 = vst.msk [vmem:[#allocation2 + $0x50] sm:$0xff] %vm878_vm1, %v4808_v0  ;;  %v1534_v17 = vsel %vm874_vm3, %v1522_v10, %v1524_v9  ;;  %v1533_v20 = vsel %vm874_vm3, %v1520_v8, %v1522_v10 }
 0x47a   : > { %1674 = vrot.lane.b32.xlu1 %v1649_v1, %s6195_s2  ;;  %1606 = vmatpush1.bf16.msra.mxu1 %v1478_v63 }
 0x47b   : > { %1670 = vrot.lane.b32.xlu0 %v1488_v58, %s6195_s2 }
 0x47d   : > { %4664 = vmatmul.mubr.msk.bf16.vlgmr.msra.gmra.mrb[12].mxu1 %vm946_vm6, %v4775_v2 }
 0x47e   : > { %1527 = vrot.lane.b32.xlu1 %v1478_v63, %s6186_s29  ;;  %1901 = vmatprep.mubr.bf16.mxu1 %v4808_v0 }
 0x47f   : > { %1672 = vrot.lane.b32.xlu0 %v1461_v55, %s6195_s2 }
 0x482   : > { %1678 = vrot.lane.b32.xlu1 %v1452_v50, %s6195_s2  ;;  %v1819_v50 = vld [vmem:[#allocation2] sm:$0xff] }
 0x483   : > { %1680 = vrot.lane.b32.xlu0 %v1652_v51, %s6195_s2  ;;  %2099 = vst.msk [vmem:[#allocation2] sm:$0xff] %vm854_vm2, %v4808_v0  ;;  %v1820_v51 = vld [vmem:[#allocation2 + $0x20] sm:$0xff] }
 0x484   : > { %2114 = vst.msk [vmem:[#allocation2 + $0x20] sm:$0xff] %vm854_vm2, %v4808_v0 }
 0x486   : > { %1676 = vrot.lane.b32.xlu1 %v1451_v49, %s6195_s2 }
 0x487   : > { %1684 = vrot.lane.b32.xlu0 %v1493_v60, %s6195_s2 }
 0x48a   : > { %1686 = vrot.lane.b32.xlu1 %v1655_v52, %s6195_s2 }
 0x48b   : > { %1682 = vrot.lane.b32.xlu0 %v1478_v63, %s6195_s2 }
 0x48e   : > { %1758 = vperm.xlu1 %4773, %v1754_v6  }
 0x48f   : > { %1763 = vperm.xlu0 %4772, %v1755_v5  }
 0x4de   : > { %v1518_v12 = vpop.permute.xlu0 %1517 }
 0x4e4   : > { %v1516_v11 = vpop.permute.xlu1 %1515 }
 0x4e5   : > { %v1532_v13 = vsel %vm874_vm3, %v1516_v11, %v1518_v12  ;;  %v1531_v16 = vsel %vm874_vm3, %v1514_v7, %v1516_v11 }
 0x4e6   : > { %1546 = vmatprep.subr.bf16.mxu0 %v1532_v13 }
 0x4e7   : > { %1547 = vmatpush1.bf16.msra.mxu0 %v1531_v16 }
 0x4e8   : > { %v1526_v18 = vpop.permute.xlu1 %1525  ;;  %1548 = vmatprep.subr.bf16.mxu0 %v1534_v17 }
 0x4e9   : > { %v1530_v19 = vpop.permute.xlu0 %1529 }
 0x4eb   : > { %1549 = vmatpush1.bf16.msra.mxu0 %v1533_v20 }
 0x4ec   : > { %v1675_v21 = vpop.permute.xlu1 %1674 }
 0x4ed   : > { %v1671_v22 = vpop.permute.xlu0 %1670 }
 0x4f0   : > { %v1528_v23 = vpop.permute.xlu1 %1527 }
 0x4f1   : > { %v1536_v24 = vsel %vm874_vm3, %v1528_v23, %v1530_v19  ;;  %v1673_v25 = vpop.permute.xlu0 %1672  ;;  %v1535_v26 = vsel %vm874_vm3, %v1526_v18, %v1528_v23 }
 0x4f2   : > { %1550 = vmatprep.subr.bf16.mxu0 %v1536_v24  ;;  %v1689_v27 = vsel %vm1086_vm7, %v1673_v25, %v1675_v21  ;;  %v1688_v32 = vsel %vm1086_vm7, %v1671_v22, %v1673_v25 }
 0x4f3   : > { %1551 = vmatpush1.bf16.msra.mxu0 %v1535_v26 }
 0x4f4   : > { %v1679_v30 = vpop.permute.xlu1 %1678  ;;  %1703 = vmatprep.subr.bf16.mxu0 %v1689_v27 }
 0x4f5   : > { %v1681_v31 = vpop.permute.xlu0 %1680 }
 0x4f6   : > { %4662 = vmatmul.mubr.msk.bf16.vlgmr.msra.gmra.mrb[12].mxu0 %vm946_vm6, %v4774_v28  ;;  %v1691_v33 = vsel %vm1086_vm7, %v1679_v30, %v1681_v31 }
 0x4f7   : > { %1704 = vmatpush1.bf16.msra.mxu0 %v1688_v32  ;;  %1735 = vmatprep.mubr.bf16.mxu0 %v4808_v0  ;;  %v1975_v32 = vld [vmem:[#allocation2 + $0x38] sm:$0xff] }
 0x4f8   : > { %v1677_v34 = vpop.permute.xlu1 %1676  ;;  %1705 = vmatprep.subr.bf16.mxu0 %v1691_v33  ;;  %2115 = vst.msk [vmem:[#allocation2 + $0x38] sm:$0xff] %vm874_vm3, %v4808_v0  ;;  %v1978_v33 = vld [vmem:[#allocation2 + $0x58] sm:$0xff] }
 0x4f9   : > { %v1690_v35 = vsel %vm1086_vm7, %v1677_v34, %v1679_v30  ;;  %v1685_v36 = vpop.permute.xlu0 %1684  ;;  %2119 = vst.msk [vmem:[#allocation2 + $0x58] sm:$0xff] %vm874_vm3, %v4808_v0 }
 0x4fb   : > { %1706 = vmatpush1.bf16.msra.mxu0 %v1690_v35 }
 0x4fc   : > { %v1687_v37 = vpop.permute.xlu1 %1686 }
 0x4fd   : > { %v1693_v38 = vsel %vm1086_vm7, %v1685_v36, %v1687_v37  ;;  %v1683_v39 = vpop.permute.xlu0 %1682 }
 0x4fe   : > { %1707 = vmatprep.subr.bf16.mxu0 %v1693_v38  ;;  %v1692_v40 = vsel %vm1086_vm7, %v1683_v39, %v1685_v36 }
 0x4ff   : > { %1708 = vmatpush1.bf16.msra.mxu0 %v1692_v40 }
 0x502   : > { %4668 = vmatmul.mubr.msk.bf16.vlgmr.msra.gmra.mrb[16].mxu0 %vm946_vm6, %v4776_v41 }
 0x503   : > { %1956 = vmatprep.mubr.bf16.mxu0 %v4808_v0 }
 0x50d   : > { %v1759_v10 = vpop.permute.xlu1 %1758 }
 0x50e   : > { %v1764_v20 = vpop.permute.xlu0 %1763 }
 0x550   : > { %v1635_v42 = vpop.f32.mrb[12].mxu1 }
 0x551   : > { %v1637_v43 = vpop.f32.mrb[13].mxu1 }
 0x552   : > { %v1639_v44 = vpop.f32.mrb[14].mxu1 }
 0x553   : > { %v1641_v49 = vpop.f32.mrb[15].mxu1 }
 0x5c9   : > { %v1580_v52 = vpop.f32.mrb[12].mxu0 }
 0x5ca   : > { %v1589_v53 = vmul.f32 %v1580_v52, %v5091_v3  ;;  %v1582_v54 = vpop.f32.mrb[13].mxu0 }
 0x5cb   : > { %v1590_v55 = vmul.f32 %v1582_v54, %v5093_v4  ;;  %v1584_v56 = vpop.f32.mrb[14].mxu0 }
 0x5cc   : > { %v1591_v57 = vmul.f32 %v1584_v56, %v5091_v3  ;;  %v1636_v58 = vadd.f32 %v1635_v42, %v1589_v53  ;;  %v1586_v59 = vpop.f32.mrb[15].mxu0 }
 0x5cd   : > { %v1592_v60 = vmul.f32 %v1586_v59, %v5093_v4  ;;  %v1638_v63 = vadd.f32 %v1637_v43, %v1590_v55 }
 0x5ce   : > { %v1640_v1 = vadd.f32 %v1639_v44, %v1591_v57  ;;  %v4778_v44 = vld [vmem:[%s6220_s3 + $0x8] sm:$0xff]  }
 0x5cf   : > { %v1642_v2 = vadd.f32 %v1641_v49, %v1592_v60  ;;  %v2077_v49 = vld [vmem:[%s6159_s15] sm:$0xff] }
 0x5d5   : > { %v1737_v5 = vpop.f32.mrb[16].mxu0 }
 0x5d6   : > { %v1746_v6 = vmul.f32 %v1737_v5, %v5100_v14  ;;  %v1739_v7 = vpop.f32.mrb[17].mxu0 }
 0x5d7   : > { %v1747_v8 = vmul.f32 %v1739_v7, %v5102_v15  ;;  %v1741_v9 = vpop.f32.mrb[18].mxu0 }
 0x5d8   : > { %v1750_v11 = vadd.f32 %v1746_v6, %v1636_v58  ;;  %v1748_v12 = vmul.f32 %v1741_v9, %v5100_v14  ;;  %v1743_v13 = vpop.f32.mrb[19].mxu0 }
 0x5d9   : > { %v1751_v16 = vadd.f32 %v1747_v8, %v1638_v63  ;;  %v1749_v17 = vmul.f32 %v1743_v13, %v5102_v15 }
 0x5da   : > { %v1752_v18 = vadd.f32 %v1748_v12, %v1640_v1  ;;  %v1766_v19 = vadd.f32 %v1759_v10, %v1750_v11  ;;  %v4777_v11 = vld [vmem:[%s6220_s3] sm:$0xff]  }
 0x5db   : > { %v1753_v21 = vadd.f32 %v1749_v17, %v1642_v2  ;;  %v1767_v22 = vadd.f32 %v1759_v10, %v1751_v16 }
 0x5dc   : > { %v1768_v23 = vadd.f32 %v1764_v20, %v1752_v18  ;;  %v1770_v26 = vmax.f32 %v1766_v19, 0.0 }
 0x5dd   : > { %v1769_v24 = vadd.f32 %v1764_v20, %v1753_v21  ;;  %v1771_v28 = vmax.f32 %v1767_v22, 0.0 }
 0x5de   : > { %v1772_v25 = vmax.f32 %v1768_v23, 0.0 }
 0x5df   : > { %v1773_v27 = vmax.f32 %v1769_v24, 0.0 }
 0x5e0   : > { %v1774_v30 = vpack.c.bf16 %v1772_v25, %v1770_v26  ;;  %v4779_v25 = vld [vmem:[%s6220_s3 + $0x10] sm:$0xff]  }
 0x5e1   : > { %v1775_v31 = vpack.c.bf16 %v1773_v27, %v1771_v28 }
 0x5e2   : > { %1780 = vrot.lane.b32.xlu1 %v1774_v30, %s6188_s0 }
 0x5e3   : > { %1782 = vrot.lane.b32.xlu0 %v1775_v31, %s6188_s0 }
 0x5e6   : > { %1797 = vrot.lane.b32.xlu1 %v1774_v30, %s6184_s11 }
 0x5e7   : > { %1799 = vrot.lane.b32.xlu0 %v1775_v31, %s6184_s11 }
 0x5ea   : > { %1836 = vrot.lane.b32.xlu1 %v1819_v50, %s6186_s29  ;;  %v2078_v50 = vld [vmem:[%s6159_s15 + $0x8] sm:$0xff] }
 0x5eb   : > { %1842 = vrot.lane.b32.xlu0 %v1820_v51, %s6186_s29 }
 0x5ee   : > { %1846 = vrot.lane.b32.xlu1 %v1775_v31, %s6186_s29 }
 0x5ef   : > { %1844 = vrot.lane.b32.xlu0 %v1774_v30, %s6186_s29 }
 0x654   : > { %v1781_v34 = vpop.permute.xlu1 %1780 }
 0x655   : > { %1788 = vst.msk [vmem:[#allocation2 + $0x8] sm:$0xff] %vm869_vm4, %v1781_v34  ;;  %v1783_v35 = vpop.permute.xlu0 %1782 }
 0x656   : > { %v1784_v36 = vsel %vm856_vm0, %v1781_v34, %v1783_v35  ;;  %1790 = vst.msk [vmem:[#allocation2 + $0x18] sm:$0xff] %vm856_vm0, %v1783_v35 }
 0x657   : > { %1924 = vmatprep.subr.bf16.mxu0 %v1784_v36  ;;  %1840 = vrot.lane.b32.xlu0 %v1784_v36, %s6186_s29 }
 0x658   : > { %v1798_v37 = vpop.permute.xlu1 %1797 }
 0x659   : > { %1805 = vst.msk [vmem:[#allocation2 + $0x40] sm:$0xff] %vm878_vm1, %v1798_v37  ;;  %v1800_v38 = vpop.permute.xlu0 %1799 }
 0x65a   : > { %1807 = vst.msk [vmem:[#allocation2 + $0x50] sm:$0xff] %vm885_vm5, %v1800_v38  ;;  %v1801_v42 = vsel %vm885_vm5, %v1798_v37, %v1800_v38 }
 0x65c   : > { %v1811_v39 = vld [vmem:[#allocation2 + $0x8] sm:$0xff]  ;;  %v1837_v51 = vpop.permute.xlu1 %1836 }
 0x65d   : > { %1838 = vrot.lane.b32.xlu1 %v1811_v39, %s6186_s29  ;;  %1925 = vmatpush1.bf16.msra.mxu0 %v1811_v39  ;;  %2100 = vst.msk [vmem:[#allocation2 + $0x8] sm:$0xff] %vm856_vm0, %v4808_v0  ;;  %v1972_v43 = vld [vmem:[#allocation2 + $0x18] sm:$0xff]  ;;  %v1843_v52 = vpop.permute.xlu0 %1842 }
 0x65e   : > { %1926 = vmatprep.subr.bf16.mxu0 %v1775_v31 }
 0x660   : > { %v1821_v40 = vld [vmem:[#allocation2 + $0x40] sm:$0xff]  ;;  %v1847_v53 = vpop.permute.xlu1 %1846 }
 0x661   : > { %1848 = vrot.lane.b32.xlu1 %v1821_v40, %s6186_s29  ;;  %v1816_v41 = vld [vmem:[#allocation2 + $0x50] sm:$0xff]  ;;  %1927 = vmatpush1.bf16.msra.mxu0 %v1774_v30  ;;  %v1845_v54 = vpop.permute.xlu0 %1844 }
 0x662   : > { %1852 = vrot.lane.b32.xlu0 %v1816_v41, %s6186_s29  ;;  %1928 = vmatprep.subr.bf16.mxu0 %v1816_v41  ;;  %2118 = vst.msk [vmem:[#allocation2 + $0x50] sm:$0xff] %vm878_vm1, %v4808_v0  ;;  %v1857_v59 = vsel %vm874_vm3, %v1845_v54, %v1847_v53  ;;  %v1856_v1 = vsel %vm874_vm3, %v1843_v52, %v1845_v54 }
 0x665   : > { %1997 = vrot.lane.b32.xlu1 %v1972_v43, %s6195_s2  ;;  %1929 = vmatpush1.bf16.msra.mxu0 %v1801_v42 }
 0x666   : > { %1993 = vrot.lane.b32.xlu0 %v1811_v39, %s6195_s2 }
 0x668   : > { %4674 = vmatmul.mubr.msk.bf16.vlgmr.msra.gmra.mrb[20].mxu0 %vm946_vm6, %v4778_v44 }
 0x669   : > { %1850 = vrot.lane.b32.xlu1 %v1801_v42, %s6186_s29  ;;  %2236 = vmatprep.mubr.bf16.mxu0 %v4808_v0 }
 0x66a   : > { %1995 = vrot.lane.b32.xlu0 %v1784_v36, %s6195_s2 }
 0x66d   : > { %2001 = vrot.lane.b32.xlu1 %v1775_v31, %s6195_s2  ;;  %v2146_v31 = vld [vmem:[#allocation2] sm:$0xff] }
 0x66e   : > { %2003 = vrot.lane.b32.xlu0 %v1975_v32, %s6195_s2  ;;  %2516 = vst.msk [vmem:[#allocation2] sm:$0xff] %vm854_vm2, %v4808_v0 }
 0x671   : > { %1999 = vrot.lane.b32.xlu1 %v1774_v30, %s6195_s2 }
 0x672   : > { %2007 = vrot.lane.b32.xlu0 %v1816_v41, %s6195_s2 }
 0x675   : > { %2009 = vrot.lane.b32.xlu1 %v1978_v33, %s6195_s2 }
 0x676   : > { %2005 = vrot.lane.b32.xlu0 %v1801_v42, %s6195_s2 }
 0x679   : > { %2081 = vperm.xlu1 %4773, %v2077_v49  }
 0x67a   : > { %2086 = vperm.xlu0 %4772, %v2078_v50  }
 0x6c9   : > { %v1841_v56 = vpop.permute.xlu0 %1840 }
 0x6cf   : > { %v1839_v55 = vpop.permute.xlu1 %1838 }
 0x6d0   : > { %v1855_v57 = vsel %vm874_vm3, %v1839_v55, %v1841_v56  ;;  %v1854_v58 = vsel %vm874_vm3, %v1837_v51, %v1839_v55 }
 0x6d1   : > { %1869 = vmatprep.subr.bf16.mxu1 %v1855_v57 }
 0x6d2   : > { %1870 = vmatpush1.bf16.msra.mxu1 %v1854_v58 }
 0x6d3   : > { %v1849_v60 = vpop.permute.xlu1 %1848  ;;  %1871 = vmatprep.subr.bf16.mxu1 %v1857_v59 }
 0x6d4   : > { %v1853_v63 = vpop.permute.xlu0 %1852 }
 0x6d6   : > { %1872 = vmatpush1.bf16.msra.mxu1 %v1856_v1 }
 0x6d7   : > { %v1998_v2 = vpop.permute.xlu1 %1997 }
 0x6d8   : > { %v1994_v5 = vpop.permute.xlu0 %1993 }
 0x6db   : > { %v1851_v6 = vpop.permute.xlu1 %1850 }
 0x6dc   : > { %v1859_v7 = vsel %vm874_vm3, %v1851_v6, %v1853_v63  ;;  %v1996_v8 = vpop.permute.xlu0 %1995  ;;  %v1858_v9 = vsel %vm874_vm3, %v1849_v60, %v1851_v6 }
 0x6dd   : > { %1873 = vmatprep.subr.bf16.mxu1 %v1859_v7  ;;  %v2012_v10 = vsel %vm1086_vm7, %v1996_v8, %v1998_v2  ;;  %v2011_v16 = vsel %vm1086_vm7, %v1994_v5, %v1996_v8  ;;  %v2147_v5 = vld [vmem:[#allocation2 + $0x20] sm:$0xff] }
 0x6de   : > { %1874 = vmatpush1.bf16.msra.mxu1 %v1858_v9  ;;  %2518 = vst.msk [vmem:[#allocation2 + $0x20] sm:$0xff] %vm854_vm2, %v4808_v0 }
 0x6df   : > { %v2002_v12 = vpop.permute.xlu1 %2001  ;;  %2026 = vmatprep.subr.bf16.mxu1 %v2012_v10 }
 0x6e0   : > { %v2004_v13 = vpop.permute.xlu0 %2003 }
 0x6e1   : > { %4672 = vmatmul.mubr.msk.bf16.vlgmr.msra.gmra.mrb[16].mxu1 %vm946_vm6, %v4777_v11  ;;  %v2014_v17 = vsel %vm1086_vm7, %v2002_v12, %v2004_v13 }
 0x6e2   : > { %2027 = vmatpush1.bf16.msra.mxu1 %v2011_v16  ;;  %2058 = vmatprep.mubr.bf16.mxu1 %v4808_v0  ;;  %v2347_v16 = vld [vmem:[#allocation2 + $0x58] sm:$0xff] }
 0x6e3   : > { %v2000_v18 = vpop.permute.xlu1 %1999  ;;  %2028 = vmatprep.subr.bf16.mxu1 %v2014_v17  ;;  %2548 = vst.msk [vmem:[#allocation2 + $0x58] sm:$0xff] %vm874_vm3, %v4808_v0 }
 0x6e4   : > { %v2013_v19 = vsel %vm1086_vm7, %v2000_v18, %v2002_v12  ;;  %v2008_v20 = vpop.permute.xlu0 %2007 }
 0x6e6   : > { %2029 = vmatpush1.bf16.msra.mxu1 %v2013_v19 }
 0x6e7   : > { %v2010_v21 = vpop.permute.xlu1 %2009 }
 0x6e8   : > { %v2016_v22 = vsel %vm1086_vm7, %v2008_v20, %v2010_v21  ;;  %v2006_v23 = vpop.permute.xlu0 %2005 }
 0x6e9   : > { %2030 = vmatprep.subr.bf16.mxu1 %v2016_v22  ;;  %v2015_v24 = vsel %vm1086_vm7, %v2006_v23, %v2008_v20 }
 0x6ea   : > { %2031 = vmatpush1.bf16.msra.mxu1 %v2015_v24 }
 0x6ed   : > { %4678 = vmatmul.mubr.msk.bf16.vlgmr.msra.gmra.mrb[20].mxu1 %vm946_vm6, %v4779_v25 }
 0x6ee   : > { %2313 = vmatprep.mubr.bf16.mxu1 %v4808_v0 }
 0x6f8   : > { %v2082_v56 = vpop.permute.xlu1 %2081 }
 0x6f9   : > { %v2087_v63 = vpop.permute.xlu0 %2086 }
 0x73b   : > { %v1958_v26 = vpop.f32.mrb[20].mxu0 }
 0x73c   : > { %v1960_v27 = vpop.f32.mrb[21].mxu0 }
 0x73d   : > { %v1962_v28 = vpop.f32.mrb[22].mxu0 }
 0x73e   : > { %v1964_v30 = vpop.f32.mrb[23].mxu0 }
 0x7b4   : > { %v1903_v32 = vpop.f32.mrb[16].mxu1 }
 0x7b5   : > { %v1912_v33 = vmul.f32 %v1903_v32, %v5091_v3  ;;  %v1905_v34 = vpop.f32.mrb[17].mxu1  ;;  %v2473_v32 = vld [vmem:[%s6160_s16 + $0x8] sm:$0xff] }
 0x7b6   : > { %v1913_v35 = vmul.f32 %v1905_v34, %v5093_v4  ;;  %v1907_v36 = vpop.f32.mrb[18].mxu1  ;;  %v2475_v34 = vld [vmem:[%s6160_s16 + $0x18] sm:$0xff] }
 0x7b7   : > { %v1914_v37 = vmul.f32 %v1907_v36, %v5091_v3  ;;  %v1959_v38 = vadd.f32 %v1958_v26, %v1912_v33  ;;  %v1909_v39 = vpop.f32.mrb[19].mxu1  ;;  %v4781_v26 = vld [vmem:[%s6221_s12 + $0x10] sm:$0xff]  }
 0x7b8   : > { %v1915_v40 = vmul.f32 %v1909_v39, %v5093_v4  ;;  %v1961_v41 = vadd.f32 %v1960_v27, %v1913_v35  ;;  %v2474_v33 = vld [vmem:[%s6160_s16 + $0x10] sm:$0xff] }
 0x7b9   : > { %v1963_v42 = vadd.f32 %v1962_v28, %v1914_v37  ;;  %v2344_v28 = vld [vmem:[#allocation2 + $0x38] sm:$0xff] }
 0x7ba   : > { %v1965_v43 = vadd.f32 %v1964_v30, %v1915_v40  ;;  %v4783_v30 = vld [vmem:[%s6221_s12 + $0x18] sm:$0xff]  }
 0x7c0   : > { %v2060_v44 = vpop.f32.mrb[20].mxu1 }
 0x7c1   : > { %v2069_v49 = vmul.f32 %v2060_v44, %v5100_v14  ;;  %v2062_v50 = vpop.f32.mrb[21].mxu1 }
 0x7c2   : > { %v2070_v51 = vmul.f32 %v2062_v50, %v5102_v15  ;;  %v2064_v52 = vpop.f32.mrb[22].mxu1 }
 0x7c3   : > { %v2073_v53 = vadd.f32 %v2069_v49, %v1959_v38  ;;  %v2071_v54 = vmul.f32 %v2064_v52, %v5100_v14  ;;  %v2066_v55 = vpop.f32.mrb[23].mxu1 }
 0x7c4   : > { %v2074_v57 = vadd.f32 %v2070_v51, %v1961_v41  ;;  %v2072_v58 = vmul.f32 %v2066_v55, %v5102_v15  ;;  %v4780_v55 = vld [vmem:[%s6221_s12] sm:$0xff]  }
 0x7c5   : > { %v2089_v59 = vadd.f32 %v2082_v56, %v2073_v53  ;;  %v2075_v60 = vadd.f32 %v2071_v54, %v1963_v42 }
 0x7c6   : > { %v2090_v1 = vadd.f32 %v2082_v56, %v2074_v57  ;;  %v2076_v2 = vadd.f32 %v2072_v58, %v1965_v43 }
 0x7c7   : > { %v2091_v6 = vadd.f32 %v2087_v63, %v2075_v60  ;;  %v2093_v8 = vmax.f32 %v2089_v59, 0.0 }
 0x7c8   : > { %v2092_v7 = vadd.f32 %v2087_v63, %v2076_v2  ;;  %v2094_v10 = vmax.f32 %v2090_v1, 0.0  ;;  %v4782_v1 = vld [vmem:[%s6221_s12 + $0x8] sm:$0xff]  }
 0x7c9   : > { %v2095_v9 = vmax.f32 %v2091_v6, 0.0 }
 0x7ca   : > { %v2096_v11 = vmax.f32 %v2092_v7, 0.0 }
 0x7cb   : > { %v5356_v12 = vpack.c.bf16 %v2095_v9, %v2093_v8 }
 0x7cc   : > { %v5358_v13 = vpack.c.bf16 %v2096_v11, %v2094_v10 }
 0x7cd   : > { %2116 = vst [vmem:[#allocation2 + $0x28] sm:$0xff] %v5356_v12  ;;  %2103 = vrot.lane.b32.xlu1 %v5356_v12, %s6188_s0 }
 0x7ce   : > { %2105 = vrot.lane.b32.xlu0 %v5358_v13, %s6188_s0  ;;  %2519 = vst.msk [vmem:[#allocation2 + $0x28] sm:$0xff] %vm856_vm0, %v4808_v0  ;;  %s6222_s0 = smov 16  }
 0x7d1   : > { %2120 = vrot.lane.b32.xlu1 %v5356_v12, %s6184_s11 }
 0x7d2   : > { %2122 = vrot.lane.b32.xlu0 %v5358_v13, %s6184_s11  ;;  %s6229_s11 = sld [smem:[#allocation13_spill]] }
 0x7d5   : > { %2168 = vrot.lane.b32.xlu1 %v2146_v31, %s6186_s29  ;;  %v2472_v31 = vld [vmem:[%s6160_s16] sm:$0xff] }
 0x7d6   : > { %2176 = vrot.lane.b32.xlu0 %v5356_v12, %s6186_s29 }
 0x7d9   : > { %2178 = vrot.lane.b32.xlu1 %v5358_v13, %s6186_s29 }
 0x83f   : > { %v5378_v17 = vpop.permute.xlu1 %2103 }
 0x840   : > { %2111 = vst.msk [vmem:[#allocation2 + $0x8] sm:$0xff] %vm869_vm4, %v5378_v17  ;;  %v5382_v18 = vpop.permute.xlu0 %2105 }
 0x841   : > { %v5387_v19 = vsel %vm856_vm0, %v5378_v17, %v5382_v18  ;;  %2113 = vst.msk [vmem:[#allocation2 + $0x18] sm:$0xff] %vm856_vm0, %v5382_v18 }
 0x842   : > { %2281 = vmatprep.subr.bf16.mxu1 %v5387_v19  ;;  %2172 = vrot.lane.b32.xlu0 %v5387_v19, %s6186_s29 }
 0x843   : > { %v5394_v20 = vpop.permute.xlu1 %2120 }
 0x844   : > { %2128 = vst.msk [vmem:[#allocation2 + $0x40] sm:$0xff] %vm878_vm1, %v5394_v20  ;;  %v5398_v21 = vpop.permute.xlu0 %2122 }
 0x845   : > { %v2124_v22 = vsel %vm885_vm5, %v5394_v20, %v5398_v21  ;;  %2130 = vst.msk [vmem:[#allocation2 + $0x50] sm:$0xff] %vm885_vm5, %v5398_v21 }
 0x846   : > { %2174 = vrot.lane.b32.xlu0 %v2147_v5, %s6186_s29  ;;  %3171 = vst [vmem:[#allocation2 + $0x88] sm:$0xff] %v2124_v22 }
 0x847   : > { %v2136_v23 = vld [vmem:[#allocation2 + $0x8] sm:$0xff]  ;;  %v2169_v35 = vpop.permute.xlu1 %2168 }
 0x848   : > { %2170 = vrot.lane.b32.xlu1 %v2136_v23, %s6186_s29  ;;  %2282 = vmatpush1.bf16.msra.mxu1 %v2136_v23  ;;  %2517 = vst.msk [vmem:[#allocation2 + $0x8] sm:$0xff] %vm856_vm0, %v4808_v0  ;;  %v2341_v27 = vld [vmem:[#allocation2 + $0x18] sm:$0xff]  ;;  %v2177_v36 = vpop.permute.xlu0 %2176 }
 0x849   : > { %2283 = vmatprep.subr.bf16.mxu1 %v5358_v13 }
 0x84b   : > { %v2148_v24 = vld [vmem:[#allocation2 + $0x40] sm:$0xff]  ;;  %v2179_v38 = vpop.permute.xlu1 %2178 }
 0x84c   : > { %2180 = vrot.lane.b32.xlu1 %v2148_v24, %s6186_s29  ;;  %2546 = vst.msk [vmem:[#allocation2 + $0x40] sm:$0xff] %vm854_vm2, %v4808_v0  ;;  %2284 = vmatpush1.bf16.msra.mxu1 %v5356_v12  ;;  %v2141_v25 = vld [vmem:[#allocation2 + $0x50] sm:$0xff]  ;;  %v2189_v43 = vsel %vm874_vm3, %v2177_v36, %v2179_v38 }
 0x84d   : > { %2285 = vmatprep.subr.bf16.mxu1 %v2141_v25  ;;  %2184 = vrot.lane.b32.xlu0 %v2141_v25, %s6186_s29  ;;  %3155 = vst [vmem:[#allocation2 + $0x50] sm:$0xff] %v5358_v13 }
 0x84e   : > { %3582 = vst.msk [vmem:[#allocation2 + $0x50] sm:$0xff] %vm878_vm1, %v4808_v0 }
 0x850   : > { %2182 = vrot.lane.b32.xlu1 %v2124_v22, %s6186_s29  ;;  %2286 = vmatpush1.bf16.msra.mxu1 %v2124_v22  ;;  %s6223_s29 = smov 112  }
 0x851   : > { %2367 = vrot.lane.b32.xlu0 %v2136_v23, %s6195_s2 }
 0x853   : > { %4689 = vmatmul.mubr.msk.bf16.vlgmr.msra.gmra.mrb[24].mxu1 %vm946_vm6, %v4781_v26 }
 0x854   : > { %2371 = vrot.lane.b32.xlu1 %v2341_v27, %s6195_s2  ;;  %2323 = vmatprep.mubr.bf16.mxu1 %v4808_v0 }
 0x855   : > { %2369 = vrot.lane.b32.xlu0 %v5387_v19, %s6195_s2 }
 0x858   : > { %2375 = vrot.lane.b32.xlu1 %v5358_v13, %s6195_s2 }
 0x859   : > { %2377 = vrot.lane.b32.xlu0 %v2344_v28, %s6195_s2 }
 0x85b   : > { %4690 = vmatmul.mubr.msk.bf16.gmra.mrb[28].mxu1 %vm946_vm6, %v4783_v30 }
 0x85c   : > { %2373 = vrot.lane.b32.xlu1 %v5356_v12, %s6195_s2  ;;  %2734 = vmatprep.mubr.bf16.mxu1 %v4808_v0 }
 0x85d   : > { %2381 = vrot.lane.b32.xlu0 %v2141_v25, %s6195_s2 }
 0x860   : > { %2383 = vrot.lane.b32.xlu1 %v2347_v16, %s6195_s2  ;;  %v4784_v16 = vld [vmem:[%s6221_s12 + $0x20] sm:$0xff]  }
 0x861   : > { %2379 = vrot.lane.b32.xlu0 %v2124_v22, %s6195_s2  ;;  %v4785_v22 = vld [vmem:[%s6221_s12 + $0x28] sm:$0xff]  }
 0x864   : > { %2478 = vperm.xlu1 %4773, %v2472_v31  }
 0x865   : > { %2483 = vperm.xlu0 %4772, %v2473_v32   ;;  %v5485_v32 = vld [vmem:[#allocation2] sm:$0xff] }
 0x866   : > { %3130 = vst.msk [vmem:[#allocation2] sm:$0xff] %vm854_vm2, %v4808_v0 }
 0x868   : > { %2488 = vperm.xlu1 %4773, %v2474_v33   ;;  %v5489_v33 = vld [vmem:[#allocation2 + $0x20] sm:$0xff] }
 0x869   : > { %2493 = vperm.xlu0 %4772, %v2475_v34   ;;  %3132 = vst.msk [vmem:[#allocation2 + $0x20] sm:$0xff] %vm854_vm2, %v4808_v0  ;;  %v5493_v34 = vld [vmem:[#allocation2 + $0x60] sm:$0xff] }
 0x86a   : > { %3151 = vst.msk [vmem:[#allocation2 + $0x60] sm:$0xff] %vm854_vm2, %v4808_v0 }
 0x8b4   : > { %v2173_v37 = vpop.permute.xlu0 %2172 }
 0x8b8   : > { %v2175_v42 = vpop.permute.xlu0 %2174 }
 0x8b9   : > { %v2188_v50 = vsel %vm874_vm3, %v2175_v42, %v2177_v36 }
 0x8ba   : > { %v2171_v39 = vpop.permute.xlu1 %2170 }
 0x8bb   : > { %v2187_v40 = vsel %vm874_vm3, %v2171_v39, %v2173_v37  ;;  %v2186_v41 = vsel %vm874_vm3, %v2169_v35, %v2171_v39  ;;  %v5497_v35 = vld [vmem:[#allocation2 + $0x40] sm:$0xff] }
 0x8bc   : > { %2204 = vmatprep.subr.bf16.mxu0 %v2187_v40  ;;  %3150 = vst.msk [vmem:[#allocation2 + $0x40] sm:$0xff] %vm854_vm2, %v4808_v0 }
 0x8bd   : > { %2205 = vmatpush1.bf16.msra.mxu0 %v2186_v41 }
 0x8be   : > { %v2181_v44 = vpop.permute.xlu1 %2180  ;;  %2206 = vmatprep.subr.bf16.mxu0 %v2189_v43 }
 0x8bf   : > { %v2185_v49 = vpop.permute.xlu0 %2184 }
 0x8c1   : > { %2207 = vmatpush1.bf16.msra.mxu0 %v2188_v50 }
 0x8c2   : > { %v2183_v51 = vpop.permute.xlu1 %2182 }
 0x8c3   : > { %v2191_v52 = vsel %vm874_vm3, %v2183_v51, %v2185_v49  ;;  %v2190_v53 = vsel %vm874_vm3, %v2181_v44, %v2183_v51  ;;  %v2368_v54 = vpop.permute.xlu0 %2367 }
 0x8c4   : > { %2208 = vmatprep.subr.bf16.mxu0 %v2191_v52 }
 0x8c5   : > { %2209 = vmatpush1.bf16.msra.mxu0 %v2190_v53 }
 0x8c6   : > { %v2372_v56 = vpop.permute.xlu1 %2371 }
 0x8c7   : > { %v2370_v57 = vpop.permute.xlu0 %2369 }
 0x8c8   : > { %4685 = vmatmul.mubr.msk.bf16.vlgmr.msra.gmra.mrb[24].mxu0 %vm946_vm6, %v4780_v55  ;;  %v2386_v58 = vsel %vm1086_vm7, %v2370_v57, %v2372_v56  ;;  %v2385_v59 = vsel %vm1086_vm7, %v2368_v54, %v2370_v57 }
 0x8c9   : > { %2403 = vmatprep.subr.bf16.mxu0 %v2386_v58  ;;  %2246 = vmatprep.mubr.bf16.mxu0 %v4808_v0 }
 0x8ca   : > { %v2376_v60 = vpop.permute.xlu1 %2375  ;;  %2404 = vmatpush1.bf16.msra.mxu0 %v2385_v59 }
 0x8cb   : > { %v2378_v63 = vpop.permute.xlu0 %2377 }
 0x8cc   : > { %v2388_v2 = vsel %vm1086_vm7, %v2376_v60, %v2378_v63 }
 0x8cd   : > { %2405 = vmatprep.subr.bf16.mxu0 %v2388_v2 }
 0x8ce   : > { %v2374_v5 = vpop.permute.xlu1 %2373 }
 0x8cf   : > { %v2387_v6 = vsel %vm1086_vm7, %v2374_v5, %v2376_v60  ;;  %v2382_v7 = vpop.permute.xlu0 %2381 }
 0x8d0   : > { %4686 = vmatmul.mubr.msk.bf16.gmra.mrb[28].mxu0 %vm946_vm6, %v4782_v1 }
 0x8d1   : > { %2406 = vmatpush1.bf16.msra.mxu0 %v2387_v6  ;;  %2435 = vmatprep.mubr.bf16.mxu0 %v4808_v0 }
 0x8d2   : > { %v2384_v8 = vpop.permute.xlu1 %2383 }
 0x8d3   : > { %v2390_v9 = vsel %vm1086_vm7, %v2382_v7, %v2384_v8  ;;  %v2380_v10 = vpop.permute.xlu0 %2379 }
 0x8d4   : > { %2407 = vmatprep.subr.bf16.mxu0 %v2390_v9  ;;  %v2389_v11 = vsel %vm1086_vm7, %v2380_v10, %v2382_v7 }
 0x8d5   : > { %2408 = vmatpush1.bf16.msra.mxu0 %v2389_v11 }
 0x8d8   : > { %4697 = vmatmul.mubr.msk.bf16.vlgmr.msra.gmra.mrb[32].mxu0 %vm946_vm6, %v4784_v16 }
 0x8d9   : > { %2445 = vmatprep.mubr.bf16.mxu0 %v4808_v0 }
 0x8e0   : > { %4698 = vmatmul.mubr.msk.bf16.gmra.mrb[36].mxu0 %vm946_vm6, %v4785_v22 }
 0x8e1   : > { %2811 = vmatprep.mubr.bf16.mxu0 %v4808_v0 }
 0x8e3   : > { %v2479_v22 = vpop.permute.xlu1 %2478 }
 0x926   : > { %v2315_v23 = vpop.f32.mrb[24].mxu1 }
 0x927   : > { %v2317_v24 = vpop.f32.mrb[25].mxu1 }
 0x928   : > { %v2319_v25 = vpop.f32.mrb[26].mxu1 }
 0x929   : > { %v2321_v26 = vpop.f32.mrb[27].mxu1 }
 0x92e   : > { %v2325_v27 = vpop.f32.mrb[28].mxu1 }
 0x92f   : > { %v2327_v28 = vpop.f32.mrb[29].mxu1 }
 0x930   : > { %v2329_v30 = vpop.f32.mrb[30].mxu1 }
 0x931   : > { %v2331_v31 = vpop.f32.mrb[31].mxu1 }
 0x99b   : > { %v2238_v36 = vpop.f32.mrb[24].mxu0 }
 0x99c   : > { %v2257_v37 = vmul.f32 %v2238_v36, %v5091_v3  ;;  %v2240_v38 = vpop.f32.mrb[25].mxu0 }
 0x99d   : > { %v2258_v39 = vmul.f32 %v2240_v38, %v5093_v4  ;;  %v2242_v40 = vpop.f32.mrb[26].mxu0 }
 0x99e   : > { %v2259_v41 = vmul.f32 %v2242_v40, %v5091_v3  ;;  %v2316_v42 = vadd.f32 %v2315_v23, %v2257_v37  ;;  %v2244_v43 = vpop.f32.mrb[27].mxu0 }
 0x99f   : > { %v2260_v44 = vmul.f32 %v2244_v43, %v5093_v4  ;;  %v2318_v49 = vadd.f32 %v2317_v24, %v2258_v39 }
 0x9a0   : > { %v2320_v50 = vadd.f32 %v2319_v25, %v2259_v41 }
 0x9a1   : > { %v2322_v51 = vadd.f32 %v2321_v26, %v2260_v44 }
 0x9a3   : > { %v2248_v52 = vpop.f32.mrb[28].mxu0 }
 0x9a4   : > { %v2261_v53 = vmul.f32 %v2248_v52, %v5091_v3  ;;  %v2250_v54 = vpop.f32.mrb[29].mxu0 }
 0x9a5   : > { %v2262_v55 = vmul.f32 %v2250_v54, %v5093_v4  ;;  %v2252_v56 = vpop.f32.mrb[30].mxu0 }
 0x9a6   : > { %v2263_v57 = vmul.f32 %v2252_v56, %v5091_v3  ;;  %v2326_v58 = vadd.f32 %v2325_v27, %v2261_v53  ;;  %v2254_v59 = vpop.f32.mrb[31].mxu0  ;;  %v2484_v27 = vpop.permute.xlu0 %2483 }
 0x9a7   : > { %v2264_v60 = vmul.f32 %v2254_v59, %v5093_v4  ;;  %v2328_v63 = vadd.f32 %v2327_v28, %v2262_v55 }
 0x9a8   : > { %v2330_v1 = vadd.f32 %v2329_v30, %v2263_v57 }
 0x9a9   : > { %v2332_v2 = vadd.f32 %v2331_v31, %v2264_v60 }
 0x9ab   : > { %v2437_v5 = vpop.f32.mrb[32].mxu0 }
 0x9ac   : > { %v2456_v6 = vmul.f32 %v2437_v5, %v5100_v14  ;;  %v2439_v7 = vpop.f32.mrb[33].mxu0  ;;  %v2494_v5 = vpop.permute.xlu0 %2493 }
 0x9ad   : > { %v2457_v8 = vmul.f32 %v2439_v7, %v5102_v15  ;;  %v2441_v9 = vpop.f32.mrb[34].mxu0 }
 0x9ae   : > { %v2464_v10 = vadd.f32 %v2456_v6, %v2316_v42  ;;  %v2458_v11 = vmul.f32 %v2441_v9, %v5100_v14  ;;  %v2443_v16 = vpop.f32.mrb[35].mxu0 }
 0x9af   : > { %v2465_v23 = vadd.f32 %v2457_v8, %v2318_v49  ;;  %v2459_v24 = vmul.f32 %v2443_v16, %v5102_v15 }
 0x9b0   : > { %v2496_v25 = vadd.f32 %v2479_v22, %v2464_v10  ;;  %v2466_v26 = vadd.f32 %v2458_v11, %v2320_v50 }
 0x9b1   : > { %v2497_v28 = vadd.f32 %v2479_v22, %v2465_v23  ;;  %v2467_v30 = vadd.f32 %v2459_v24, %v2322_v51  ;;  %v2489_v51 = vpop.permute.xlu1 %2488 }
 0x9b2   : > { %v2498_v31 = vadd.f32 %v2484_v27, %v2466_v26  ;;  %v2504_v38 = vmax.f32 %v2496_v25, 0.0 }
 0x9b3   : > { %v2499_v36 = vadd.f32 %v2484_v27, %v2467_v30  ;;  %v2447_v37 = vpop.f32.mrb[36].mxu0  ;;  %v2505_v42 = vmax.f32 %v2497_v28, 0.0 }
 0x9b4   : > { %v2506_v39 = vmax.f32 %v2498_v31, 0.0  ;;  %v2460_v40 = vmul.f32 %v2447_v37, %v5100_v14  ;;  %v2449_v41 = vpop.f32.mrb[37].mxu0 }
 0x9b5   : > { %v2507_v43 = vmax.f32 %v2499_v36, 0.0  ;;  %v2461_v44 = vmul.f32 %v2449_v41, %v5102_v15  ;;  %v2451_v49 = vpop.f32.mrb[38].mxu0 }
 0x9b6   : > { %v5515_v52 = vpack.c.bf16 %v2506_v39, %v2504_v38  ;;  %v2468_v53 = vadd.f32 %v2460_v40, %v2326_v58  ;;  %v2462_v50 = vmul.f32 %v2451_v49, %v5100_v14  ;;  %v2453_v54 = vpop.f32.mrb[39].mxu0  ;;  %v3018_v49 = vld [vmem:[%s6161_s17] sm:$0xff] }
 0x9b7   : > { %v5518_v55 = vpack.c.bf16 %v2507_v43, %v2505_v42  ;;  %v2469_v56 = vadd.f32 %v2461_v44, %v2328_v63  ;;  %v2463_v57 = vmul.f32 %v2453_v54, %v5102_v15  ;;  %v4787_v42 = vld [vmem:[%s6225_s10 + $0x10] sm:$0xff]   ;;  %v4789_v44 = vld [vmem:[%s6225_s10 + $0x18] sm:$0xff]  }
 0x9b8   : > { %v2500_v59 = vadd.f32 %v2489_v51, %v2468_v53  ;;  %v2470_v60 = vadd.f32 %v2462_v50, %v2330_v1  ;;  %2524 = vrot.lane.b32.xlu1 %v5515_v52, %s6222_s0  ;;  %v3019_v53 = vld [vmem:[%s6161_s17 + $0x8] sm:$0xff]  ;;  %v3064_v50 = vld [vmem:[%s6168_s24] sm:$0xff]  ;;  %v3021_v54 = vld [vmem:[%s6161_s17 + $0x18] sm:$0xff] }
 0x9b9   : > { %v2501_v6 = vadd.f32 %v2489_v51, %v2469_v56  ;;  %v2471_v7 = vadd.f32 %v2463_v57, %v2332_v2  ;;  %2526 = vrot.lane.b32.xlu0 %v5518_v55, %s6222_s0  ;;  %v3065_v51 = vld [vmem:[%s6168_s24 + $0x8] sm:$0xff] }
 0x9ba   : > { %v2502_v58 = vadd.f32 %v2494_v5, %v2470_v60  ;;  %v2508_v9 = vmax.f32 %v2500_v59, 0.0 }
 0x9bb   : > { %v2503_v8 = vadd.f32 %v2494_v5, %v2471_v7  ;;  %v2509_v11 = vmax.f32 %v2501_v6, 0.0 }
 0x9bc   : > { %v2510_v10 = vmax.f32 %v2502_v58, 0.0 }
 0x9bd   : > { %v2511_v16 = vmax.f32 %v2503_v8, 0.0 }
 0x9be   : > { %v5525_v63 = vpack.c.bf16 %v2510_v10, %v2508_v9 }
 0x9bf   : > { %v5527_v22 = vpack.c.bf16 %v2511_v16, %v2509_v11 }
 0x9c0   : > { %2528 = vrot.lane.b32.xlu1 %v5525_v63, %s6222_s0 }
 0x9c1   : > { %2530 = vrot.lane.b32.xlu0 %v5527_v22, %s6222_s0 }
 0x9c4   : > { %2558 = vrot.lane.b32.xlu1 %v5515_v52, %s6223_s29 }
 0x9c5   : > { %2560 = vrot.lane.b32.xlu0 %v5518_v55, %s6223_s29 }
 0x9c8   : > { %2562 = vrot.lane.b32.xlu1 %v5525_v63, %s6223_s29 }
 0x9c9   : > { %2564 = vrot.lane.b32.xlu0 %v5527_v22, %s6223_s29 }
 0x9cc   : > { %2635 = vrot.lane.b32.xlu1 %v5485_v32, %s6224_s1  ;;  %v5557_v32 = vld [vmem:[#allocation2 + $0x58] sm:$0xff] }
 0x9cd   : > { %2641 = vrot.lane.b32.xlu0 %v5489_v33, %s6224_s1  ;;  %3152 = vst.msk [vmem:[#allocation2 + $0x58] sm:$0xff] %vm874_vm3, %v4808_v0  ;;  %v5561_v33 = vld [vmem:[#allocation2 + $0x78] sm:$0xff] }
 0x9ce   : > { %3153 = vst.msk [vmem:[#allocation2 + $0x78] sm:$0xff] %vm874_vm3, %v4808_v0 }
 0x9d0   : > { %2649 = vrot.lane.b32.xlu1 %v5515_v52, %s6224_s1 }
 0x9d1   : > { %2653 = vrot.lane.b32.xlu0 %v5493_v34, %s6224_s1  ;;  %v5565_v34 = vld [vmem:[#allocation2 + $0x98] sm:$0xff] }
 0x9d2   : > { %3159 = vst.msk [vmem:[#allocation2 + $0x98] sm:$0xff] %vm874_vm3, %v4808_v0 }
 0x9d4   : > { %2647 = vrot.lane.b32.xlu1 %v5497_v35, %s6224_s1  ;;  %v5569_v35 = vld [vmem:[#allocation2 + $0xb8] sm:$0xff] }
 0x9d5   : > { %2651 = vrot.lane.b32.xlu0 %v5518_v55, %s6224_s1  ;;  %3161 = vst.msk [vmem:[#allocation2 + $0xb8] sm:$0xff] %vm874_vm3, %v4808_v0 }
 0x9d8   : > { %2657 = vrot.lane.b32.xlu1 %v5527_v22, %s6224_s1 }
 0x9d9   : > { %2655 = vrot.lane.b32.xlu0 %v5525_v63, %s6224_s1 }
 0xa2a   : > { %v2525_v1 = vpop.permute.xlu1 %2524 }
 0xa2b   : > { %2540 = vst.msk [vmem:[#allocation2 + $0x8] sm:$0xff] %vm869_vm4, %v2525_v1  ;;  %v2527_v2 = vpop.permute.xlu0 %2526 }
 0xa2c   : > { %v2532_v23 = vsel %vm856_vm0, %v2525_v1, %v2527_v2  ;;  %2542 = vst.msk [vmem:[#allocation2 + $0x18] sm:$0xff] %vm856_vm0, %v2527_v2 }
 0xa2d   : > { %2779 = vmatprep.subr.bf16.mxu0 %v2532_v23 }
 0xa32   : > { %v2529_v24 = vpop.permute.xlu1 %2528  ;;  %v2585_v25 = vld [vmem:[#allocation2 + $0x8] sm:$0xff] }
 0xa33   : > { %2543 = vst.msk [vmem:[#allocation2 + $0x28] sm:$0xff] %vm869_vm4, %v2529_v24  ;;  %v2531_v26 = vpop.permute.xlu0 %2530  ;;  %2637 = vrot.lane.b32.xlu1 %v2585_v25, %s6224_s1  ;;  %2780 = vmatpush1.bf16.msra.mxu0 %v2585_v25  ;;  %v2839_v27 = vld [vmem:[#allocation2 + $0x18] sm:$0xff] }
 0xa34   : > { %3131 = vst.msk [vmem:[#allocation2 + $0x8] sm:$0xff] %vm856_vm0, %v4808_v0  ;;  %v2533_v28 = vsel %vm856_vm0, %v2529_v24, %v2531_v26  ;;  %2545 = vst.msk [vmem:[#allocation2 + $0x38] sm:$0xff] %vm856_vm0, %v2531_v26 }
 0xa35   : > { %3146 = vst.msk [vmem:[#allocation2 + $0x18] sm:$0xff] %vm856_vm0, %v5382_v18  ;;  %2781 = vmatprep.subr.bf16.mxu0 %v2533_v28 }
 0xa36   : > { %3144 = vst.msk [vmem:[#allocation2 + $0x8] sm:$0xff] %vm869_vm4, %v5378_v17  ;;  %v2559_v30 = vpop.permute.xlu1 %2558 }
 0xa37   : > { %2574 = vst.msk [vmem:[#allocation2 + $0x80] sm:$0xff] %vm878_vm1, %v2559_v30  ;;  %v2561_v31 = vpop.permute.xlu0 %2560 }
 0xa38   : > { %2576 = vst.msk [vmem:[#allocation2 + $0x90] sm:$0xff] %vm885_vm5, %v2561_v31  ;;  %v2566_v40 = vsel %vm885_vm5, %v2559_v30, %v2561_v31 }
 0xa3a   : > { %v2563_v36 = vpop.permute.xlu1 %2562  ;;  %v2587_v37 = vld [vmem:[#allocation2 + $0x28] sm:$0xff] }
 0xa3b   : > { %2577 = vst.msk [vmem:[#allocation2 + $0xa0] sm:$0xff] %vm878_vm1, %v2563_v36  ;;  %v2565_v38 = vpop.permute.xlu0 %2564  ;;  %2782 = vmatpush1.bf16.msra.mxu0 %v2587_v37  ;;  %v2842_v43 = vld [vmem:[#allocation2 + $0x38] sm:$0xff] }
 0xa3c   : > { %3133 = vst.msk [vmem:[#allocation2 + $0x28] sm:$0xff] %vm856_vm0, %v4808_v0  ;;  %2783 = vmatprep.subr.bf16.mxu0 %v5518_v55 }
 0xa3d   : > { %v5591_v18 = vld [vmem:[#allocation2 + $0x8] sm:$0xff]  ;;  %2579 = vst.msk [vmem:[#allocation2 + $0xb0] sm:$0xff] %vm885_vm5, %v2565_v38 }
 0xa3e   : > { %3564 = vst.msk [vmem:[#allocation2 + $0x8] sm:$0xff] %vm856_vm0, %v4808_v0  ;;  %v2605_v17 = vld [vmem:[#allocation2 + $0x80] sm:$0xff] }
 0xa3f   : > { %3170 = vst.msk [vmem:[#allocation2 + $0x80] sm:$0xff] %vm878_vm1, %v5394_v20  ;;  %2659 = vrot.lane.b32.xlu1 %v2605_v17, %s6224_s1  ;;  %v2594_v39 = vld [vmem:[#allocation2 + $0x90] sm:$0xff]  ;;  %2784 = vmatpush1.bf16.msra.mxu0 %v5515_v52  ;;  %v2642_v56 = vpop.permute.xlu0 %2641 }
 0xa40   : > { %2663 = vrot.lane.b32.xlu0 %v2594_v39, %s6224_s1  ;;  %2785 = vmatprep.subr.bf16.mxu0 %v5527_v22  ;;  %3158 = vst.msk [vmem:[#allocation2 + $0x90] sm:$0xff] %vm878_vm1, %v4808_v0 }
 0xa41   : > { %3172 = vst.msk [vmem:[#allocation2 + $0x90] sm:$0xff] %vm885_vm5, %v5398_v21  ;;  %v2567_v21 = vsel %vm885_vm5, %v2563_v36, %v2565_v38 }
 0xa42   : > { %v2606_v41 = vld [vmem:[#allocation2 + $0xa0] sm:$0xff] }
 0xa43   : > { %2661 = vrot.lane.b32.xlu1 %v2566_v40, %s6224_s1  ;;  %2786 = vmatpush1.bf16.msra.mxu0 %v5525_v63  ;;  %v2654_v59 = vpop.permute.xlu0 %2653 }
 0xa44   : > { %v2596_v20 = vld [vmem:[#allocation2 + $0xb0] sm:$0xff]  ;;  %2639 = vrot.lane.b32.xlu0 %v2532_v23, %s6224_s1  ;;  %2787 = vmatprep.subr.bf16.mxu0 %v2594_v39 }
 0xa45   : > { %3160 = vst.msk [vmem:[#allocation2 + $0xb0] sm:$0xff] %vm878_vm1, %v4808_v0 }
 0xa47   : > { %2645 = vrot.lane.b32.xlu1 %v2533_v28, %s6224_s1  ;;  %2788 = vmatpush1.bf16.msra.mxu0 %v2566_v40  ;;  %v2652_v5 = vpop.permute.xlu0 %2651 }
 0xa48   : > { %2643 = vrot.lane.b32.xlu0 %v2587_v37, %s6224_s1  ;;  %2789 = vmatprep.subr.bf16.mxu0 %v2596_v20 }
 0xa4b   : > { %2669 = vrot.lane.b32.xlu1 %v2596_v20, %s6224_s1  ;;  %2790 = vmatpush1.bf16.msra.mxu0 %v2567_v21  ;;  %v2656_v58 = vpop.permute.xlu0 %2655 }
 0xa4c   : > { %2665 = vrot.lane.b32.xlu0 %v2606_v41, %s6224_s1 }
 0xa4e   : > { %4709 = vmatmul.mubr.msk.bf16.vlgmr.msra.gmra.mrb[40].mxu0 %vm2695_vm8, %v4787_v42 }
 0xa4f   : > { %2885 = vrot.lane.b32.xlu1 %v2532_v23, %s6195_s2  ;;  %2821 = vmatprep.mubr.bf16.mxu0 %v4808_v0 }
 0xa50   : > { %2887 = vrot.lane.b32.xlu0 %v2839_v27, %s6195_s2  ;;  %v2677_v27 = vsel %vm874_vm3, %v2654_v59, %v2656_v58 }
 0xa53   : > { %2883 = vrot.lane.b32.xlu1 %v2585_v25, %s6195_s2 }
 0xa54   : > { %2889 = vrot.lane.b32.xlu0 %v2587_v37, %s6195_s2 }
 0xa56   : > { %4710 = vmatmul.mubr.msk.bf16.gmra.mrb[44].mxu0 %vm2695_vm8, %v4789_v44 }
 0xa57   : > { %2893 = vrot.lane.b32.xlu1 %v2842_v43, %s6195_s2  ;;  %3117 = vmatprep.mubr.bf16.mxu0 %v4808_v0 }
 0xa58   : > { %2667 = vrot.lane.b32.xlu0 %v2567_v21, %s6224_s1 }
 0xa5b   : > { %2897 = vrot.lane.b32.xlu1 %v5518_v55, %s6195_s2  ;;  %v2636_v55 = vpop.permute.xlu1 %2635 }
 0xa5c   : > { %2899 = vrot.lane.b32.xlu0 %v5557_v32, %s6195_s2 }
 0xa5f   : > { %2895 = vrot.lane.b32.xlu1 %v5515_v52, %s6195_s2  ;;  %v3020_v52 = vld [vmem:[%s6161_s17 + $0x10] sm:$0xff]  ;;  %v2650_v57 = vpop.permute.xlu1 %2649 }
 0xa60   : > { %2891 = vrot.lane.b32.xlu0 %v2533_v28, %s6195_s2  ;;  %v2676_v1 = vsel %vm874_vm3, %v2650_v57, %v2652_v5 }
 0xa63   : > { %2905 = vrot.lane.b32.xlu1 %v5561_v33, %s6195_s2  ;;  %v2648_v60 = vpop.permute.xlu1 %2647 }
 0xa64   : > { %2903 = vrot.lane.b32.xlu0 %v5527_v22, %s6195_s2  ;;  %v2675_v23 = vsel %vm874_vm3, %v2648_v60, %v2650_v57 }
 0xa67   : > { %2909 = vrot.lane.b32.xlu1 %v2594_v39, %s6195_s2  ;;  %v2658_v6 = vpop.permute.xlu1 %2657 }
 0xa68   : > { %2901 = vrot.lane.b32.xlu0 %v5525_v63, %s6195_s2  ;;  %v2678_v25 = vsel %vm874_vm3, %v2656_v58, %v2658_v6 }
 0xa6b   : > { %2907 = vrot.lane.b32.xlu1 %v2566_v40, %s6195_s2  ;;  %v4786_v40 = vld [vmem:[%s6225_s10] sm:$0xff]  }
 0xa6c   : > { %2911 = vrot.lane.b32.xlu0 %v5565_v34, %s6195_s2 }
 0xa6f   : > { %2917 = vrot.lane.b32.xlu1 %v5569_v35, %s6195_s2 }
 0xa70   : > { %2915 = vrot.lane.b32.xlu0 %v2596_v20, %s6195_s2 }
 0xa73   : > { %3024 = vperm.xlu1 %4773, %v3018_v49  }
 0xa74   : > { %2913 = vrot.lane.b32.xlu0 %v2567_v21, %s6195_s2 }
 0xa77   : > { %3034 = vperm.xlu1 %4773, %v3020_v52  }
 0xa78   : > { %3029 = vperm.xlu0 %4772, %v3019_v53   ;;  %v4788_v53 = vld [vmem:[%s6225_s10 + $0x8] sm:$0xff]  }
 0xa7b   : > { %3068 = vperm.xlu1 %4773, %v3064_v50  }
 0xa7c   : > { %3039 = vperm.xlu0 %4772, %v3021_v54  }
 0xa80   : > { %3073 = vperm.xlu0 %4772, %v3065_v51  }
 0xaa5   : > { %v2638_v7 = vpop.permute.xlu1 %2637 }
 0xaa6   : > { %v2671_v63 = vsel %vm874_vm3, %v2636_v55, %v2638_v7 }
 0xab1   : > { %v2660_v8 = vpop.permute.xlu1 %2659 }
 0xab2   : > { %v2664_v9 = vpop.permute.xlu0 %2663 }
 0xab5   : > { %v2662_v10 = vpop.permute.xlu1 %2661 }
 0xab6   : > { %v2640_v11 = vpop.permute.xlu0 %2639  ;;  %v2680_v30 = vsel %vm874_vm3, %v2662_v10, %v2664_v9  ;;  %v2679_v36 = vsel %vm874_vm3, %v2660_v8, %v2662_v10 }
 0xab7   : > { %v2672_v16 = vsel %vm874_vm3, %v2638_v7, %v2640_v11 }
 0xab8   : > { %2702 = vmatprep.subr.bf16.mxu1 %v2672_v16 }
 0xab9   : > { %2703 = vmatpush1.bf16.msra.mxu1 %v2671_v63  ;;  %v2646_v22 = vpop.permute.xlu1 %2645  ;;  %v4790_v63 = vld [vmem:[%s6225_s10 + $0x20] sm:$0xff]  }
 0xaba   : > { %v2644_v32 = vpop.permute.xlu0 %2643 }
 0xabb   : > { %v2674_v33 = vsel %vm874_vm3, %v2644_v32, %v2646_v22  ;;  %v2673_v34 = vsel %vm874_vm3, %v2642_v56, %v2644_v32  ;;  %v4791_v22 = vld [vmem:[%s6225_s10 + $0x28] sm:$0xff]  }
 0xabc   : > { %2704 = vmatprep.subr.bf16.mxu1 %v2674_v33 }
 0xabd   : > { %2705 = vmatpush1.bf16.msra.mxu1 %v2673_v34  ;;  %v2670_v35 = vpop.permute.xlu1 %2669 }
 0xabe   : > { %v2666_v2 = vpop.permute.xlu0 %2665  ;;  %2706 = vmatprep.subr.bf16.mxu1 %v2676_v1 }
 0xac1   : > { %2707 = vmatpush1.bf16.msra.mxu1 %v2675_v23  ;;  %v2886_v24 = vpop.permute.xlu1 %2885 }
 0xac2   : > { %v2888_v26 = vpop.permute.xlu0 %2887  ;;  %2708 = vmatprep.subr.bf16.mxu1 %v2678_v25 }
 0xac3   : > { %v2920_v21 = vsel %vm1086_vm7, %v2886_v24, %v2888_v26 }
 0xac5   : > { %2709 = vmatpush1.bf16.msra.mxu1 %v2677_v27  ;;  %v2884_v28 = vpop.permute.xlu1 %2883 }
 0xac6   : > { %v2890_v31 = vpop.permute.xlu0 %2889  ;;  %2710 = vmatprep.subr.bf16.mxu1 %v2680_v30  ;;  %v2919_v42 = vsel %vm1086_vm7, %v2884_v28, %v2886_v24 }
 0xac9   : > { %2711 = vmatpush1.bf16.msra.mxu1 %v2679_v36  ;;  %v2894_v37 = vpop.permute.xlu1 %2893 }
 0xaca   : > { %v2668_v38 = vpop.permute.xlu0 %2667 }
 0xacb   : > { %v2682_v17 = vsel %vm874_vm3, %v2668_v38, %v2670_v35  ;;  %v2681_v39 = vsel %vm874_vm3, %v2666_v2, %v2668_v38 }
 0xacc   : > { %2712 = vmatprep.subr.bf16.mxu1 %v2682_v17 }
 0xacd   : > { %2713 = vmatpush1.bf16.msra.mxu1 %v2681_v39  ;;  %v2898_v20 = vpop.permute.xlu1 %2897 }
 0xace   : > { %v2900_v41 = vpop.permute.xlu0 %2899  ;;  %2949 = vmatprep.subr.bf16.mxu1 %v2920_v21 }
 0xacf   : > { %v2924_v54 = vsel %vm1086_vm7, %v2898_v20, %v2900_v41 }
 0xad0   : > { %4705 = vmatmul.mubr.msk.bf16.vlgmr.msra.gmra.mrb[32].mxu1 %vm2695_vm8, %v4786_v40 }
 0xad1   : > { %2950 = vmatpush1.bf16.msra.mxu1 %v2919_v42  ;;  %v2896_v43 = vpop.permute.xlu1 %2895  ;;  %2744 = vmatprep.mubr.bf16.mxu1 %v4808_v0 }
 0xad2   : > { %v2892_v44 = vpop.permute.xlu0 %2891  ;;  %v2923_v55 = vsel %vm1086_vm7, %v2896_v43, %v2898_v20 }
 0xad3   : > { %v2922_v49 = vsel %vm1086_vm7, %v2892_v44, %v2894_v37  ;;  %v2921_v52 = vsel %vm1086_vm7, %v2890_v31, %v2892_v44 }
 0xad4   : > { %2951 = vmatprep.subr.bf16.mxu1 %v2922_v49 }
 0xad5   : > { %2952 = vmatpush1.bf16.msra.mxu1 %v2921_v52  ;;  %v2906_v50 = vpop.permute.xlu1 %2905 }
 0xad6   : > { %v2904_v51 = vpop.permute.xlu0 %2903  ;;  %2953 = vmatprep.subr.bf16.mxu1 %v2924_v54 }
 0xad7   : > { %v2926_v57 = vsel %vm1086_vm7, %v2904_v51, %v2906_v50 }
 0xad8   : > { %4706 = vmatmul.mubr.msk.bf16.gmra.mrb[36].mxu1 %vm2695_vm8, %v4788_v53 }
 0xad9   : > { %2954 = vmatpush1.bf16.msra.mxu1 %v2923_v55  ;;  %v2910_v56 = vpop.permute.xlu1 %2909  ;;  %2981 = vmatprep.mubr.bf16.mxu1 %v4808_v0 }
 0xada   : > { %v2902_v59 = vpop.permute.xlu0 %2901  ;;  %2955 = vmatprep.subr.bf16.mxu1 %v2926_v57 }
 0xadb   : > { %v2925_v60 = vsel %vm1086_vm7, %v2902_v59, %v2904_v51 }
 0xadd   : > { %2956 = vmatpush1.bf16.msra.mxu1 %v2925_v60  ;;  %v2908_v5 = vpop.permute.xlu1 %2907 }
 0xade   : > { %v2912_v6 = vpop.permute.xlu0 %2911  ;;  %v2927_v58 = vsel %vm1086_vm7, %v2908_v5, %v2910_v56 }
 0xadf   : > { %v2928_v7 = vsel %vm1086_vm7, %v2910_v56, %v2912_v6 }
 0xae0   : > { %2957 = vmatprep.subr.bf16.mxu1 %v2928_v7 }
 0xae1   : > { %2958 = vmatpush1.bf16.msra.mxu1 %v2927_v58  ;;  %v2918_v8 = vpop.permute.xlu1 %2917 }
 0xae2   : > { %v2916_v9 = vpop.permute.xlu0 %2915 }
 0xae3   : > { %v2930_v10 = vsel %vm1086_vm7, %v2916_v9, %v2918_v8 }
 0xae4   : > { %2959 = vmatprep.subr.bf16.mxu1 %v2930_v10 }
 0xae6   : > { %v2914_v11 = vpop.permute.xlu0 %2913 }
 0xae7   : > { %v2929_v16 = vsel %vm1086_vm7, %v2914_v11, %v2916_v9 }
 0xae8   : > { %2960 = vmatpush1.bf16.msra.mxu1 %v2929_v16 }
 0xaeb   : > { %4717 = vmatmul.mubr.msk.bf16.vlgmr.msra.gmra.mrb[40].mxu1 %vm2695_vm8, %v4790_v63 }
 0xaec   : > { %2991 = vmatprep.mubr.bf16.mxu1 %v4808_v0 }
 0xaf2   : > { %v3025_v58 = vpop.permute.xlu1 %3024 }
 0xaf3   : > { %4718 = vmatmul.mubr.msk.bf16.gmra.mrb[44].mxu1 %vm2695_vm8, %v4791_v22 }
 0xaf4   : > { %3317 = vmatprep.mubr.bf16.mxu1 %v4808_v0 }
 0xaf7   : > { %v3030_v16 = vpop.permute.xlu0 %3029 }
 0xb21   : > { %v2813_v32 = vpop.f32.mrb[40].mxu0 }
 0xb22   : > { %v2815_v33 = vpop.f32.mrb[41].mxu0 }
 0xb23   : > { %v2817_v34 = vpop.f32.mrb[42].mxu0 }
 0xb24   : > { %v2819_v35 = vpop.f32.mrb[43].mxu0 }
 0xb29   : > { %v2823_v1 = vpop.f32.mrb[44].mxu0 }
 0xb2a   : > { %v2825_v2 = vpop.f32.mrb[45].mxu0 }
 0xb2b   : > { %v2827_v23 = vpop.f32.mrb[46].mxu0 }
 0xb2c   : > { %v2829_v24 = vpop.f32.mrb[47].mxu0 }
 0xba3   : > { %v2736_v25 = vpop.f32.mrb[32].mxu1 }
 0xba4   : > { %v2755_v26 = vmul.f32 %v2736_v25, %v5091_v3  ;;  %v2738_v27 = vpop.f32.mrb[33].mxu1 }
 0xba5   : > { %v2756_v28 = vmul.f32 %v2738_v27, %v5093_v4  ;;  %v2740_v30 = vpop.f32.mrb[34].mxu1 }
 0xba6   : > { %v2757_v31 = vmul.f32 %v2740_v30, %v5091_v3  ;;  %v2814_v36 = vadd.f32 %v2813_v32, %v2755_v26  ;;  %v2742_v37 = vpop.f32.mrb[35].mxu1 }
 0xba7   : > { %v2758_v38 = vmul.f32 %v2742_v37, %v5093_v4  ;;  %v2816_v17 = vadd.f32 %v2815_v33, %v2756_v28  ;;  %v3035_v37 = vpop.permute.xlu1 %3034 }
 0xba8   : > { %v2818_v39 = vadd.f32 %v2817_v34, %v2757_v31 }
 0xba9   : > { %v2820_v40 = vadd.f32 %v2819_v35, %v2758_v38 }
 0xbab   : > { %v2746_v20 = vpop.f32.mrb[36].mxu1 }
 0xbac   : > { %v2759_v21 = vmul.f32 %v2746_v20, %v5091_v3  ;;  %v2748_v41 = vpop.f32.mrb[37].mxu1 }
 0xbad   : > { %v2760_v42 = vmul.f32 %v2748_v41, %v5093_v4  ;;  %v2750_v43 = vpop.f32.mrb[38].mxu1 }
 0xbae   : > { %v2761_v44 = vmul.f32 %v2750_v43, %v5091_v3  ;;  %v2824_v49 = vadd.f32 %v2823_v1, %v2759_v21  ;;  %v2752_v52 = vpop.f32.mrb[39].mxu1  ;;  %v3040_v21 = vpop.permute.xlu0 %3039 }
 0xbaf   : > { %v2762_v53 = vmul.f32 %v2752_v52, %v5093_v4  ;;  %v2826_v50 = vadd.f32 %v2825_v2, %v2760_v42 }
 0xbb0   : > { %v2828_v54 = vadd.f32 %v2827_v23, %v2761_v44 }
 0xbb1   : > { %v2830_v51 = vadd.f32 %v2829_v24, %v2762_v53 }
 0xbbe   : > { %v2983_v55 = vpop.f32.mrb[40].mxu1 }
 0xbbf   : > { %v3002_v56 = vmul.f32 %v2983_v55, %v5100_v14  ;;  %v2985_v57 = vpop.f32.mrb[41].mxu1 }
 0xbc0   : > { %v3003_v59 = vmul.f32 %v2985_v57, %v5102_v15  ;;  %v2987_v60 = vpop.f32.mrb[42].mxu1 }
 0xbc1   : > { %v3010_v5 = vadd.f32 %v3002_v56, %v2814_v36  ;;  %v3004_v6 = vmul.f32 %v2987_v60, %v5100_v14  ;;  %v2989_v7 = vpop.f32.mrb[43].mxu1  ;;  %v3069_v60 = vpop.permute.xlu1 %3068 }
 0xbc2   : > { %v3011_v8 = vadd.f32 %v3003_v59, %v2816_v17  ;;  %v3005_v9 = vmul.f32 %v2989_v7, %v5102_v15 }
 0xbc3   : > { %v3042_v10 = vadd.f32 %v3025_v58, %v3010_v5  ;;  %v3012_v11 = vadd.f32 %v3004_v6, %v2818_v39  ;;  %v3074_v6 = vpop.permute.xlu0 %3073 }
 0xbc4   : > { %v3043_v63 = vadd.f32 %v3025_v58, %v3011_v8  ;;  %v3013_v22 = vadd.f32 %v3005_v9, %v2820_v40 }
 0xbc5   : > { %v3044_v32 = vadd.f32 %v3030_v16, %v3012_v11  ;;  %v3050_v35 = vmax.f32 %v3042_v10, 0.0 }
 0xbc6   : > { %v3045_v33 = vadd.f32 %v3030_v16, %v3013_v22  ;;  %v2993_v34 = vpop.f32.mrb[44].mxu1  ;;  %v3051_v24 = vmax.f32 %v3043_v63, 0.0  ;;  %v3394_v22 = vld [vmem:[#allocation2 + $0x58] sm:$0xff] }
 0xbc7   : > { %v3052_v1 = vmax.f32 %v3044_v32, 0.0  ;;  %v3006_v2 = vmul.f32 %v2993_v34, %v5100_v14  ;;  %v2995_v23 = vpop.f32.mrb[45].mxu1  ;;  %3583 = vst.msk [vmem:[#allocation2 + $0x58] sm:$0xff] %vm874_vm3, %v4808_v0  ;;  %v3195_v32 = vld [vmem:[#allocation2 + $0x40] sm:$0xff]  ;;  %v5769_v34 = vld [vmem:[#allocation2 + $0x88] sm:$0xff] }
 0xbc8   : > { %v3053_v25 = vmax.f32 %v3045_v33, 0.0  ;;  %v3007_v26 = vmul.f32 %v2995_v23, %v5102_v15  ;;  %v2997_v27 = vpop.f32.mrb[46].mxu1  ;;  %v3196_v33 = vld [vmem:[#allocation2 + $0x60] sm:$0xff] }
 0xbc9   : > { %v3060_v28 = vpack.c.bf16 %v3052_v1, %v3050_v35  ;;  %v3014_v30 = vadd.f32 %v3006_v2, %v2824_v49  ;;  %v3008_v31 = vmul.f32 %v2997_v27, %v5100_v14  ;;  %v2999_v36 = vpop.f32.mrb[47].mxu1  ;;  %v3188_v35 = vld [vmem:[#allocation2 + $0x90] sm:$0xff]  ;;  %v3197_v1 = vld [vmem:[#allocation2 + $0x80] sm:$0xff] }
 0xbca   : > { %v3015_v38 = vadd.f32 %v3007_v26, %v2826_v50  ;;  %v3009_v17 = vmul.f32 %v2999_v36, %v5102_v15  ;;  %v3061_v39 = vpack.c.bf16 %v3053_v25, %v3051_v24  ;;  %v4792_v50 = vld [vmem:[%s6166_s22] sm:$0xff]  }
 0xbcb   : > { %v3046_v40 = vadd.f32 %v3035_v37, %v3014_v30  ;;  %v3016_v20 = vadd.f32 %v3008_v31, %v2828_v54  ;;  %v3193_v54 = vld [vmem:[#allocation2] sm:$0xff] }
 0xbcc   : > { %v3047_v41 = vadd.f32 %v3035_v37, %v3015_v38  ;;  %v3017_v42 = vadd.f32 %v3009_v17, %v2830_v51  ;;  %3085 = vmatprep.subr.bf16.mxu0 %v3061_v39  ;;  %3563 = vst.msk [vmem:[#allocation2] sm:$0xff] %vm854_vm2, %v4808_v0  ;;  %v3194_v51 = vld [vmem:[#allocation2 + $0x20] sm:$0xff] }
 0xbcd   : > { %v3048_v43 = vadd.f32 %v3040_v21, %v3016_v20  ;;  %3086 = vmatpush1.bf16.msra.mxu0 %v3060_v28  ;;  %v3054_v52 = vmax.f32 %v3046_v40, 0.0  ;;  %3578 = vst.msk [vmem:[#allocation2 + $0x20] sm:$0xff] %vm854_vm2, %v4808_v0  ;;  %v3388_v20 = vld [vmem:[#allocation2 + $0x18] sm:$0xff] }
 0xbce   : > { %v3049_v44 = vadd.f32 %v3040_v21, %v3017_v42  ;;  %v3055_v49 = vmax.f32 %v3047_v41, 0.0  ;;  %v4794_v21 = vld [vmem:[%s6227_s9 + $0x8] sm:$0xff]  }
 0xbcf   : > { %v3056_v53 = vmax.f32 %v3048_v43, 0.0  ;;  %v3542_v41 = vld [vmem:[%s6162_s18 + $0x8] sm:$0xff] }
 0xbd0   : > { %v3057_v55 = vmax.f32 %v3049_v44, 0.0 }
 0xbd1   : > { %v3062_v56 = vpack.c.bf16 %v3056_v53, %v3054_v52 }
 0xbd2   : > { %v3063_v57 = vpack.c.bf16 %v3057_v55, %v3055_v49 }
 0xbd4   : > { %3087 = vmatprep.subr.bf16.mxu0 %v3063_v57 }
 0xbd5   : > { %3088 = vmatpush1.bf16.msra.mxu0 %v3062_v56 }
 0xbd6   : > { %3340 = vmatprep.subr.bf16.mxu0 %v5387_v19 }
 0xbd8   : > { %4720 = vmatmul.mubr.msk.bf16.vlgmr.msra.gmra.mrb[48].mxu0 %vm3081_vm9, %v4792_v50 }
 0xbd9   : > { %3341 = vmatpush1.bf16.msra.mxu0 %v5591_v18  ;;  %3372 = vmatprep.mubr.bf16.mxu0 %v4808_v0 }
 0xcab   : > { %v3119_v59 = vpop.f32.mrb[48].mxu0 }
 0xcac   : > { %v3121_v5 = vpop.f32.mrb[49].mxu0  ;;  %v3120_v58 = vadd.f32 %v3119_v59, %v3069_v60 }
 0xcad   : > { %v3123_v7 = vpop.f32.mrb[50].mxu0  ;;  %v3122_v10 = vadd.f32 %v3121_v5, %v3069_v60 }
 0xcae   : > { %v3124_v8 = vadd.f32 %v3123_v7, %v3074_v6  ;;  %v3125_v9 = vpop.f32.mrb[51].mxu0 }
 0xcaf   : > { %v3126_v11 = vadd.f32 %v3125_v9, %v3074_v6 }
 0xcb0   : > { %v5743_v16 = vpack.c.bf16 %v3124_v8, %v3120_v58 }
 0xcb1   : > { %v5745_v63 = vpack.c.bf16 %v3126_v11, %v3122_v10 }
 0xcb2   : > { %3136 = vrot.lane.b32.xlu1 %v5743_v16, %s6222_s0 }
 0xcb3   : > { %3138 = vrot.lane.b32.xlu0 %v5745_v63, %s6222_s0 }
 0xcb6   : > { %3162 = vrot.lane.b32.xlu1 %v5743_v16, %s6223_s29 }
 0xcb7   : > { %3164 = vrot.lane.b32.xlu0 %v5745_v63, %s6223_s29 }
 0xcba   : > { %3224 = vrot.lane.b32.xlu1 %v5591_v18, %s6224_s1 }
 0xcbb   : > { %3226 = vrot.lane.b32.xlu0 %v5387_v19, %s6224_s1 }
 0xcbe   : > { %3222 = vrot.lane.b32.xlu1 %v3193_v54, %s6224_s1 }
 0xcbf   : > { %3228 = vrot.lane.b32.xlu0 %v3194_v51, %s6224_s1 }
 0xcc2   : > { %3236 = vrot.lane.b32.xlu1 %v5356_v12, %s6224_s1 }
 0xcc3   : > { %3238 = vrot.lane.b32.xlu0 %v5358_v13, %s6224_s1 }
 0xcc6   : > { %3234 = vrot.lane.b32.xlu1 %v3195_v32, %s6224_s1 }
 0xcc7   : > { %3240 = vrot.lane.b32.xlu0 %v3196_v33, %s6224_s1 }
 0xcca   : > { %3248 = vrot.lane.b32.xlu1 %v5769_v34, %s6224_s1 }
 0xccb   : > { %3250 = vrot.lane.b32.xlu0 %v3188_v35, %s6224_s1 }
 0xcce   : > { %3246 = vrot.lane.b32.xlu1 %v3197_v1, %s6224_s1 }
 0xccf   : > { %3242 = vrot.lane.b32.xlu0 %v5743_v16, %s6224_s1 }
 0xcd2   : > { %3244 = vrot.lane.b32.xlu1 %v5745_v63, %s6224_s1 }
 0xd24   : > { %v3137_v2 = vpop.permute.xlu1 %3136 }
 0xd25   : > { %3147 = vst.msk [vmem:[#allocation2 + $0x28] sm:$0xff] %vm869_vm4, %v3137_v2  ;;  %v3139_v23 = vpop.permute.xlu0 %3138 }
 0xd26   : > { %v3140_v24 = vsel %vm856_vm0, %v3137_v2, %v3139_v23  ;;  %3149 = vst.msk [vmem:[#allocation2 + $0x38] sm:$0xff] %vm856_vm0, %v3139_v23  ;;  %v4793_v2 = vld [vmem:[%s6227_s9] sm:$0xff]  }
 0xd27   : > { %3232 = vrot.lane.b32.xlu1 %v3140_v24, %s6224_s1  ;;  %3342 = vmatprep.subr.bf16.mxu0 %v3140_v24 }
 0xd28   : > { %v3163_v25 = vpop.permute.xlu1 %3162 }
 0xd29   : > { %3173 = vst.msk [vmem:[#allocation2 + $0xa0] sm:$0xff] %vm878_vm1, %v3163_v25  ;;  %v3165_v26 = vpop.permute.xlu0 %3164 }
 0xd2a   : > { %v3166_v27 = vsel %vm885_vm5, %v3163_v25, %v3165_v26  ;;  %3175 = vst.msk [vmem:[#allocation2 + $0xb0] sm:$0xff] %vm885_vm5, %v3165_v26 }
 0xd2c   : > { %v3225_v28 = vpop.permute.xlu1 %3224  ;;  %v3181_v30 = vld [vmem:[#allocation2 + $0x28] sm:$0xff] }
 0xd2d   : > { %v3227_v31 = vpop.permute.xlu0 %3226  ;;  %3230 = vrot.lane.b32.xlu0 %v3181_v30, %s6224_s1  ;;  %3343 = vmatpush1.bf16.msra.mxu0 %v3181_v30  ;;  %v3391_v36 = vld [vmem:[#allocation2 + $0x38] sm:$0xff] }
 0xd2e   : > { %v3259_v37 = vsel %vm874_vm3, %v3225_v28, %v3227_v31  ;;  %3344 = vmatprep.subr.bf16.mxu0 %v5358_v13  ;;  %3579 = vst.msk [vmem:[#allocation2 + $0x38] sm:$0xff] %vm874_vm3, %v4808_v0 }
 0xd2f   : > { %3285 = vmatprep.subr.bf16.mxu1 %v3259_v37 }
 0xd30   : > { %v3223_v38 = vpop.permute.xlu1 %3222  ;;  %v3198_v17 = vld [vmem:[#allocation2 + $0xa0] sm:$0xff] }
 0xd31   : > { %v3258_v39 = vsel %vm874_vm3, %v3223_v38, %v3225_v28  ;;  %3252 = vrot.lane.b32.xlu0 %v3198_v17, %s6224_s1  ;;  %v3190_v40 = vld [vmem:[#allocation2 + $0xb0] sm:$0xff]  ;;  %3345 = vmatpush1.bf16.msra.mxu0 %v5356_v12  ;;  %v3229_v42 = vpop.permute.xlu0 %3228 }
 0xd32   : > { %3286 = vmatpush1.bf16.msra.mxu1 %v3258_v39  ;;  %3256 = vrot.lane.b32.xlu1 %v3190_v40, %s6224_s1 }
 0xd33   : > { %3346 = vmatprep.subr.bf16.mxu0 %v5745_v63 }
 0xd34   : > { %v3237_v43 = vpop.permute.xlu1 %3236 }
 0xd35   : > { %3431 = vrot.lane.b32.xlu0 %v3388_v20, %s6226_s13  ;;  %3347 = vmatpush1.bf16.msra.mxu0 %v5743_v16  ;;  %v3239_v44 = vpop.permute.xlu0 %3238 }
 0xd36   : > { %3429 = vrot.lane.b32.xlu1 %v5387_v19, %s6226_s13  ;;  %3348 = vmatprep.subr.bf16.mxu0 %v3188_v35  ;;  %v3397_v19 = vld [vmem:[#allocation2 + $0x78] sm:$0xff]  ;;  %v3263_v5 = vsel %vm874_vm3, %v3237_v43, %v3239_v44 }
 0xd38   : > { %v3235_v52 = vpop.permute.xlu1 %3234 }
 0xd39   : > { %3433 = vrot.lane.b32.xlu0 %v3181_v30, %s6226_s13  ;;  %3349 = vmatpush1.bf16.msra.mxu0 %v5769_v34  ;;  %v3241_v53 = vpop.permute.xlu0 %3240  ;;  %v3262_v58 = vsel %vm874_vm3, %v3235_v52, %v3237_v43 }
 0xd3a   : > { %3427 = vrot.lane.b32.xlu1 %v5591_v18, %s6226_s13  ;;  %3350 = vmatprep.subr.bf16.mxu0 %v3190_v40  ;;  %v3400_v18 = vld [vmem:[#allocation2 + $0x98] sm:$0xff] }
 0xd3c   : > { %v3249_v49 = vpop.permute.xlu1 %3248 }
 0xd3d   : > { %3254 = vrot.lane.b32.xlu0 %v3166_v27, %s6224_s1  ;;  %3351 = vmatpush1.bf16.msra.mxu0 %v3166_v27  ;;  %v3251_v55 = vpop.permute.xlu0 %3250 }
 0xd3e   : > { %3437 = vrot.lane.b32.xlu1 %v3391_v36, %s6226_s13 }
 0xd40   : > { %4726 = vmatmul.mubr.msk.bf16.vlgmr.msra.gmra.mrb[52].mxu0 %vm2695_vm8, %v4794_v21  ;;  %v3247_v56 = vpop.permute.xlu1 %3246 }
 0xd41   : > { %3443 = vrot.lane.b32.xlu0 %v3394_v22, %s6226_s13  ;;  %3688 = vmatprep.mubr.bf16.mxu0 %v4808_v0  ;;  %v3243_v57 = vpop.permute.xlu0 %3242  ;;  %v3266_v32 = vsel %vm874_vm3, %v3247_v56, %v3249_v49 }
 0xd42   : > { %3441 = vrot.lane.b32.xlu1 %v5358_v13, %s6226_s13  ;;  %v3403_v13 = vld [vmem:[#allocation2 + $0xb8] sm:$0xff]  ;;  %v3264_v11 = vsel %vm874_vm3, %v3241_v53, %v3243_v57  ;;  %v4795_v53 = vld [vmem:[%s6227_s9 + $0x10] sm:$0xff]  }
 0xd44   : > { %v3245_v50 = vpop.permute.xlu1 %3244 }
 0xd45   : > { %3435 = vrot.lane.b32.xlu0 %v3140_v24, %s6226_s13  ;;  %v3265_v8 = vsel %vm874_vm3, %v3243_v57, %v3245_v50  ;;  %v3606_v50 = vld [vmem:[#allocation2] sm:$0xff] }
 0xd46   : > { %3439 = vrot.lane.b32.xlu1 %v5356_v12, %s6226_s13  ;;  %v3541_v12 = vld [vmem:[%s6162_s18] sm:$0xff]  ;;  %3939 = vst.msk [vmem:[#allocation2] sm:$0xff] %vm854_vm2, %v4808_v0 }
 0xd49   : > { %3447 = vrot.lane.b32.xlu0 %v5745_v63, %s6226_s13 }
 0xd4a   : > { %3449 = vrot.lane.b32.xlu1 %v3397_v19, %s6226_s13 }
 0xd4d   : > { %3445 = vrot.lane.b32.xlu0 %v5743_v16, %s6226_s13  ;;  %v3267_v16 = vsel %vm874_vm3, %v3249_v49, %v3251_v55 }
 0xd4e   : > { %3453 = vrot.lane.b32.xlu1 %v3188_v35, %s6226_s13 }
 0xd51   : > { %3455 = vrot.lane.b32.xlu0 %v3400_v18, %s6226_s13 }
 0xd52   : > { %3451 = vrot.lane.b32.xlu1 %v5769_v34, %s6226_s13 }
 0xd55   : > { %3459 = vrot.lane.b32.xlu0 %v3190_v40, %s6226_s13 }
 0xd56   : > { %3461 = vrot.lane.b32.xlu1 %v3403_v13, %s6226_s13 }
 0xd59   : > { %3457 = vrot.lane.b32.xlu0 %v3166_v27, %s6226_s13 }
 0xd5a   : > { %3545 = vperm.xlu1 %4773, %v3541_v12  }
 0xd5d   : > { %3550 = vperm.xlu0 %4772, %v3542_v41  }
 0xd99   : > { %v3233_v51 = vpop.permute.xlu1 %3232 }
 0xd9f   : > { %v3231_v54 = vpop.permute.xlu0 %3230 }
 0xda0   : > { %v3260_v59 = vsel %vm874_vm3, %v3229_v42, %v3231_v54  ;;  %v3261_v60 = vsel %vm874_vm3, %v3231_v54, %v3233_v51  ;;  %v3607_v54 = vld [vmem:[#allocation2 + $0x20] sm:$0xff] }
 0xda1   : > { %3287 = vmatprep.subr.bf16.mxu1 %v3261_v60  ;;  %3954 = vst.msk [vmem:[#allocation2 + $0x20] sm:$0xff] %vm854_vm2, %v4808_v0 }
 0xda2   : > { %3288 = vmatpush1.bf16.msra.mxu1 %v3260_v59 }
 0xda3   : > { %v3253_v6 = vpop.permute.xlu0 %3252  ;;  %3289 = vmatprep.subr.bf16.mxu1 %v3263_v5 }
 0xda4   : > { %v3257_v7 = vpop.permute.xlu1 %3256 }
 0xda6   : > { %3290 = vmatpush1.bf16.msra.mxu1 %v3262_v58 }
 0xda7   : > { %v3432_v9 = vpop.permute.xlu0 %3431  ;;  %3291 = vmatprep.subr.bf16.mxu1 %v3265_v8 }
 0xda8   : > { %v3430_v10 = vpop.permute.xlu1 %3429 }
 0xda9   : > { %v3464_v23 = vsel %vm1086_vm7, %v3430_v10, %v3432_v9 }
 0xdaa   : > { %3292 = vmatpush1.bf16.msra.mxu1 %v3264_v11 }
 0xdab   : > { %v3434_v63 = vpop.permute.xlu0 %3433  ;;  %3293 = vmatprep.subr.bf16.mxu1 %v3267_v16 }
 0xdac   : > { %v3428_v22 = vpop.permute.xlu1 %3427 }
 0xdad   : > { %v3463_v26 = vsel %vm1086_vm7, %v3428_v22, %v3430_v10 }
 0xdae   : > { %3294 = vmatpush1.bf16.msra.mxu1 %v3266_v32 }
 0xdaf   : > { %v3255_v33 = vpop.permute.xlu0 %3254 }
 0xdb0   : > { %v3268_v34 = vsel %vm874_vm3, %v3253_v6, %v3255_v33  ;;  %v3438_v35 = vpop.permute.xlu1 %3437  ;;  %v3269_v1 = vsel %vm874_vm3, %v3255_v33, %v3257_v7 }
 0xdb1   : > { %3295 = vmatprep.subr.bf16.mxu1 %v3269_v1 }
 0xdb2   : > { %3296 = vmatpush1.bf16.msra.mxu1 %v3268_v34 }
 0xdb3   : > { %v3444_v24 = vpop.permute.xlu0 %3443  ;;  %3490 = vmatprep.subr.bf16.mxu1 %v3464_v23 }
 0xdb4   : > { %v3442_v25 = vpop.permute.xlu1 %3441 }
 0xdb5   : > { %4724 = vmatmul.mubr.msk.bf16.vlgmr.msra.gmra.mrb[48].mxu1 %vm2695_vm8, %v4793_v2  ;;  %v3468_v36 = vsel %vm1086_vm7, %v3442_v25, %v3444_v24 }
 0xdb6   : > { %3491 = vmatpush1.bf16.msra.mxu1 %v3463_v26  ;;  %3522 = vmatprep.mubr.bf16.mxu1 %v4808_v0 }
 0xdb7   : > { %v3436_v27 = vpop.permute.xlu0 %3435 }
 0xdb8   : > { %v3465_v28 = vsel %vm1086_vm7, %v3434_v63, %v3436_v27  ;;  %v3440_v30 = vpop.permute.xlu1 %3439  ;;  %v3466_v31 = vsel %vm1086_vm7, %v3436_v27, %v3438_v35 }
 0xdb9   : > { %3492 = vmatprep.subr.bf16.mxu1 %v3466_v31  ;;  %v3467_v17 = vsel %vm1086_vm7, %v3440_v30, %v3442_v25 }
 0xdba   : > { %3493 = vmatpush1.bf16.msra.mxu1 %v3465_v28 }
 0xdbb   : > { %v3448_v37 = vpop.permute.xlu0 %3447  ;;  %3494 = vmatprep.subr.bf16.mxu1 %v3468_v36 }
 0xdbc   : > { %v3450_v38 = vpop.permute.xlu1 %3449 }
 0xdbd   : > { %v3470_v39 = vsel %vm1086_vm7, %v3448_v37, %v3450_v38 }
 0xdbe   : > { %3495 = vmatpush1.bf16.msra.mxu1 %v3467_v17 }
 0xdbf   : > { %v3446_v40 = vpop.permute.xlu0 %3445  ;;  %3496 = vmatprep.subr.bf16.mxu1 %v3470_v39 }
 0xdc0   : > { %v3469_v20 = vsel %vm1086_vm7, %v3446_v40, %v3448_v37  ;;  %v3454_v21 = vpop.permute.xlu1 %3453 }
 0xdc2   : > { %3497 = vmatpush1.bf16.msra.mxu1 %v3469_v20 }
 0xdc3   : > { %v3456_v19 = vpop.permute.xlu0 %3455 }
 0xdc4   : > { %v3452_v18 = vpop.permute.xlu1 %3451  ;;  %v3472_v13 = vsel %vm1086_vm7, %v3454_v21, %v3456_v19  ;;  %v3762_v19 = vld [vmem:[#allocation2 + $0x38] sm:$0xff] }
 0xdc5   : > { %v3471_v12 = vsel %vm1086_vm7, %v3452_v18, %v3454_v21  ;;  %3498 = vmatprep.subr.bf16.mxu1 %v3472_v13  ;;  %3955 = vst.msk [vmem:[#allocation2 + $0x38] sm:$0xff] %vm874_vm3, %v4808_v0  ;;  %v3765_v18 = vld [vmem:[#allocation2 + $0x58] sm:$0xff] }
 0xdc6   : > { %3499 = vmatpush1.bf16.msra.mxu1 %v3471_v12  ;;  %3959 = vst.msk [vmem:[#allocation2 + $0x58] sm:$0xff] %vm874_vm3, %v4808_v0 }
 0xdc7   : > { %v3460_v41 = vpop.permute.xlu0 %3459 }
 0xdc8   : > { %v3462_v42 = vpop.permute.xlu1 %3461 }
 0xdc9   : > { %v3474_v43 = vsel %vm1086_vm7, %v3460_v41, %v3462_v42 }
 0xdca   : > { %3500 = vmatprep.subr.bf16.mxu1 %v3474_v43 }
 0xdcb   : > { %v3458_v44 = vpop.permute.xlu0 %3457 }
 0xdcc   : > { %v3473_v52 = vsel %vm1086_vm7, %v3458_v44, %v3460_v41 }
 0xdcd   : > { %3501 = vmatpush1.bf16.msra.mxu1 %v3473_v52  ;;  %v4122_v45 = vld [vmem:[#allocation2 + $0x58] sm:$0xff] }
 0xdce   : > { %4242 = vst.msk [vmem:[#allocation2 + $0x58] sm:$0xff] %vm874_vm3, %v4808_v0 }
 0xdd0   : > { %4730 = vmatmul.mubr.msk.bf16.vlgmr.msra.gmra.mrb[52].mxu1 %vm2695_vm8, %v4795_v53 }
 0xdd1   : > { %3845 = vmatprep.mubr.bf16.mxu1 %v4808_v0 }
 0xdd9   : > { %v3546_v23 = vpop.permute.xlu1 %3545 }
 0xddc   : > { %v3551_v28 = vpop.permute.xlu0 %3550 }
 0xe13   : > { %v3374_v49 = vpop.f32.mrb[52].mxu0 }
 0xe14   : > { %v3376_v55 = vpop.f32.mrb[53].mxu0 }
 0xe15   : > { %v3378_v56 = vpop.f32.mrb[54].mxu0 }
 0xe16   : > { %v3380_v57 = vpop.f32.mrb[55].mxu0 }
 0xe88   : > { %v3319_v51 = vpop.f32.mrb[48].mxu1 }
 0xe89   : > { %v3328_v59 = vmul.f32 %v3319_v51, %v5091_v3  ;;  %v3321_v60 = vpop.f32.mrb[49].mxu1 }
 0xe8a   : > { %v3329_v5 = vmul.f32 %v3321_v60, %v5093_v4  ;;  %v3323_v6 = vpop.f32.mrb[50].mxu1 }
 0xe8b   : > { %v3330_v7 = vmul.f32 %v3323_v6, %v5091_v3  ;;  %v3375_v58 = vadd.f32 %v3374_v49, %v3328_v59  ;;  %v3325_v8 = vpop.f32.mrb[51].mxu1 }
 0xe8c   : > { %v3331_v9 = vmul.f32 %v3325_v8, %v5093_v4  ;;  %v3377_v10 = vadd.f32 %v3376_v55, %v3329_v5 }
 0xe8d   : > { %v3379_v11 = vadd.f32 %v3378_v56, %v3330_v7  ;;  %v3864_v56 = vld [vmem:[%s6163_s19] sm:$0xff] }
 0xe8e   : > { %v3381_v16 = vadd.f32 %v3380_v57, %v3331_v9  ;;  %v3865_v57 = vld [vmem:[%s6163_s19 + $0x8] sm:$0xff] }
 0xea3   : > { %v3524_v63 = vpop.f32.mrb[52].mxu1 }
 0xea4   : > { %v3533_v22 = vmul.f32 %v3524_v63, %v5100_v14  ;;  %v3526_v32 = vpop.f32.mrb[53].mxu1 }
 0xea5   : > { %v3534_v33 = vmul.f32 %v3526_v32, %v5102_v15  ;;  %v3528_v34 = vpop.f32.mrb[54].mxu1 }
 0xea6   : > { %v3537_v35 = vadd.f32 %v3533_v22, %v3375_v58  ;;  %v3535_v1 = vmul.f32 %v3528_v34, %v5100_v14  ;;  %v3530_v2 = vpop.f32.mrb[55].mxu1 }
 0xea7   : > { %v3538_v24 = vadd.f32 %v3534_v33, %v3377_v10  ;;  %v3536_v25 = vmul.f32 %v3530_v2, %v5102_v15  ;;  %v4796_v2 = vld [vmem:[%s6228_s7] sm:$0xff]  }
 0xea8   : > { %v3553_v26 = vadd.f32 %v3546_v23, %v3537_v35  ;;  %v3539_v27 = vadd.f32 %v3535_v1, %v3379_v11 }
 0xea9   : > { %v3554_v30 = vadd.f32 %v3546_v23, %v3538_v24  ;;  %v3540_v31 = vadd.f32 %v3536_v25, %v3381_v16 }
 0xeaa   : > { %v3555_v36 = vadd.f32 %v3551_v28, %v3539_v27  ;;  %v3557_v38 = vmax.f32 %v3553_v26, 0.0 }
 0xeab   : > { %v3556_v37 = vadd.f32 %v3551_v28, %v3540_v31  ;;  %v3558_v39 = vmax.f32 %v3554_v30, 0.0 }
 0xeac   : > { %v3559_v17 = vmax.f32 %v3555_v36, 0.0 }
 0xead   : > { %v3560_v40 = vmax.f32 %v3556_v37, 0.0 }
 0xeae   : > { %v5879_v20 = vpack.c.bf16 %v3559_v17, %v3557_v38  ;;  %v4797_v38 = vld [vmem:[%s6228_s7 + $0x8] sm:$0xff]   ;;  %v4798_v17 = vld [vmem:[%s6228_s7 + $0x10] sm:$0xff]  }
 0xeaf   : > { %v5881_v21 = vpack.c.bf16 %v3560_v40, %v3558_v39 }
 0xeb0   : > { %3567 = vrot.lane.b32.xlu1 %v5879_v20, %s6222_s0 }
 0xeb1   : > { %3569 = vrot.lane.b32.xlu0 %v5881_v21, %s6222_s0 }
 0xeb4   : > { %3584 = vrot.lane.b32.xlu1 %v5879_v20, %s6223_s29 }
 0xeb5   : > { %3586 = vrot.lane.b32.xlu0 %v5881_v21, %s6223_s29 }
 0xeb8   : > { %3623 = vrot.lane.b32.xlu1 %v3606_v50, %s6224_s1  ;;  %v3887_v50 = vld [vmem:[%s6169_s25] sm:$0xff] }
 0xeb9   : > { %3629 = vrot.lane.b32.xlu0 %v3607_v54, %s6224_s1 }
 0xebc   : > { %3633 = vrot.lane.b32.xlu1 %v5881_v21, %s6224_s1 }
 0xebd   : > { %3631 = vrot.lane.b32.xlu0 %v5879_v20, %s6224_s1 }
 0xf22   : > { %v3568_v13 = vpop.permute.xlu1 %3567 }
 0xf23   : > { %3575 = vst.msk [vmem:[#allocation2 + $0x8] sm:$0xff] %vm869_vm4, %v3568_v13  ;;  %v3570_v12 = vpop.permute.xlu0 %3569 }
 0xf24   : > { %v3571_v41 = vsel %vm856_vm0, %v3568_v13, %v3570_v12  ;;  %3577 = vst.msk [vmem:[#allocation2 + $0x18] sm:$0xff] %vm856_vm0, %v3570_v12 }
 0xf25   : > { %3627 = vrot.lane.b32.xlu0 %v3571_v41, %s6224_s1 }
 0xf26   : > { %v3585_v42 = vpop.permute.xlu1 %3584 }
 0xf27   : > { %3592 = vst.msk [vmem:[#allocation2 + $0x40] sm:$0xff] %vm878_vm1, %v3585_v42  ;;  %v3587_v43 = vpop.permute.xlu0 %3586 }
 0xf28   : > { %3594 = vst.msk [vmem:[#allocation2 + $0x50] sm:$0xff] %vm885_vm5, %v3587_v43  ;;  %v5920_v55 = vsel %vm885_vm5, %v3585_v42, %v3587_v43 }
 0xf2a   : > { %v3598_v44 = vld [vmem:[#allocation2 + $0x8] sm:$0xff]  ;;  %v3624_v54 = vpop.permute.xlu1 %3623 }
 0xf2b   : > { %3625 = vrot.lane.b32.xlu1 %v3598_v44, %s6224_s1  ;;  %3940 = vst.msk [vmem:[#allocation2 + $0x8] sm:$0xff] %vm856_vm0, %v4808_v0  ;;  %v3759_v49 = vld [vmem:[#allocation2 + $0x18] sm:$0xff]  ;;  %v3630_v51 = vpop.permute.xlu0 %3629 }
 0xf2e   : > { %v3608_v52 = vld [vmem:[#allocation2 + $0x40] sm:$0xff]  ;;  %v3634_v59 = vpop.permute.xlu1 %3633 }
 0xf2f   : > { %3635 = vrot.lane.b32.xlu1 %v3608_v52, %s6224_s1  ;;  %v5911_v53 = vld [vmem:[#allocation2 + $0x50] sm:$0xff]  ;;  %v3632_v60 = vpop.permute.xlu0 %3631 }
 0xf30   : > { %3639 = vrot.lane.b32.xlu0 %v5911_v53, %s6224_s1  ;;  %3958 = vst.msk [vmem:[#allocation2 + $0x50] sm:$0xff] %vm878_vm1, %v4808_v0  ;;  %v3644_v8 = vsel %vm874_vm3, %v3632_v60, %v3634_v59  ;;  %v3643_v11 = vsel %vm874_vm3, %v3630_v51, %v3632_v60 }
 0xf33   : > { %3784 = vrot.lane.b32.xlu1 %v3759_v49, %s6226_s13 }
 0xf34   : > { %3780 = vrot.lane.b32.xlu0 %v3598_v44, %s6226_s13 }
 0xf37   : > { %3637 = vrot.lane.b32.xlu1 %v5920_v55, %s6224_s1 }
 0xf38   : > { %3782 = vrot.lane.b32.xlu0 %v3571_v41, %s6226_s13 }
 0xf3b   : > { %3788 = vrot.lane.b32.xlu1 %v5881_v21, %s6226_s13 }
 0xf3c   : > { %3790 = vrot.lane.b32.xlu0 %v3762_v19, %s6226_s13 }
 0xf3f   : > { %3786 = vrot.lane.b32.xlu1 %v5879_v20, %s6226_s13 }
 0xf40   : > { %3794 = vrot.lane.b32.xlu0 %v5911_v53, %s6226_s13 }
 0xf43   : > { %3796 = vrot.lane.b32.xlu1 %v3765_v18, %s6226_s13 }
 0xf44   : > { %3792 = vrot.lane.b32.xlu0 %v5920_v55, %s6226_s13 }
 0xf47   : > { %3868 = vperm.xlu1 %4773, %v3864_v56  }
 0xf48   : > { %3873 = vperm.xlu0 %4772, %v3865_v57  }
 0xf4b   : > { %3890 = vperm.xlu1 %4773, %v3887_v50  }
 0xf97   : > { %v3628_v6 = vpop.permute.xlu0 %3627 }
 0xf9d   : > { %v3626_v5 = vpop.permute.xlu1 %3625 }
 0xf9e   : > { %v3641_v7 = vsel %vm874_vm3, %v3624_v54, %v3626_v5  ;;  %v3642_v58 = vsel %vm874_vm3, %v3626_v5, %v3628_v6 }
 0xf9f   : > { %3656 = vmatprep.subr.bf16.mxu0 %v3642_v58 }
 0xfa0   : > { %3657 = vmatpush1.bf16.msra.mxu0 %v3641_v7 }
 0xfa1   : > { %v3636_v9 = vpop.permute.xlu1 %3635  ;;  %3658 = vmatprep.subr.bf16.mxu0 %v3644_v8 }
 0xfa2   : > { %v3640_v10 = vpop.permute.xlu0 %3639 }
 0xfa4   : > { %3659 = vmatpush1.bf16.msra.mxu0 %v3643_v11 }
 0xfa5   : > { %v3785_v16 = vpop.permute.xlu1 %3784 }
 0xfa6   : > { %v3781_v63 = vpop.permute.xlu0 %3780 }
 0xfa9   : > { %v3638_v22 = vpop.permute.xlu1 %3637 }
 0xfaa   : > { %v3645_v32 = vsel %vm874_vm3, %v3636_v9, %v3638_v22  ;;  %v3646_v33 = vsel %vm874_vm3, %v3638_v22, %v3640_v10  ;;  %v3783_v34 = vpop.permute.xlu0 %3782 }
 0xfab   : > { %3660 = vmatprep.subr.bf16.mxu0 %v3646_v33  ;;  %v3798_v35 = vsel %vm1086_vm7, %v3781_v63, %v3783_v34  ;;  %v3799_v1 = vsel %vm1086_vm7, %v3783_v34, %v3785_v16 }
 0xfac   : > { %3661 = vmatpush1.bf16.msra.mxu0 %v3645_v32  ;;  %3813 = vmatprep.subr.bf16.mxu1 %v3799_v1 }
 0xfad   : > { %v3789_v23 = vpop.permute.xlu1 %3788  ;;  %3711 = vmatprep.subr.bf16.mxu0 %v3571_v41  ;;  %3814 = vmatpush1.bf16.msra.mxu1 %v3798_v35 }
 0xfae   : > { %v3791_v24 = vpop.permute.xlu0 %3790 }
 0xfaf   : > { %4734 = vmatmul.mubr.msk.bf16.vlgmr.msra.gmra.mrb[56].mxu0 %vm946_vm6, %v4796_v2  ;;  %v3801_v25 = vsel %vm1086_vm7, %v3789_v23, %v3791_v24  ;;  %v3980_v24 = vld [vmem:[#allocation2] sm:$0xff] }
 0xfb0   : > { %3712 = vmatpush1.bf16.msra.mxu0 %v3598_v44  ;;  %3815 = vmatprep.subr.bf16.mxu1 %v3801_v25  ;;  %4222 = vst.msk [vmem:[#allocation2] sm:$0xff] %vm854_vm2, %v4808_v0  ;;  %v3981_v25 = vld [vmem:[#allocation2 + $0x20] sm:$0xff] }
 0xfb1   : > { %v3787_v26 = vpop.permute.xlu1 %3786  ;;  %3713 = vmatprep.subr.bf16.mxu0 %v5881_v21  ;;  %3743 = vmatprep.mubr.bf16.mxu0 %v4808_v0  ;;  %4237 = vst.msk [vmem:[#allocation2 + $0x20] sm:$0xff] %vm854_vm2, %v4808_v0 }
 0xfb2   : > { %v3800_v27 = vsel %vm1086_vm7, %v3787_v26, %v3789_v23  ;;  %v3795_v28 = vpop.permute.xlu0 %3794  ;;  %v3884_v23 = vld [vmem:[%s6167_s23] sm:$0xf] }
 0xfb3   : > { %3816 = vmatpush1.bf16.msra.mxu1 %v3800_v27 }
 0xfb4   : > { %3714 = vmatpush1.bf16.msra.mxu0 %v5879_v20 }
 0xfb5   : > { %v3797_v30 = vpop.permute.xlu1 %3796  ;;  %3715 = vmatprep.subr.bf16.mxu0 %v5911_v53 }
 0xfb6   : > { %v3803_v31 = vsel %vm1086_vm7, %v3795_v28, %v3797_v30  ;;  %v3793_v36 = vpop.permute.xlu0 %3792 }
 0xfb7   : > { %3817 = vmatprep.subr.bf16.mxu1 %v3803_v31  ;;  %v3802_v37 = vsel %vm1086_vm7, %v3793_v36, %v3795_v28 }
 0xfb8   : > { %3716 = vmatpush1.bf16.msra.mxu0 %v5920_v55  ;;  %3818 = vmatpush1.bf16.msra.mxu1 %v3802_v37 }
 0xfbb   : > { %4736 = vmatmul.mubr.msk.bf16.vlgmr.msra.gmra.mrb[60].mxu0 %vm946_vm6, %v4797_v38  ;;  %4740 = vmatmul.mubr.msk.bf16.vlgmr.msra.gmra.mrb[56].mxu1 %vm946_vm6, %v4798_v17 }
 0xfbc   : > { %3928 = vmatprep.mubr.bf16.mxu0 %v4808_v0  ;;  %4057 = vmatprep.mubr.bf16.mxu1 %v4808_v0 }
 0xfc6   : > { %v3869_v5 = vpop.permute.xlu1 %3868 }
 0xfc7   : > { %v3874_v10 = vpop.permute.xlu0 %3873 }
 0xfca   : > { %v3891_v26 = vpop.permute.xlu1 %3890 }
0x1082   : > { %v3690_v39 = vpop.f32.mrb[56].mxu0 }
0x1083   : > { %v3692_v40 = vpop.f32.mrb[57].mxu0  ;;  %v3699_v19 = vmul.f32 %v3690_v39, %v5091_v3  ;;  %v4119_v39 = vld [vmem:[#allocation2 + $0x38] sm:$0xff] }
0x1084   : > { %v3694_v20 = vpop.f32.mrb[58].mxu0  ;;  %v3700_v18 = vmul.f32 %v3692_v40, %v5093_v4  ;;  %4238 = vst.msk [vmem:[#allocation2 + $0x38] sm:$0xff] %vm874_vm3, %v4808_v0 }
0x1085   : > { %v3696_v21 = vpop.f32.mrb[59].mxu0  ;;  %v3701_v41 = vmul.f32 %v3694_v20, %v5091_v3 }
0x1086   : > { %v3702_v53 = vmul.f32 %v3696_v21, %v5093_v4 }
0x108e   : > { %v3745_v13 = vpop.f32.mrb[60].mxu0  ;;  %v3847_v12 = vpop.f32.mrb[56].mxu1 }
0x108f   : > { %v3746_v42 = vadd.f32 %v3745_v13, %v3699_v19  ;;  %v3747_v43 = vpop.f32.mrb[61].mxu0  ;;  %v3856_v44 = vmul.f32 %v3847_v12, %v5100_v14  ;;  %v3849_v52 = vpop.f32.mrb[57].mxu1 }
0x1090   : > { %v3748_v49 = vadd.f32 %v3747_v43, %v3700_v18  ;;  %v3749_v55 = vpop.f32.mrb[62].mxu0  ;;  %v3857_v56 = vmul.f32 %v3849_v52, %v5102_v15  ;;  %v3851_v57 = vpop.f32.mrb[58].mxu1 }
0x1091   : > { %v3860_v50 = vadd.f32 %v3856_v44, %v3746_v42  ;;  %v3750_v54 = vadd.f32 %v3749_v55, %v3701_v41  ;;  %v3751_v51 = vpop.f32.mrb[63].mxu0  ;;  %v3858_v59 = vmul.f32 %v3851_v57, %v5100_v14  ;;  %v3853_v60 = vpop.f32.mrb[59].mxu1  ;;  %v4742_v41 = vld [vmem:[%s6229_s11 + $0x4] sm:$0xf] }
0x1092   : > { %v3861_v6 = vadd.f32 %v3857_v56, %v3748_v49  ;;  %v3752_v7 = vadd.f32 %v3751_v51, %v3702_v53  ;;  %v3859_v58 = vmul.f32 %v3853_v60, %v5102_v15  ;;  %v4210_v42 = vld [vmem:[%s6164_s20] sm:$0xff] }
0x1093   : > { %v3876_v8 = vadd.f32 %v3869_v5, %v3860_v50  ;;  %v3862_v9 = vadd.f32 %v3858_v59, %v3750_v54 }
0x1094   : > { %v3877_v11 = vadd.f32 %v3869_v5, %v3861_v6  ;;  %v3863_v16 = vadd.f32 %v3859_v58, %v3752_v7 }
0x1095   : > { %v3878_v63 = vadd.f32 %v3874_v10, %v3862_v9  ;;  %v3880_v32 = vmax.f32 %v3876_v8, 0.0 }
0x1096   : > { %v3879_v22 = vadd.f32 %v3874_v10, %v3863_v16  ;;  %v3881_v34 = vmax.f32 %v3877_v11, 0.0  ;;  %v3979_v10 = vld [vmem:[%s6229_s11] sm:$0xf] }
0x1097   : > { %v3882_v33 = vmax.f32 %v3878_v63, 0.0 }
0x1098   : > { %v3883_v35 = vmax.f32 %v3879_v22, 0.0 }
0x1099   : > { %v3885_v1 = vpack.c.bf16 %v3882_v33, %v3880_v32 }
0x109a   : > { %v3886_v2 = vpack.c.bf16 %v3883_v35, %v3881_v34 }
0x109c   : > { %3896 = vmatprep.subr.bf16.mxu0 %v3886_v2 }
0x109d   : > { %3897 = vmatpush1.bf16.msra.mxu0 %v3885_v1 }
0x10a0   : > { %4741 = vmatmul.mubr.msk.bf16.vlgmr.msra.gmra.mrb[64].mxu0 %vm856_vm0, %v3884_v23 }
0x10a1   : > { %4103 = vmatprep.mubr.bf16.mxu0 %v4808_v0 }
0x1173   : > { %v3930_v27 = vpop.f32.mrb[64].mxu0 }
0x1174   : > { %v3931_v28 = vadd.f32 %v3930_v27, %v3891_v26  ;;  %v3932_v30 = vpop.f32.mrb[65].mxu0 }
0x1175   : > { %v3933_v31 = vadd.f32 %v3932_v30, %v3891_v26  ;;  %v3934_v36 = vpop.f32.mrb[66].mxu0 }
0x1176   : > { %v3937_v37 = vpack.c.bf16 %v3931_v28, %v1449_v47  ;;  %v3935_v38 = vpop.f32.mrb[67].mxu0 }
0x1177   : > { %v3938_v17 = vpack.c.bf16 %v3933_v31, %v1450_v48 }
0x1178   : > { %3943 = vrot.lane.b32.xlu0 %v3937_v37, %s6222_s0 }
0x1179   : > { %3945 = vrot.lane.b32.xlu1 %v3938_v17, %s6222_s0 }
0x117c   : > { %3960 = vrot.lane.b32.xlu0 %v3937_v37, %s6223_s29 }
0x117d   : > { %3962 = vrot.lane.b32.xlu1 %v3938_v17, %s6223_s29 }
0x1180   : > { %3992 = vrot.lane.b32.xlu0 %v3980_v24, %s6224_s1  ;;  %v4745_v24 = vld [vmem:[%s6229_s11 + $0x8] sm:$0xf] }
0x1181   : > { %3998 = vrot.lane.b32.xlu1 %v3981_v25, %s6224_s1 }
0x1184   : > { %4002 = vrot.lane.b32.xlu0 %v3938_v17, %s6224_s1 }
0x1185   : > { %4000 = vrot.lane.b32.xlu1 %v3937_v37, %s6224_s1 }
0x11ea   : > { %v3944_v46 = vpop.permute.xlu0 %3943 }
0x11eb   : > { %3951 = vst.msk [vmem:[#allocation2 + $0x8] sm:$0xff] %vm869_vm4, %v3944_v46  ;;  %v3946_v47 = vpop.permute.xlu1 %3945 }
0x11ec   : > { %v3947_v48 = vsel %vm856_vm0, %v3944_v46, %v3946_v47  ;;  %3953 = vst.msk [vmem:[#allocation2 + $0x18] sm:$0xff] %vm856_vm0, %v3946_v47 }
0x11ed   : > { %4071 = vmatprep.subr.bf16.mxu0 %v3947_v48  ;;  %3996 = vrot.lane.b32.xlu1 %v3947_v48, %s6224_s1 }
0x11ee   : > { %v3961_v40 = vpop.permute.xlu0 %3960 }
0x11ef   : > { %3968 = vst.msk [vmem:[#allocation2 + $0x40] sm:$0xff] %vm878_vm1, %v3961_v40  ;;  %v3963_v20 = vpop.permute.xlu1 %3962 }
0x11f0   : > { %3970 = vst.msk [vmem:[#allocation2 + $0x50] sm:$0xff] %vm885_vm5, %v3963_v20  ;;  %v3964_v13 = vsel %vm885_vm5, %v3961_v40, %v3963_v20 }
0x11f2   : > { %v3973_v21 = vld [vmem:[#allocation2 + $0x8] sm:$0xff]  ;;  %v3993_v43 = vpop.permute.xlu0 %3992 }
0x11f3   : > { %3994 = vrot.lane.b32.xlu0 %v3973_v21, %s6224_s1  ;;  %4072 = vmatpush1.bf16.msra.mxu0 %v3973_v21  ;;  %4223 = vst.msk [vmem:[#allocation2 + $0x8] sm:$0xff] %vm856_vm0, %v4808_v0  ;;  %v4116_v12 = vld [vmem:[#allocation2 + $0x18] sm:$0xff]  ;;  %v3999_v44 = vpop.permute.xlu1 %3998 }
0x11f4   : > { %4073 = vmatprep.subr.bf16.mxu0 %v3938_v17 }
0x11f6   : > { %v3982_v19 = vld [vmem:[#allocation2 + $0x40] sm:$0xff]  ;;  %v4003_v52 = vpop.permute.xlu0 %4002 }
0x11f7   : > { %4004 = vrot.lane.b32.xlu0 %v3982_v19, %s6224_s1  ;;  %v3978_v18 = vld [vmem:[#allocation2 + $0x50] sm:$0xff]  ;;  %4074 = vmatpush1.bf16.msra.mxu0 %v3937_v37  ;;  %v4001_v53 = vpop.permute.xlu1 %4000 }
0x11f8   : > { %4008 = vrot.lane.b32.xlu1 %v3978_v18, %s6224_s1  ;;  %4075 = vmatprep.subr.bf16.mxu0 %v3978_v18  ;;  %4241 = vst.msk [vmem:[#allocation2 + $0x50] sm:$0xff] %vm878_vm1, %v4808_v0  ;;  %v4013_v50 = vsel %vm874_vm3, %v4001_v53, %v4003_v52  ;;  %v4012_v59 = vsel %vm874_vm3, %v3999_v44, %v4001_v53  ;;  %v4263_v53 = vld [vmem:[#allocation2] sm:$0xff] }
0x11fb   : > { %4136 = vrot.lane.b32.xlu0 %v4116_v12, %s6226_s13  ;;  %4076 = vmatpush1.bf16.msra.mxu0 %v3964_v13 }
0x11fc   : > { %4132 = vrot.lane.b32.xlu1 %v3973_v21, %s6226_s13 }
0x11fe   : > { %4744 = vmatmul.mubr.msk.bf16.vlgmr.msra.gmra.mrb[68].mxu0 %vm946_vm6, %v4742_v41 }
0x11ff   : > { %4006 = vrot.lane.b32.xlu0 %v3964_v13, %s6224_s1  ;;  %4340 = vmatprep.mubr.bf16.mxu0 %v4808_v0 }
0x1200   : > { %4134 = vrot.lane.b32.xlu1 %v3947_v48, %s6226_s13 }
0x1203   : > { %4140 = vrot.lane.b32.xlu0 %v3938_v17, %s6226_s13 }
0x1204   : > { %4142 = vrot.lane.b32.xlu1 %v4119_v39, %s6226_s13 }
0x1207   : > { %4138 = vrot.lane.b32.xlu0 %v3937_v37, %s6226_s13 }
0x1208   : > { %4146 = vrot.lane.b32.xlu1 %v3978_v18, %s6226_s13 }
0x120b   : > { %4148 = vrot.lane.b32.xlu0 %v4122_v45, %s6226_s13 }
0x120c   : > { %4144 = vrot.lane.b32.xlu1 %v3964_v13, %s6226_s13 }
0x120f   : > { %4213 = vperm.xlu0 %4772, %v4210_v42  }
0x125f   : > { %v3997_v55 = vpop.permute.xlu1 %3996 }
0x1265   : > { %v3995_v49 = vpop.permute.xlu0 %3994 }
0x1266   : > { %v4010_v56 = vsel %vm874_vm3, %v3993_v43, %v3995_v49  ;;  %v4011_v57 = vsel %vm874_vm3, %v3995_v49, %v3997_v55  ;;  %v4264_v49 = vld [vmem:[#allocation2 + $0x20] sm:$0xff] }
0x1267   : > { %4025 = vmatprep.subr.bf16.mxu1 %v4011_v57 }
0x1268   : > { %4026 = vmatpush1.bf16.msra.mxu1 %v4010_v56 }
0x1269   : > { %v4005_v54 = vpop.permute.xlu0 %4004  ;;  %4027 = vmatprep.subr.bf16.mxu1 %v4013_v50 }
0x126a   : > { %v4009_v51 = vpop.permute.xlu1 %4008 }
0x126c   : > { %4028 = vmatpush1.bf16.msra.mxu1 %v4012_v59 }
0x126d   : > { %v4137_v60 = vpop.permute.xlu0 %4136 }
0x126e   : > { %v4133_v5 = vpop.permute.xlu1 %4132 }
0x1271   : > { %v4007_v6 = vpop.permute.xlu0 %4006 }
0x1272   : > { %v4014_v7 = vsel %vm874_vm3, %v4005_v54, %v4007_v6  ;;  %v4015_v58 = vsel %vm874_vm3, %v4007_v6, %v4009_v51  ;;  %v4135_v8 = vpop.permute.xlu1 %4134  ;;  %v4747_v6 = vld [vmem:[%s6230_s4 + $0x4] sm:$0xf] }
0x1273   : > { %4029 = vmatprep.subr.bf16.mxu1 %v4015_v58  ;;  %v4151_v9 = vsel %vm1086_vm7, %v4135_v8, %v4137_v60  ;;  %v4150_v63 = vsel %vm1086_vm7, %v4133_v5, %v4135_v8  ;;  %v4405_v58 = vld [vmem:[#allocation2 + $0x58] sm:$0xff]  ;;  %v4493_v8 = vld [vmem:[%s6165_s21] sm:$0xff] }
0x1274   : > { %4030 = vmatpush1.bf16.msra.mxu1 %v4014_v7  ;;  %v4402_v7 = vld [vmem:[#allocation2 + $0x38] sm:$0xff] }
0x1275   : > { %v4141_v11 = vpop.permute.xlu0 %4140  ;;  %4165 = vmatprep.subr.bf16.mxu1 %v4151_v9  ;;  %v4506_v9 = vld [vmem:[%s6171_s27] sm:$0xff] }
0x1276   : > { %v4143_v16 = vpop.permute.xlu1 %4142 }
0x1277   : > { %4743 = vmatmul.mubr.msk.bf16.vlgmr.msra.gmra.mrb[60].mxu1 %vm946_vm6, %v3979_v10  ;;  %v4153_v22 = vsel %vm1086_vm7, %v4141_v11, %v4143_v16 }
0x1278   : > { %4166 = vmatpush1.bf16.msra.mxu1 %v4150_v63  ;;  %4197 = vmatprep.mubr.bf16.mxu1 %v4808_v0 }
0x1279   : > { %v4139_v32 = vpop.permute.xlu0 %4138  ;;  %4167 = vmatprep.subr.bf16.mxu1 %v4153_v22 }
0x127a   : > { %v4152_v33 = vsel %vm1086_vm7, %v4139_v32, %v4141_v11  ;;  %v4147_v34 = vpop.permute.xlu1 %4146 }
0x127c   : > { %4168 = vmatpush1.bf16.msra.mxu1 %v4152_v33 }
0x127d   : > { %v4149_v35 = vpop.permute.xlu0 %4148 }
0x127e   : > { %v4155_v1 = vsel %vm1086_vm7, %v4147_v34, %v4149_v35  ;;  %v4145_v2 = vpop.permute.xlu1 %4144 }
0x127f   : > { %4169 = vmatprep.subr.bf16.mxu1 %v4155_v1  ;;  %v4154_v23 = vsel %vm1086_vm7, %v4145_v2, %v4147_v34 }
0x1280   : > { %4170 = vmatpush1.bf16.msra.mxu1 %v4154_v23 }
0x1283   : > { %4746 = vmatmul.mubr.msk.bf16.vlgmr.msra.gmra.mrb[64].mxu1 %vm946_vm6, %v4745_v24 }
0x1284   : > { %4386 = vmatprep.mubr.bf16.mxu1 %v4808_v0 }
0x128e   : > { %v4214_v18 = vpop.permute.xlu0 %4213 }
0x12d1   : > { %v4105_v25 = vpop.f32.mrb[68].mxu0 }
0x12d2   : > { %v4107_v26 = vpop.f32.mrb[69].mxu0 }
0x12d3   : > { %v4109_v27 = vpop.f32.mrb[70].mxu0 }
0x12d4   : > { %v4110_v28 = vpop.f32.mrb[71].mxu0 }
0x134a   : > { %v4059_v30 = vpop.f32.mrb[60].mxu1 }
0x134b   : > { %v4066_v31 = vmul.f32 %v4059_v30, %v5091_v3  ;;  %v4061_v36 = vpop.f32.mrb[61].mxu1 }
0x134c   : > { %v4067_v37 = vmul.f32 %v4061_v36, %v5093_v4  ;;  %v4063_v38 = vpop.f32.mrb[62].mxu1  ;;  %v4262_v36 = vld [vmem:[%s6230_s4] sm:$0xf] }
0x134d   : > { %v4064_v17 = vpop.f32.mrb[63].mxu1  ;;  %v4106_v39 = vadd.f32 %v4105_v25, %v4066_v31 }
0x134e   : > { %v4108_v45 = vadd.f32 %v4107_v26, %v4067_v37 }
0x1356   : > { %v4199_v46 = vpop.f32.mrb[64].mxu1 }
0x1357   : > { %v4206_v47 = vmul.f32 %v4199_v46, %v5100_v14  ;;  %v4201_v48 = vpop.f32.mrb[65].mxu1 }
0x1358   : > { %v4207_v40 = vmul.f32 %v4201_v48, %v5102_v15  ;;  %v4203_v20 = vpop.f32.mrb[66].mxu1 }
0x1359   : > { %v4208_v21 = vadd.f32 %v4206_v47, %v4106_v39  ;;  %v4204_v19 = vpop.f32.mrb[67].mxu1 }
0x135a   : > { %v4209_v13 = vadd.f32 %v4207_v40, %v4108_v45  ;;  %v4750_v19 = vld [vmem:[%s6230_s4 + $0x8] sm:$0xf] }
0x135b   : > { %v4216_v12 = vadd.f32 %v4214_v18, %v4208_v21 }
0x135c   : > { %v4217_v41 = vadd.f32 %v4214_v18, %v4209_v13 }
0x135d   : > { %v4218_v42 = vmax.f32 %v4216_v12, 0.0 }
0x135e   : > { %v4219_v43 = vmax.f32 %v4217_v41, 0.0 }
0x135f   : > { %v4220_v44 = vpack.c.bf16 %v4813_v29, %v4218_v42 }
0x1360   : > { %v4221_v52 = vpack.c.bf16 %v4813_v29, %v4219_v43 }
0x1361   : > { %4239 = vst [vmem:[#allocation2 + $0x28] sm:$0xff] %v4220_v44  ;;  %4226 = vrot.lane.b32.xlu1 %v4220_v44, %s6222_s0 }
0x1362   : > { %4228 = vrot.lane.b32.xlu0 %v4221_v52, %s6222_s0 }
0x1365   : > { %4243 = vrot.lane.b32.xlu1 %v4220_v44, %s6223_s29 }
0x1366   : > { %4245 = vrot.lane.b32.xlu0 %v4221_v52, %s6223_s29 }
0x1369   : > { %4275 = vrot.lane.b32.xlu1 %v4263_v53, %s6224_s1 }
0x136a   : > { %4281 = vrot.lane.b32.xlu0 %v4264_v49, %s6224_s1 }
0x136d   : > { %4285 = vrot.lane.b32.xlu1 %v4221_v52, %s6224_s1 }
0x136e   : > { %4283 = vrot.lane.b32.xlu0 %v4220_v44, %s6224_s1 }
0x13d3   : > { %v4227_v29 = vpop.permute.xlu1 %4226 }
0x13d4   : > { %4234 = vst.msk [vmem:[#allocation2 + $0x8] sm:$0xff] %vm869_vm4, %v4227_v29  ;;  %v4229_v55 = vpop.permute.xlu0 %4228 }
0x13d5   : > { %v4230_v56 = vsel %vm856_vm0, %v4227_v29, %v4229_v55  ;;  %4236 = vst.msk [vmem:[#allocation2 + $0x18] sm:$0xff] %vm856_vm0, %v4229_v55 }
0x13d6   : > { %4354 = vmatprep.subr.bf16.mxu1 %v4230_v56  ;;  %4279 = vrot.lane.b32.xlu0 %v4230_v56, %s6224_s1 }
0x13d7   : > { %v4244_v57 = vpop.permute.xlu1 %4243 }
0x13d8   : > { %4251 = vst.msk [vmem:[#allocation2 + $0x40] sm:$0xff] %vm878_vm1, %v4244_v57  ;;  %v4246_v50 = vpop.permute.xlu0 %4245 }
0x13d9   : > { %v4247_v54 = vsel %vm885_vm5, %v4244_v57, %v4246_v50  ;;  %4253 = vst.msk [vmem:[#allocation2 + $0x50] sm:$0xff] %vm885_vm5, %v4246_v50 }
0x13db   : > { %v4256_v51 = vld [vmem:[#allocation2 + $0x8] sm:$0xff]  ;;  %v4276_v10 = vpop.permute.xlu1 %4275 }
0x13dc   : > { %4277 = vrot.lane.b32.xlu1 %v4256_v51, %s6224_s1  ;;  %4355 = vmatpush1.bf16.msra.mxu1 %v4256_v51  ;;  %v4399_v5 = vld [vmem:[#allocation2 + $0x18] sm:$0xff]  ;;  %v4282_v11 = vpop.permute.xlu0 %4281 }
0x13dd   : > { %4356 = vmatprep.subr.bf16.mxu1 %v4221_v52 }
0x13df   : > { %v4265_v59 = vld [vmem:[#allocation2 + $0x40] sm:$0xff]  ;;  %v4286_v16 = vpop.permute.xlu1 %4285 }
0x13e0   : > { %4287 = vrot.lane.b32.xlu1 %v4265_v59, %s6224_s1  ;;  %v4261_v60 = vld [vmem:[#allocation2 + $0x50] sm:$0xff]  ;;  %4357 = vmatpush1.bf16.msra.mxu1 %v4220_v44  ;;  %v4284_v63 = vpop.permute.xlu0 %4283 }
0x13e1   : > { %4291 = vrot.lane.b32.xlu0 %v4261_v60, %s6224_s1  ;;  %4358 = vmatprep.subr.bf16.mxu1 %v4261_v60  ;;  %v4296_v35 = vsel %vm874_vm3, %v4284_v63, %v4286_v16  ;;  %v4295_v23 = vsel %vm874_vm3, %v4282_v11, %v4284_v63 }
0x13e4   : > { %4419 = vrot.lane.b32.xlu1 %v4399_v5, %s6226_s13  ;;  %4359 = vmatpush1.bf16.msra.mxu1 %v4247_v54 }
0x13e5   : > { %4415 = vrot.lane.b32.xlu0 %v4256_v51, %s6226_s13 }
0x13e7   : > { %4749 = vmatmul.mubr.msk.bf16.vlgmr.msra.gmra.mrb[68].mxu1 %vm946_vm6, %v4747_v6 }
0x13e8   : > { %4289 = vrot.lane.b32.xlu1 %v4247_v54, %s6224_s1  ;;  %4555 = vmatprep.mubr.bf16.mxu1 %v4808_v0  ;;  %s4647_s1 = sshll.u32 %s6232_s5, 1 }
0x13e9   : > { %4417 = vrot.lane.b32.xlu0 %v4230_v56, %s6226_s13 }
0x13ec   : > { %4423 = vrot.lane.b32.xlu1 %v4221_v52, %s6226_s13 }
0x13ed   : > { %4425 = vrot.lane.b32.xlu0 %v4402_v7, %s6226_s13 }
0x13f0   : > { %4421 = vrot.lane.b32.xlu1 %v4220_v44, %s6226_s13 }
0x13f1   : > { %4429 = vrot.lane.b32.xlu0 %v4261_v60, %s6226_s13 }
0x13f4   : > { %4431 = vrot.lane.b32.xlu1 %v4405_v58, %s6226_s13 }
0x13f5   : > { %4427 = vrot.lane.b32.xlu0 %v4247_v54, %s6226_s13  ;;  %s843_s13 = scalar_lea.vmem %s6172_s28, %s4647_s1 }
0x13f8   : > { %4496 = vperm.xlu1 %4773, %v4493_v8  }
0x13f9   : > { %4509 = vperm.xlu0 %4772, %v4506_v9  }
0x1448   : > { %v4280_v32 = vpop.permute.xlu0 %4279 }
0x144e   : > { %v4278_v22 = vpop.permute.xlu1 %4277 }
0x144f   : > { %v4293_v33 = vsel %vm874_vm3, %v4276_v10, %v4278_v22  ;;  %v4294_v34 = vsel %vm874_vm3, %v4278_v22, %v4280_v32 }
0x1450   : > { %4308 = vmatprep.subr.bf16.mxu0 %v4294_v34 }
0x1451   : > { %4309 = vmatpush1.bf16.msra.mxu0 %v4293_v33 }
0x1452   : > { %v4288_v1 = vpop.permute.xlu1 %4287  ;;  %4310 = vmatprep.subr.bf16.mxu0 %v4296_v35 }
0x1453   : > { %v4292_v2 = vpop.permute.xlu0 %4291 }
0x1455   : > { %4311 = vmatpush1.bf16.msra.mxu0 %v4295_v23 }
0x1456   : > { %v4420_v24 = vpop.permute.xlu1 %4419 }
0x1457   : > { %v4416_v25 = vpop.permute.xlu0 %4415 }
0x145a   : > { %v4290_v26 = vpop.permute.xlu1 %4289 }
0x145b   : > { %v4297_v27 = vsel %vm874_vm3, %v4288_v1, %v4290_v26  ;;  %v4298_v28 = vsel %vm874_vm3, %v4290_v26, %v4292_v2  ;;  %v4418_v30 = vpop.permute.xlu0 %4417 }
0x145c   : > { %4312 = vmatprep.subr.bf16.mxu0 %v4298_v28  ;;  %v4434_v31 = vsel %vm1086_vm7, %v4418_v30, %v4420_v24  ;;  %v4433_v17 = vsel %vm1086_vm7, %v4416_v25, %v4418_v30 }
0x145d   : > { %4313 = vmatpush1.bf16.msra.mxu0 %v4297_v27 }
0x145e   : > { %v4424_v37 = vpop.permute.xlu1 %4423  ;;  %4448 = vmatprep.subr.bf16.mxu0 %v4434_v31 }
0x145f   : > { %v4426_v38 = vpop.permute.xlu0 %4425 }
0x1460   : > { %4748 = vmatmul.mubr.msk.bf16.vlgmr.msra.gmra.mrb[72].mxu0 %vm946_vm6, %v4262_v36  ;;  %v4436_v39 = vsel %vm1086_vm7, %v4424_v37, %v4426_v38 }
0x1461   : > { %4449 = vmatpush1.bf16.msra.mxu0 %v4433_v17  ;;  %4480 = vmatprep.mubr.bf16.mxu0 %v4808_v0 }
0x1462   : > { %v4422_v45 = vpop.permute.xlu1 %4421  ;;  %4450 = vmatprep.subr.bf16.mxu0 %v4436_v39 }
0x1463   : > { %v4435_v46 = vsel %vm1086_vm7, %v4422_v45, %v4424_v37  ;;  %v4430_v47 = vpop.permute.xlu0 %4429 }
0x1465   : > { %4451 = vmatpush1.bf16.msra.mxu0 %v4435_v46 }
0x1466   : > { %v4432_v48 = vpop.permute.xlu1 %4431 }
0x1467   : > { %v4438_v40 = vsel %vm1086_vm7, %v4430_v47, %v4432_v48  ;;  %v4428_v20 = vpop.permute.xlu0 %4427 }
0x1468   : > { %4452 = vmatprep.subr.bf16.mxu0 %v4438_v40  ;;  %v4437_v21 = vsel %vm1086_vm7, %v4428_v20, %v4430_v47 }
0x1469   : > { %4453 = vmatpush1.bf16.msra.mxu0 %v4437_v21 }
0x146c   : > { %4751 = vmatmul.mubr.msk.bf16.vlgmr.msra.gmra.mrb[76].mxu0 %vm946_vm6, %v4750_v19 }
0x1477   : > { %v4497_v60 = vpop.permute.xlu1 %4496 }
0x1478   : > { %v4510_v16 = vpop.permute.xlu0 %4509 }
0x14ba   : > { %v4388_v0 = vpop.f32.mrb[68].mxu1 }
0x14bb   : > { %v4390_v18 = vpop.f32.mrb[69].mxu1 }
0x14bc   : > { %v4392_v13 = vpop.f32.mrb[70].mxu1 }
0x14bd   : > { %v4393_v12 = vpop.f32.mrb[71].mxu1 }
0x1533   : > { %v4342_v41 = vpop.f32.mrb[72].mxu0 }
0x1534   : > { %v4349_v42 = vmul.f32 %v4342_v41, %v5091_v3  ;;  %v4344_v43 = vpop.f32.mrb[73].mxu0 }
0x1535   : > { %v4350_v44 = vmul.f32 %v4344_v43, %v5093_v4  ;;  %v4346_v52 = vpop.f32.mrb[74].mxu0 }
0x1536   : > { %v4347_v53 = vpop.f32.mrb[75].mxu0  ;;  %v4389_v49 = vadd.f32 %v4388_v0, %v4349_v42 }
0x1537   : > { %v4391_v29 = vadd.f32 %v4390_v18, %v4350_v44 }
0x153f   : > { %v4482_v55 = vpop.f32.mrb[76].mxu0 }
0x1540   : > { %v4489_v56 = vmul.f32 %v4482_v55, %v5100_v14  ;;  %v4484_v57 = vpop.f32.mrb[77].mxu0  ;;  %v4503_v14 = vld [vmem:[%s6170_s26] sm:$0xf] }
0x1541   : > { %v4490_v50 = vmul.f32 %v4484_v57, %v5102_v15  ;;  %v4486_v54 = vpop.f32.mrb[78].mxu0  ;;  %v4814_v15 = vmov 1966171168  }
0x1542   : > { %v4491_v51 = vadd.f32 %v4489_v56, %v4389_v49  ;;  %v4487_v59 = vpop.f32.mrb[79].mxu0  ;;  %v4568_v10 = vunpack.c.l.s4 %v4814_v15 }
0x1543   : > { %v4492_v5 = vadd.f32 %v4490_v50, %v4391_v29 }
0x1544   : > { %v4499_v6 = vadd.f32 %v4497_v60, %v4491_v51  ;;  %v4569_v11 = vunpack.c.0.s8 %v4568_v10 }
0x1545   : > { %v4500_v3 = vadd.f32 %v4497_v60, %v4492_v5 }
0x1546   : > { %v4501_v7 = vmax.f32 %v4499_v6, 0.0  ;;  %v4572_v34 = vsub.s32 %v4569_v11, %v5084_v62 }
0x1547   : > { %v4502_v58 = vmax.f32 %v4500_v3, 0.0 }
0x1548   : > { %v4504_v4 = vpack.c.bf16 %v4501_v7, %v4501_v7 }
0x1549   : > { %v4505_v8 = vpack.c.bf16 %v4502_v58, %v4502_v58 }
0x154a   : > { %v4518_v9 = vsel %vm4516_vm10, %v4504_v4, 0 }
0x154b   : > { %4752 = vmatprep.subr.msk.bf16.mxu1 %vm4516_vm10, %v4505_v8 }
0x154c   : > { %4524 = vmatpush1.bf16.msra.mxu1 %v4518_v9 }
0x154f   : > { %4753 = vmatmul.mubr.msk.bf16.vlgmr.msra.gmra.mrb[72].mxu1 %vm4512_vm11, %v4503_v14 }
0x1622   : > { %v4557_v63 = vpop.f32.mrb[72].mxu1 }
0x1623   : > { %v4558_v22 = vadd.f32 %v4557_v63, %v4510_v16  ;;  %v4559_v32 = vpop.f32.mrb[73].mxu1 }
0x1624   : > { %v4560_v33 = vadd.f32 %v4559_v32, %v4510_v16  ;;  %v4561_v35 = vpop.f32.mrb[74].mxu1 }
0x1625   : > { %v4562_v1 = vpop.f32.mrb[75].mxu1 }
0x1626   : > { %v4566_v2 = vcombine.low %v4558_v22, %v4560_v33 }
0x1628   : > { %v4573_v23 = vrot.slane %v4566_v2, %v4572_v34 }
0x162a   : > { %v4580_v24 = vrot.slane %v4573_v23, %v4572_v34 }
0x162c   : > { %4586 = vst.msk [vmem:[%s843_s13] sm:$0x3] %vm4584_vm12, %v4580_v24 }
0x162d PF: > { %s38_s8 = sadd.s32 1, %s4806_s8  }
0x162e   : > { %p35_p4 = scmp.ge.s32.totalorder %s38_s8, 4  }
0x1630   :  { %37 = sbr.rel (!%p35_p4) target bundleno = 16 (0x10), region = 183 }

</bundles_post_ra>
